<compile_context>
chip_gen: v5e
topology: v5e:2x2
jax: 0.10.0
libtpu: 0.0.40
codegen_flags: <defaults>
</compile_context>

<pallas_src>
import functools

import jax
import jax.numpy as jnp
from jax import lax
from jax.experimental import pallas as pl
from jax.experimental.pallas import tpu as pltpu


def _round_up(x, m):
    return ((x + m - 1) // m) * m


def discriminator_kernel(x_ref, w1_ref, b1_ref, w2_ref, b2_ref, w3_ref, b3_ref,
                         o_ref, *, bf16_epilogue):
    # Layer 1: h1^T = W1 @ x^T, expressed as a dot_general contracting the
    # feature dim of both operands so x stays in its natural (TILE_B, D)
    # layout (no HBM transpose in the wrapper) while the result keeps the
    # batch on lanes: (512, TILE_B).  bf16 operands, f32 accumulation.
    h1 = lax.dot_general(w1_ref[...], x_ref[...],
                         (((1,), (1,)), ((), ())),
                         preferred_element_type=jnp.float32)
    if bf16_epilogue:
        # v6e/v7x: bf16 VALU runs 2x packed -> halves the dominant epilogue
        # vreg-op count and the h1/h2 store traffic.
        h1 = h1.astype(jnp.bfloat16) + b1_ref[...]
        h1 = jnp.maximum(h1, 0.2 * h1)          # LeakyReLU(0.2): mul + max
    else:
        h1 = h1 + b1_ref[...]
        h1 = jnp.maximum(h1, 0.2 * h1)
        h1 = h1.astype(jnp.bfloat16)

    # Layer 2: (256, 512) @ (512, TILE_B) -> (256, TILE_B).
    h2 = jnp.dot(w2_ref[...], h1, preferred_element_type=jnp.float32)
    if bf16_epilogue:
        h2 = h2.astype(jnp.bfloat16) + b2_ref[...]
        h2 = jnp.maximum(h2, 0.2 * h2)
        # Layer 3 (out_features=1) on the MXU (which has slack on v6e/v7x):
        # w3 is pre-padded to an (8, 256) bf16 block, only row 0 is real.
        h3 = jnp.dot(w3_ref[...], h2, preferred_element_type=jnp.float32)[0:1, :]
    else:
        h2 = h2 + b2_ref[...]
        h2 = jnp.maximum(h2, 0.2 * h2)
        # v5e: MXU is the binding unit; keep the head as a VPU/XLU weighted
        # sublane reduction. Result is already lane-dense (1, TILE_B).
        h3 = jnp.sum(h2 * w3_ref[...], axis=0, keepdims=True)

    h3 = h3 + b3_ref[...]
    o_ref[...] = jax.nn.sigmoid(h3).astype(o_ref.dtype)


def _bf16_epilogue_default():
    """bf16 epilogue + MXU head on v6e/v7x; f32 epilogue + VPU head on v5e and
    older generations (no bf16 VALU there, and the MXU is the binding unit)."""
    try:
        kind = jax.devices()[0].device_kind.lower()
    except Exception:
        return True
    return not any(tag in kind for tag in ("v2", "v3", "v4", "v5"))


def discriminator_forward(x, params, *, tile_b=2048, bf16_epilogue=None):
    """x: (B, input_dim).  params in PyTorch nn.Linear orientation:
    w1 (512, D), b1 (512,), w2 (256, 512), b2 (256,), w3 (1, 256), b3 (1,)."""
    if bf16_epilogue is None:
        bf16_epilogue = _bf16_epilogue_default()

    B, D = x.shape
    w1, b1 = params["w1"], params["b1"]
    w2, b2 = params["w2"], params["b2"]
    w3, b3 = params["w3"], params["b3"]

    LANE = 256                                   # v6e/v7x MXU is 256 wide in N
    b_lanes = _round_up(B, LANE)

    tile_b_eff = min(_round_up(tile_b, LANE), b_lanes)
    # Keep >= 2 grid steps when the batch is large enough, so both v7x
    # TensorCores get work (the grid axis is marked "parallel").
    if b_lanes >= 2 * LANE:
        tile_b_eff = min(tile_b_eff, _round_up(-(-b_lanes // 2), LANE))

    # VMEM guard (v7x has only 64 MiB): double-buffered x tile + bf16 weights
    # (pipeline buffers) + worst-case f32 h1/h2 intermediates with headroom.
    def _vmem_bytes(tb):
        return (2 * tb * D * 2
                + 2 * (512 * D + 256 * 512) * 2
                + tb * (512 + 256) * 4)
    while tile_b_eff > LANE and _vmem_bytes(tile_b_eff) > (48 << 20):
        tile_b_eff -= LANE

    Bp = _round_up(B, tile_b_eff)
    num_tiles = Bp // tile_b_eff

    # Zero-pad the batch (padding rows give sigmoid(bias), sliced off below);
    # bf16 matmul operands. No transpose of x is materialized.
    xp = jnp.pad(x, ((0, Bp - B), (0, 0))).astype(jnp.bfloat16)

    bias_dt = jnp.bfloat16 if bf16_epilogue else jnp.float32
    w1b = w1.astype(jnp.bfloat16)
    w2b = w2.astype(jnp.bfloat16)
    b1c = b1.reshape(512, 1).astype(bias_dt)
    b2c = b2.reshape(256, 1).astype(bias_dt)
    b3c = b3.reshape(1, 1).astype(jnp.float32)
    if bf16_epilogue:
        # (8, 256) bf16 block for the MXU head; only row 0 is real.
        w3c = jnp.zeros((8, 256), jnp.bfloat16).at[0, :].set(
            w3.reshape(256).astype(jnp.bfloat16))
    else:
        w3c = w3.reshape(256, 1).astype(jnp.float32)

    # Grid-invariant blocks: constant index_map -> fetched once, reused.
    full = lambda arr: pl.BlockSpec(arr.shape, lambda i: (0, 0))

    head_flops = 2 * Bp * 256 * (8 if bf16_epilogue else 1)
    flops = 2 * Bp * (D * 512 + 512 * 256) + head_flops
    bytes_accessed = int(
        xp.size * 2 + w1b.size * 2 + w2b.size * 2
        + b1c.size * b1c.dtype.itemsize + b2c.size * b2c.dtype.itemsize
        + w3c.size * w3c.dtype.itemsize + b3c.size * 4
        + Bp * 4)
    cost = pl.CostEstimate(flops=flops, transcendentals=Bp,
                           bytes_accessed=bytes_accessed)

    kernel = functools.partial(discriminator_kernel, bf16_epilogue=bf16_epilogue)

    out = pl.pallas_call(
        kernel,
        out_shape=jax.ShapeDtypeStruct((1, Bp), jnp.float32),
        grid_spec=pltpu.PrefetchScalarGridSpec(
            num_scalar_prefetch=0,
            grid=(num_tiles,),
            in_specs=[
                pl.BlockSpec((tile_b_eff, D), lambda i: (i, 0)),   # x tile
                full(w1b), full(b1c),
                full(w2b), full(b2c),
                full(w3c), full(b3c),
            ],
            out_specs=pl.BlockSpec((1, tile_b_eff), lambda i: (0, i)),
        ),
        compiler_params=pltpu.CompilerParams(
            dimension_semantics=("parallel",),   # shards grid steps across TCs
        ),
        cost_estimate=cost,
    )(xp, w1b, b1c, w2b, b2c, w3c, b3c)

    return out[0, :B].reshape(B, 1)


def init_params(key, input_dim):
    """PyTorch nn.Linear-style init: U(-1/sqrt(fan_in), 1/sqrt(fan_in))."""
    dims = [(input_dim, 512), (512, 256), (256, 1)]
    params = {}
    for idx, (fan_in, fan_out) in enumerate(dims, start=1):
        key, kw, kb = jax.random.split(key, 3)
        bound = 1.0 / (fan_in ** 0.5)
        params[f"w{idx}"] = jax.random.uniform(
            kw, (fan_out, fan_in), jnp.float32, -bound, bound)
        params[f"b{idx}"] = jax.random.uniform(
            kb, (fan_out,), jnp.float32, -bound, bound)
    return params


def reference_forward(x, params):
    h = x @ params["w1"].T + params["b1"]
    h = jnp.maximum(h, 0.2 * h)
    h = h @ params["w2"].T + params["b2"]
    h = jnp.maximum(h, 0.2 * h)
    h = h @ params["w3"].T + params["b3"]
    return jax.nn.sigmoid(h)


if __name__ == "__main__":
    key = jax.random.PRNGKey(0)
    k_x, k_p = jax.random.split(key)

    B, INPUT_DIM = 8, 64
    x = jax.random.normal(k_x, (B, INPUT_DIM), jnp.float32)
    params = init_params(k_p, INPUT_DIM)

    out = discriminator_forward(x, params)
    out = jax.block_until_ready(out)

    ref = reference_forward(x, params)
    assert out.shape == (B, 1)
    max_err = float(jnp.max(jnp.abs(out - ref)))
    # bf16 matmul operands / bf16 epilogue (f32 accumulation) loosen the
    # tolerance vs pure f32; post-sigmoid the error stays well below this.
    assert max_err < 2e-2, f"mismatch vs JAX reference: max abs err {max_err}"

    print("KERNEL_OK")
</pallas_src>

<mosaic_0001>
module attributes {stable_mosaic.version = 11 : i64} {
  func.func @discriminator_kernel(%arg0: i32, %arg1: memref<256x64xbf16, #tpu.memory_space<vmem>>, %arg2: memref<512x64xbf16, #tpu.memory_space<vmem>>, %arg3: memref<512x1xbf16, #tpu.memory_space<vmem>>, %arg4: memref<256x512xbf16, #tpu.memory_space<vmem>>, %arg5: memref<256x1xbf16, #tpu.memory_space<vmem>>, %arg6: memref<8x256xbf16, #tpu.memory_space<vmem>>, %arg7: memref<1x1xf32, #tpu.memory_space<vmem>>, %arg8: memref<1x256xf32, #tpu.memory_space<vmem>>) attributes {dimension_semantics = [#tpu.dimension_semantics<parallel>], iteration_bounds = array<i64: 1>, scalar_prefetch = 0 : i64, scratch_operands = 0 : i64, tpu.core_type = #tpu.core_type<tc>, window_params = [{transform_indices = @transform_0, window_bounds = array<i64: 256, 64>}, {pipeline_mode = #tpu.pipeline_mode<synchronous>, transform_indices = @transform_1, window_bounds = array<i64: 512, 64>}, {pipeline_mode = #tpu.pipeline_mode<synchronous>, transform_indices = @transform_2, window_bounds = array<i64: 512, 1>}, {pipeline_mode = #tpu.pipeline_mode<synchronous>, transform_indices = @transform_3, window_bounds = array<i64: 256, 512>}, {pipeline_mode = #tpu.pipeline_mode<synchronous>, transform_indices = @transform_4, window_bounds = array<i64: 256, 1>}, {pipeline_mode = #tpu.pipeline_mode<synchronous>, transform_indices = @transform_5, window_bounds = array<i64: 8, 256>}, {pipeline_mode = #tpu.pipeline_mode<synchronous>, transform_indices = @transform_6, window_bounds = array<i64: 1, 1>}, {transform_indices = @transform_7, window_bounds = array<i64: 1, 256>}]} {
    %c0 = arith.constant 0 : index
    %c0_0 = arith.constant 0 : index
    %0 = vector.load %arg2[%c0, %c0_0] : memref<512x64xbf16, #tpu.memory_space<vmem>>, vector<512x64xbf16>
    %c0_1 = arith.constant 0 : index
    %c0_2 = arith.constant 0 : index
    %1 = vector.load %arg1[%c0_1, %c0_2] : memref<256x64xbf16, #tpu.memory_space<vmem>>, vector<256x64xbf16>
    %cst = arith.constant dense<0.000000e+00> : vector<512x256xf32>
    %2 = tpu.matmul %0, %1, %cst {dimension_numbers = #tpu.dot_dimension_numbers<[1], [1], [0], [0], [0, 0, 1, 0], [], []>} : vector<512x64xbf16>, vector<256x64xbf16>, vector<512x256xf32> -> vector<512x256xf32>
    %3 = arith.truncf %2 : vector<512x256xf32> to vector<512x256xbf16>
    %c0_3 = arith.constant 0 : index
    %c0_4 = arith.constant 0 : index
    %4 = vector.load %arg3[%c0_3, %c0_4] : memref<512x1xbf16, #tpu.memory_space<vmem>>, vector<512x1xbf16>
    %5 = vector.broadcast %4 : vector<512x1xbf16> to vector<512x256xbf16>
    %6 = arith.addf %3, %5 : vector<512x256xbf16>
    %cst_5 = arith.constant 2.001950e-01 : bf16
    %7 = vector.broadcast %cst_5 : bf16 to vector<512x256xbf16>
    %8 = arith.mulf %7, %6 : vector<512x256xbf16>
    %9 = arith.maximumf %6, %8 : vector<512x256xbf16>
    %c0_6 = arith.constant 0 : index
    %c0_7 = arith.constant 0 : index
    %10 = vector.load %arg4[%c0_6, %c0_7] : memref<256x512xbf16, #tpu.memory_space<vmem>>, vector<256x512xbf16>
    %cst_8 = arith.constant dense<0.000000e+00> : vector<256x256xf32>
    %11 = tpu.matmul %10, %9, %cst_8 {dimension_numbers = #tpu.dot_dimension_numbers<[1], [0], [0], [1], [0, 0, 1, 1], [], []>} : vector<256x512xbf16>, vector<512x256xbf16>, vector<256x256xf32> -> vector<256x256xf32>
    %12 = arith.truncf %11 : vector<256x256xf32> to vector<256x256xbf16>
    %c0_9 = arith.constant 0 : index
    %c0_10 = arith.constant 0 : index
    %13 = vector.load %arg5[%c0_9, %c0_10] : memref<256x1xbf16, #tpu.memory_space<vmem>>, vector<256x1xbf16>
    %14 = vector.broadcast %13 : vector<256x1xbf16> to vector<256x256xbf16>
    %15 = arith.addf %12, %14 : vector<256x256xbf16>
    %cst_11 = arith.constant 2.001950e-01 : bf16
    %16 = vector.broadcast %cst_11 : bf16 to vector<256x256xbf16>
    %17 = arith.mulf %16, %15 : vector<256x256xbf16>
    %18 = arith.maximumf %15, %17 : vector<256x256xbf16>
    %c0_12 = arith.constant 0 : index
    %c0_13 = arith.constant 0 : index
    %19 = vector.load %arg6[%c0_12, %c0_13] : memref<8x256xbf16, #tpu.memory_space<vmem>>, vector<8x256xbf16>
    %cst_14 = arith.constant dense<0.000000e+00> : vector<8x256xf32>
    %20 = tpu.matmul %19, %18, %cst_14 {dimension_numbers = #tpu.dot_dimension_numbers<[1], [0], [0], [1], [0, 0, 1, 1], [], []>} : vector<8x256xbf16>, vector<256x256xbf16>, vector<8x256xf32> -> vector<8x256xf32>
    %21 = vector.extract_strided_slice %20 {offsets = [0, 0], sizes = [1, 256], strides = [1, 1]} : vector<8x256xf32> to vector<1x256xf32>
    %c0_15 = arith.constant 0 : index
    %c0_16 = arith.constant 0 : index
    %22 = vector.load %arg7[%c0_15, %c0_16] : memref<1x1xf32, #tpu.memory_space<vmem>>, vector<1x1xf32>
    %23 = vector.broadcast %22 : vector<1x1xf32> to vector<1x256xf32>
    %24 = arith.addf %21, %23 : vector<1x256xf32>
    %25 = arith.negf %24 : vector<1x256xf32>
    %26 = math.exp %25 : vector<1x256xf32>
    %cst_17 = arith.constant 1.000000e+00 : f32
    %27 = vector.broadcast %cst_17 : f32 to vector<1x256xf32>
    %28 = arith.addf %27, %26 : vector<1x256xf32>
    %29 = arith.divf %27, %28 : vector<1x256xf32>
    %c0_18 = arith.constant 0 : index
    %c0_19 = arith.constant 0 : index
    %30 = vector.load %arg8[%c0_18, %c0_19] : memref<1x256xf32, #tpu.memory_space<vmem>>, vector<1x256xf32>
    tpu.vector_store %arg8[%c0_18, %c0_19], %29 {strides = array<i32>} : memref<1x256xf32, #tpu.memory_space<vmem>>, vector<1x256xf32>,
    return
  }
  func.func @transform_0(%arg0: i32) -> (i32, i32) {
    %c0_i32 = arith.constant 0 : i32
    %c0_i32_0 = arith.constant 0 : i32
    return %arg0, %c0_i32 : i32, i32
  }
  func.func @transform_1(%arg0: i32) -> (i32, i32) {
    %c0_i32 = arith.constant 0 : i32
    %c0_i32_0 = arith.constant 0 : i32
    %c0_i32_1 = arith.constant 0 : i32
    return %c0_i32, %c0_i32_0 : i32, i32
  }
  func.func @transform_2(%arg0: i32) -> (i32, i32) {
    %c0_i32 = arith.constant 0 : i32
    %c0_i32_0 = arith.constant 0 : i32
    %c0_i32_1 = arith.constant 0 : i32
    return %c0_i32, %c0_i32_0 : i32, i32
  }
  func.func @transform_3(%arg0: i32) -> (i32, i32) {
    %c0_i32 = arith.constant 0 : i32
    %c0_i32_0 = arith.constant 0 : i32
    %c0_i32_1 = arith.constant 0 : i32
    return %c0_i32, %c0_i32_0 : i32, i32
  }
  func.func @transform_4(%arg0: i32) -> (i32, i32) {
    %c0_i32 = arith.constant 0 : i32
    %c0_i32_0 = arith.constant 0 : i32
    %c0_i32_1 = arith.constant 0 : i32
    return %c0_i32, %c0_i32_0 : i32, i32
  }
  func.func @transform_5(%arg0: i32) -> (i32, i32) {
    %c0_i32 = arith.constant 0 : i32
    %c0_i32_0 = arith.constant 0 : i32
    %c0_i32_1 = arith.constant 0 : i32
    return %c0_i32, %c0_i32_0 : i32, i32
  }
  func.func @transform_6(%arg0: i32) -> (i32, i32) {
    %c0_i32 = arith.constant 0 : i32
    %c0_i32_0 = arith.constant 0 : i32
    %c0_i32_1 = arith.constant 0 : i32
    return %c0_i32, %c0_i32_0 : i32, i32
  }
  func.func @transform_7(%arg0: i32) -> (i32, i32) {
    %c0_i32 = arith.constant 0 : i32
    %c0_i32_0 = arith.constant 0 : i32
    return %c0_i32, %arg0 : i32, i32
  }
}

</mosaic_0001>

<bundles_post_ra>
// kernel: tpu_custom_call.1
= control target key start
LH: loop header
LB: loop body
LE: loop exit
PB: predicated region body
PF: predicated region fallthrough
CT: control target
= control target key end

     0   :  { %s8036_s0 = inlined_call_operand.vmem [shape: bf16[256,64], index: 0, kind: input, shape index: {}]   ;;  %s8037_s1 = inlined_call_operand.vmem [shape: bf16[512,64], index: 1, kind: input, shape index: {}]   ;;  %s8038_s2 = inlined_call_operand.vmem [shape: bf16[512,1], index: 2, kind: input, shape index: {}]   ;;  %s8039_s3 = inlined_call_operand.vmem [shape: bf16[256,512], index: 3, kind: input, shape index: {}]   ;;  %s8040_s4 = inlined_call_operand.vmem [shape: bf16[256,1], index: 4, kind: input, shape index: {}]   ;;  %s8041_s5 = inlined_call_operand.vmem [shape: bf16[8,256], index: 5, kind: input, shape index: {}]   ;;  %s8042_s6 = inlined_call_operand.<no memory space> [shape: f32[1,1], index: 6, kind: input, shape index: {}]   ;;  %s8043_s7 = inlined_call_operand.hbm [shape: f32[1,256], index: 7, kind: output, shape index: {}]  }
   0x1   :  { %v12_v0 = vstv %s8042_s6 }
   0x2   :  { %13 = vst [vmem:[#allocation2] sm:$0x1] %v12_v0 }
   0x3   :  { %v5223_v1 = vld [vmem:[%s8036_s0 + $0x38] sm:$0xff]  ;;  %vm365_vm0 = vcmask 523264   ;;  %v5336_v4 = vmov 0   ;;  %v5222_v8 = vld [vmem:[%s8036_s0 + $0x30] sm:$0xff] }
   0x4   :  { %v5231_v2 = vld [vmem:[%s8036_s0 + $0x78] sm:$0xff]  ;;  %5300 = vset.pattern.permute.xlu1 %v5336_v4  ;;  %5299 = vset.pattern.permute.xlu0 %v5336_v4  ;;  %v484_v5 = vsel %vm365_vm0, %v5223_v1, 0  ;;  %v5230_v9 = vld [vmem:[%s8036_s0 + $0x70] sm:$0xff]  ;;  %v481_v12 = vsel %vm365_vm0, %v5222_v8, 0 }
   0x5   :  { %v942_v3 = vld [vmem:[%s8038_s2 + $0x78] sm:$0xf]  ;;  %v508_v6 = vsel %vm365_vm0, %v5231_v2, 0  ;;  %5301 = vset.pattern.permute.xlu2 %v5336_v4  ;;  %510 = vmatpush.bf16.xpose.msra.mxu0 %v484_v5  ;;  %v924_v10 = vld [vmem:[%s8038_s2 + $0x30] sm:$0xf]  ;;  %v505_v13 = vsel %vm365_vm0, %v5230_v9, 0 }
   0x6   :  { %1248 = vperm.xlu1 %5300, %v942_v3   ;;  %v926_v7 = vld [vmem:[%s8038_s2 + $0x38] sm:$0xf]  ;;  %679 = vmatpush.bf16.xpose.msra.mxu1 %v508_v6  ;;  %v943_v11 = vld [vmem:[%s8038_s2 + $0x7c] sm:$0xf] }
   0x7   :  { %1104 = vperm.xlu0 %5299, %v926_v7   ;;  %1086 = vperm.xlu2 %5301, %v924_v10  }
   0x8   :  { %14 = vsyncpa [#allocation4], 0  ;;  %v927_v14 = vld [vmem:[%s8038_s2 + $0x3c] sm:$0xf]  ;;  %v5221_v15 = vld [vmem:[%s8036_s0 + $0x28] sm:$0xff]  ;;  %s4661_s20 = sshll.u32 %s8043_s7, 4  ;;  %s4662_s20 = int_to_ptr.hbm [resolvable:$true] %s4661_s20 }
   0x9   :  { %v5229_v16 = vld [vmem:[%s8036_s0 + $0x68] sm:$0xff]  ;;  %v925_v17 = vld [vmem:[%s8038_s2 + $0x34] sm:$0xf]  ;;  %v478_v19 = vsel %vm365_vm0, %v5221_v15, 0  ;;  %v940_v21 = vld [vmem:[%s8038_s2 + $0x70] sm:$0xf] }
   0xa   :  { %v941_v18 = vld [vmem:[%s8038_s2 + $0x74] sm:$0xf]  ;;  %v502_v20 = vsel %vm365_vm0, %v5229_v16, 0  ;;  %v5220_v22 = vld [vmem:[%s8036_s0 + $0x20] sm:$0xff]  ;;  %v922_v24 = vld [vmem:[%s8038_s2 + $0x28] sm:$0xf] }
   0xb   :  { %v5228_v23 = vld [vmem:[%s8036_s0 + $0x60] sm:$0xff]  ;;  %v938_v25 = vld [vmem:[%s8038_s2 + $0x68] sm:$0xf]  ;;  %v475_v26 = vsel %vm365_vm0, %v5220_v22, 0  ;;  %v923_v28 = vld [vmem:[%s8038_s2 + $0x2c] sm:$0xf] }
   0xc   :  { %v499_v27 = vsel %vm365_vm0, %v5228_v23, 0  ;;  %v5219_v29 = vld [vmem:[%s8036_s0 + $0x18] sm:$0xff]  ;;  %v939_v31 = vld [vmem:[%s8038_s2 + $0x6c] sm:$0xf]  ;;  %v921_v32 = vld [vmem:[%s8038_s2 + $0x24] sm:$0xf] }
   0xd   :  { %511 = vmatpush.bf16.xpose.msra.mxu0 %v481_v12  ;;  %v5227_v30 = vld [vmem:[%s8036_s0 + $0x58] sm:$0xff]  ;;  %v472_v33 = vsel %vm365_vm0, %v5219_v29, 0  ;;  %v920_v35 = vld [vmem:[%s8038_s2 + $0x20] sm:$0xf]  ;;  %v5218_v36 = vld [vmem:[%s8036_s0 + $0x10] sm:$0xff]  ;;  %vm4646_vm8 = vcmask 1040384  }
   0xe   :  { %1257 = vperm.xlu1 %5300, %v943_v11   ;;  %680 = vmatpush.bf16.xpose.msra.mxu1 %v505_v13  ;;  %v496_v34 = vsel %vm365_vm0, %v5227_v30, 0  ;;  %v5226_v37 = vld [vmem:[%s8036_s0 + $0x50] sm:$0xff]  ;;  %v936_v38 = vld [vmem:[%s8038_s2 + $0x60] sm:$0xf]  ;;  %v918_v39 = vld [vmem:[%s8038_s2 + $0x18] sm:$0xf] }
   0xf   :  { %1113 = vperm.xlu0 %5299, %v927_v14   ;;  %1095 = vperm.xlu2 %5301, %v925_v17   ;;  %v469_v40 = vsel %vm365_vm0, %v5218_v36, 0  ;;  %v493_v41 = vsel %vm365_vm0, %v5226_v37, 0  ;;  %v937_v42 = vld [vmem:[%s8038_s2 + $0x64] sm:$0xf]  ;;  %v5217_v43 = vld [vmem:[%s8036_s0 + $0x8] sm:$0xff]  ;;  %v5186_v6 = vld [vmem:[%s8037_s1 + $0x10] sm:$0xff] }
  0x10   :  { %v5225_v44 = vld [vmem:[%s8036_s0 + $0x48] sm:$0xff]  ;;  %v919_v45 = vld [vmem:[%s8038_s2 + $0x1c] sm:$0xf]  ;;  %v466_v47 = vsel %vm365_vm0, %v5217_v43, 0  ;;  %v934_v49 = vld [vmem:[%s8038_s2 + $0x58] sm:$0xf] }
  0x11   :  { %v935_v46 = vld [vmem:[%s8038_s2 + $0x5c] sm:$0xf]  ;;  %v490_v48 = vsel %vm365_vm0, %v5225_v44, 0  ;;  %v5216_v50 = vld [vmem:[%s8036_s0] sm:$0xff]  ;;  %v916_v52 = vld [vmem:[%s8038_s2 + $0x10] sm:$0xf] }
  0x12   :  { %v5224_v51 = vld [vmem:[%s8036_s0 + $0x40] sm:$0xff]  ;;  %v932_v53 = vld [vmem:[%s8038_s2 + $0x50] sm:$0xf]  ;;  %v463_v54 = vsel %vm365_vm0, %v5216_v50, 0  ;;  %v917_v56 = vld [vmem:[%s8038_s2 + $0x14] sm:$0xf] }
  0x13   :  { %v487_v55 = vsel %vm365_vm0, %v5224_v51, 0  ;;  %v933_v57 = vld [vmem:[%s8038_s2 + $0x54] sm:$0xf]  ;;  %v5184_v58 = vld [vmem:[%s8037_s1] sm:$0xff]  ;;  %v915_v59 = vld [vmem:[%s8038_s2 + $0xc] sm:$0xf] }
  0x14   :  { %v914_v60 = vld [vmem:[%s8038_s2 + $0x8] sm:$0xf]  ;;  %v912_v62 = vld [vmem:[%s8038_s2] sm:$0xf]  ;;  %v931_v63 = vld [vmem:[%s8038_s2 + $0x4c] sm:$0xf] }
  0x15   :  { %512 = vmatpush.bf16.xpose.msra.mxu0 %v478_v19  ;;  %v930_v61 = vld [vmem:[%s8038_s2 + $0x48] sm:$0xf]  ;;  %v913_v0 = vld [vmem:[%s8038_s2 + $0x4] sm:$0xf]  ;;  %v928_v3 = vld [vmem:[%s8038_s2 + $0x40] sm:$0xf] }
  0x16   :  { %1239 = vperm.xlu1 %5300, %v941_v18   ;;  %681 = vmatpush.bf16.xpose.msra.mxu1 %v502_v20  ;;  %v5185_v1 = vld [vmem:[%s8037_s1 + $0x8] sm:$0xff]  ;;  %v929_v2 = vld [vmem:[%s8038_s2 + $0x44] sm:$0xf]  ;;  %v974_v4 = vld [vmem:[%s8038_s2 + $0xf8] sm:$0xf] }
  0x17   :  { %1230 = vperm.xlu0 %5299, %v940_v21   ;;  %1068 = vperm.xlu2 %5301, %v922_v24   ;;  %v959_v5 = vld [vmem:[%s8038_s2 + $0xbc] sm:$0xf]  ;;  %v957_v7 = vld [vmem:[%s8038_s2 + $0xb4] sm:$0xf]  ;;  %v956_v8 = vld [vmem:[%s8038_s2 + $0xb0] sm:$0xf] }
  0x18   :  { %v958_v10 = vld [vmem:[%s8038_s2 + $0xb8] sm:$0xf]  ;;  %v954_v11 = vld [vmem:[%s8038_s2 + $0xa8] sm:$0xf]  ;;  %v973_v12 = vld [vmem:[%s8038_s2 + $0xf4] sm:$0xf] }
  0x19   :  { %v5187_v13 = vld [vmem:[%s8037_s1 + $0x18] sm:$0xff]  ;;  %v971_v15 = vld [vmem:[%s8038_s2 + $0xec] sm:$0xf]  ;;  %v970_v16 = vld [vmem:[%s8038_s2 + $0xe8] sm:$0xf] }
  0x1a   :  { %v975_v14 = vld [vmem:[%s8038_s2 + $0xfc] sm:$0xf]  ;;  %v972_v19 = vld [vmem:[%s8038_s2 + $0xf0] sm:$0xf]  ;;  %v968_v20 = vld [vmem:[%s8038_s2 + $0xe0] sm:$0xf] }
  0x1b   :  { %v953_v21 = vld [vmem:[%s8038_s2 + $0xa4] sm:$0xf]  ;;  %v5189_v36 = vld [vmem:[%s8037_s1 + $0x28] sm:$0xff]  ;;  %v966_v44 = vld [vmem:[%s8038_s2 + $0xd8] sm:$0xf] }
  0x1c   :  { %v962_v43 = vld [vmem:[%s8038_s2 + $0xc8] sm:$0xf]  ;;  %v945_v50 = vld [vmem:[%s8038_s2 + $0x84] sm:$0xf]  ;;  %v949_v51 = vld [vmem:[%s8038_s2 + $0x94] sm:$0xf] }
  0x1d   :  { %513 = vmatpush.bf16.xpose.msra.mxu0 %v475_v26  ;;  %v955_v26 = vld [vmem:[%s8038_s2 + $0xac] sm:$0xf] }
  0x1e   :  { %1212 = vperm.xlu1 %5300, %v938_v25   ;;  %682 = vmatpush.bf16.xpose.msra.mxu1 %v499_v27  ;;  %v5188_v25 = vld [vmem:[%s8037_s1 + $0x20] sm:$0xff]  ;;  %v951_v27 = vld [vmem:[%s8038_s2 + $0x9c] sm:$0xf] }
  0x1f   :  { %1077 = vperm.xlu0 %5299, %v923_v28   ;;  %1221 = vperm.xlu2 %5301, %v939_v31   ;;  %v950_v28 = vld [vmem:[%s8038_s2 + $0x98] sm:$0xf] }
  0x25   :  { %514 = vmatpush.bf16.xpose.msra.mxu0 %v472_v33  ;;  %v948_v33 = vld [vmem:[%s8038_s2 + $0x90] sm:$0xf] }
  0x26   :  { %1059 = vperm.xlu1 %5300, %v921_v32   ;;  %683 = vmatpush.bf16.xpose.msra.mxu1 %v496_v34  ;;  %v952_v32 = vld [vmem:[%s8038_s2 + $0xa0] sm:$0xf]  ;;  %v967_v34 = vld [vmem:[%s8038_s2 + $0xdc] sm:$0xf] }
  0x27   :  { %1050 = vperm.xlu0 %5299, %v920_v35   ;;  %1194 = vperm.xlu2 %5301, %v936_v38  }
  0x2d   :  { %515 = vmatpush.bf16.xpose.msra.mxu0 %v469_v40  ;;  %v965_v40 = vld [vmem:[%s8038_s2 + $0xd4] sm:$0xf] }
  0x2e   :  { %1032 = vperm.xlu1 %5300, %v918_v39   ;;  %684 = vmatpush.bf16.xpose.msra.mxu1 %v493_v41  ;;  %v969_v39 = vld [vmem:[%s8038_s2 + $0xe4] sm:$0xf]  ;;  %v964_v41 = vld [vmem:[%s8038_s2 + $0xd0] sm:$0xf] }
  0x2f   :  { %1203 = vperm.xlu0 %5299, %v937_v42   ;;  %1041 = vperm.xlu2 %5301, %v919_v45  }
  0x35   :  { %516 = vmatpush.bf16.xpose.msra.mxu0 %v466_v47  ;;  %v947_v47 = vld [vmem:[%s8038_s2 + $0x8c] sm:$0xf] }
  0x36   :  { %1185 = vperm.xlu1 %5300, %v935_v46   ;;  %685 = vmatpush.bf16.xpose.msra.mxu1 %v490_v48 }
  0x37   :  { %1176 = vperm.xlu0 %5299, %v934_v49   ;;  %1014 = vperm.xlu2 %5301, %v916_v52   ;;  %v5190_v49 = vld [vmem:[%s8037_s1 + $0x30] sm:$0xff]  ;;  %v944_v52 = vld [vmem:[%s8038_s2 + $0x80] sm:$0xf] }
  0x3d   :  { %517 = vmatpush.bf16.xpose.msra.mxu0 %v463_v54 }
  0x3e   :  { %1158 = vperm.xlu1 %5300, %v932_v53   ;;  %686 = vmatpush.bf16.xpose.msra.mxu1 %v487_v55 }
  0x3f   :  { %1023 = vperm.xlu0 %5299, %v917_v56   ;;  %1167 = vperm.xlu2 %5301, %v933_v57   ;;  %v3718_v56 = vld [vmem:[%s8040_s4 + $0x38] sm:$0xf]  ;;  %v946_v57 = vld [vmem:[%s8038_s2 + $0x88] sm:$0xf] }
  0x44   :  { %4862 = vmatmul.msk.bf16.vlgmr.msra.gmra.mxu0 %vm365_vm0, %v5184_v58 }
  0x45   :  { %4894 = vmatmul.msk.bf16.vlgmr.msra.gmra.mxu1 %vm365_vm0, %v5184_v58  ;;  %v961_v58 = vld [vmem:[%s8038_s2 + $0xc4] sm:$0xf] }
  0x46   :  { %1005 = vperm.xlu1 %5300, %v915_v59  }
  0x47   :  { %996 = vperm.xlu0 %5299, %v914_v60   ;;  %1140 = vperm.xlu2 %5301, %v930_v61  }
  0x4e   :  { %978 = vperm.xlu1 %5300, %v912_v62   ;;  %v5191_v62 = vld [vmem:[%s8037_s1 + $0x38] sm:$0xff] }
  0x4f   :  { %1149 = vperm.xlu0 %5299, %v931_v63   ;;  %987 = vperm.xlu2 %5301, %v913_v0   ;;  %v3735_v63 = vld [vmem:[%s8040_s4 + $0x7c] sm:$0xf]  ;;  %v963_v0 = vld [vmem:[%s8038_s2 + $0xcc] sm:$0xf] }
  0x54   :  { %4863 = vmatmul.msk.bf16.gmra.mxu0 %vm365_vm0, %v5185_v1 }
  0x55   :  { %4895 = vmatmul.msk.bf16.gmra.mxu1 %vm365_vm0, %v5185_v1  ;;  %v3734_v1 = vld [vmem:[%s8040_s4 + $0x78] sm:$0xf] }
  0x56   :  { %1131 = vperm.xlu1 %5300, %v929_v2  }
  0x57   :  { %1122 = vperm.xlu0 %5299, %v928_v3   ;;  %1392 = vperm.xlu2 %5301, %v958_v10   ;;  %v5337_v3 = vmov 839922192   ;;  %v3717_v10 = vld [vmem:[%s8040_s4 + $0x34] sm:$0xf] }
  0x5e   :  { %1536 = vperm.xlu1 %5300, %v974_v4   ;;  %v982_v4 = vunpack.c.l.s4 %v5337_v3  ;;  %v5193_v3 = vld [vmem:[%s8037_s1 + $0x48] sm:$0xff] }
  0x5f   :  { %1401 = vperm.xlu0 %5299, %v959_v5   ;;  %1545 = vperm.xlu2 %5301, %v975_v14   ;;  %v5192_v14 = vld [vmem:[%s8037_s1 + $0x40] sm:$0xff] }
  0x61   :  { %v5569_v9 = vpop.permute.xlu2 %1086 }
  0x64   :  { %4864 = vmatmul.msk.bf16.gmra.mxu0 %vm365_vm0, %v5186_v6 }
  0x65   :  { %4896 = vmatmul.msk.bf16.gmra.mxu1 %vm365_vm0, %v5186_v6 }
  0x66   :  { %1383 = vperm.xlu1 %5300, %v957_v7   ;;  %v3732_v7 = vld [vmem:[%s8040_s4 + $0x70] sm:$0xf] }
  0x67   :  { %1374 = vperm.xlu0 %5299, %v956_v8   ;;  %1518 = vperm.xlu2 %5301, %v972_v19   ;;  %v960_v8 = vld [vmem:[%s8038_s2 + $0xc0] sm:$0xf] }
  0x69   :  { %v5592_v17 = vpop.permute.xlu2 %1095 }
  0x6e   :  { %1356 = vperm.xlu1 %5300, %v954_v11   ;;  %v5743_v11 = vunpack.c.0.s8 %v982_v4 }
  0x6f   :  { %1527 = vperm.xlu0 %5299, %v973_v12   ;;  %1365 = vperm.xlu2 %5301, %v955_v26  }
  0x71   :  { %v5609_v23 = vpop.permute.xlu2 %1068 }
  0x74   :  { %4865 = vmatmul.msk.bf16.gmra.mxu0 %vm365_vm0, %v5187_v13 }
  0x75   :  { %4897 = vmatmul.msk.bf16.gmra.mxu1 %vm365_vm0, %v5187_v13 }
  0x76   :  { %1509 = vperm.xlu1 %5300, %v971_v15  }
  0x77   :  { %1500 = vperm.xlu0 %5299, %v970_v16   ;;  %1338 = vperm.xlu2 %5301, %v952_v32  }
  0x78   :  { %v5596_v18 = vpop.permute.xlu1 %1248 }
  0x79   :  { %v5607_v22 = vpop.permute.xlu0 %1104  ;;  %v5631_v31 = vpop.permute.xlu2 %1221 }
  0x7e   :  { %1482 = vperm.xlu1 %5300, %v968_v20  }
  0x7f   :  { %1347 = vperm.xlu0 %5299, %v953_v21   ;;  %1491 = vperm.xlu2 %5301, %v969_v39   ;;  %v3715_v21 = vld [vmem:[%s8040_s4 + $0x2c] sm:$0xf] }
  0x80   :  { %v5611_v24 = vpop.permute.xlu1 %1257 }
  0x81   :  { %v5629_v30 = vpop.permute.xlu0 %1113  ;;  %v5649_v38 = vpop.permute.xlu2 %1194 }
  0x84   :  { %4866 = vmatmul.msk.bf16.gmra.mxu0 %vm365_vm0, %v5188_v25 }
  0x85   :  { %4898 = vmatmul.msk.bf16.gmra.mxu1 %vm365_vm0, %v5188_v25  ;;  %v3719_v25 = vld [vmem:[%s8040_s4 + $0x3c] sm:$0xf] }
  0x86   :  { %1329 = vperm.xlu1 %5300, %v951_v27  }
  0x87   :  { %1320 = vperm.xlu0 %5299, %v950_v28   ;;  %1464 = vperm.xlu2 %5301, %v966_v44   ;;  %v3714_v28 = vld [vmem:[%s8040_s4 + $0x28] sm:$0xf] }
  0x88   :  { %v5627_v29 = vpop.permute.xlu1 %1239 }
  0x89   :  { %v5647_v37 = vpop.permute.xlu0 %1230  ;;  %v5672_v46 = vpop.permute.xlu2 %1041 }
  0x8e   :  { %1302 = vperm.xlu1 %5300, %v948_v33  }
  0x8f   :  { %1473 = vperm.xlu0 %5299, %v967_v34   ;;  %1311 = vperm.xlu2 %5301, %v949_v51   ;;  %v3731_v51 = vld [vmem:[%s8040_s4 + $0x6c] sm:$0xf] }
  0x90   :  { %v5642_v35 = vpop.permute.xlu1 %1212 }
  0x91   :  { %v5670_v45 = vpop.permute.xlu0 %1077  ;;  %v5695_v54 = vpop.permute.xlu2 %1014 }
  0x94   :  { %4867 = vmatmul.msk.bf16.gmra.mxu0 %vm365_vm0, %v5189_v36 }
  0x95   :  { %4899 = vmatmul.msk.bf16.gmra.mxu1 %vm365_vm0, %v5189_v36 }
  0x96   :  { %1455 = vperm.xlu1 %5300, %v965_v40  }
  0x97   :  { %1446 = vperm.xlu0 %5299, %v964_v41   ;;  %1284 = vperm.xlu2 %5301, %v946_v57  }
  0x98   :  { %v5662_v42 = vpop.permute.xlu1 %1059 }
  0x99   :  { %v5693_v53 = vpop.permute.xlu0 %1050  ;;  %v5712_v61 = vpop.permute.xlu2 %1167 }
  0x9e   :  { %1428 = vperm.xlu1 %5300, %v962_v43  }
  0x9f   :  { %1293 = vperm.xlu0 %5299, %v947_v47   ;;  %1437 = vperm.xlu2 %5301, %v963_v0  }
  0xa0   :  { %v5677_v48 = vpop.permute.xlu1 %1032 }
  0xa1   :  { %v5710_v60 = vpop.permute.xlu0 %1203  ;;  %v5732_v6 = vpop.permute.xlu2 %1140 }
  0xa4   :  { %4868 = vmatmul.msk.bf16.gmra.mxu0 %vm365_vm0, %v5190_v49 }
  0xa5   :  { %4900 = vmatmul.msk.bf16.gmra.mxu1 %vm365_vm0, %v5190_v49  ;;  %v3712_v49 = vld [vmem:[%s8040_s4 + $0x20] sm:$0xf] }
  0xa6   :  { %1275 = vperm.xlu1 %5300, %v945_v50   ;;  %v3716_v50 = vld [vmem:[%s8040_s4 + $0x30] sm:$0xf] }
  0xa7   :  { %1266 = vperm.xlu0 %5299, %v944_v52   ;;  %1410 = vperm.xlu2 %5301, %v960_v8  }
  0xa8   :  { %v5697_v55 = vpop.permute.xlu1 %1185 }
  0xa9   :  { %v5730_v5 = vpop.permute.xlu0 %1176  ;;  %v988_v27 = vpop.permute.xlu2 %987 }
  0xaa   :  { %v993_v39 = vperm.slane %v988_v27, %v5743_v11 }
  0xac   :  { %v1681_v44 = vunpack.c.l.bf16 %v993_v39 }
  0xae   :  { %3864 = vperm.xlu1 %5300, %v3718_v56  }
  0xaf   :  { %1419 = vperm.xlu0 %5299, %v961_v58   ;;  %3873 = vperm.xlu2 %5301, %v3719_v25  }
  0xb0   :  { %v5708_v59 = vpop.permute.xlu1 %1158 }
  0xb1   :  { %v5755_v26 = vpop.permute.xlu0 %1023 }
  0xb4   :  { %4869 = vmatmul.msk.bf16.gmra.mxu0 %vm365_vm0, %v5191_v62 }
  0xb5   :  { %4901 = vmatmul.msk.bf16.gmra.mxu1 %vm365_vm0, %v5191_v62 }
  0xb6   :  { %4017 = vperm.xlu1 %5300, %v3735_v63  }
  0xb7   :  { %4008 = vperm.xlu0 %5299, %v3734_v1   ;;  %3846 = vperm.xlu2 %5301, %v3716_v50  }
  0xb8   :  { %v5728_v2 = vpop.permute.xlu1 %1005 }
  0xb9   :  { %v997_v57 = vpop.permute.xlu0 %996 }
  0xba   :  { %v1002_v62 = vperm.slane %v997_v57, %v5743_v11  ;;  %v3730_v57 = vld [vmem:[%s8040_s4 + $0x68] sm:$0xf] }
  0xbe   :  { %3990 = vperm.xlu1 %5300, %v3732_v7  }
  0xbf   :  { %3855 = vperm.xlu0 %5299, %v3717_v10  }
  0xc0   :  { %v979_v12 = vpop.permute.xlu1 %978 }
  0xc1   :  { %v984_v13 = vperm.slane %v979_v12, %v5743_v11  ;;  %v519_v15 = vpop.f32.mrf.mxu0  ;;  %v1682_v12 = vunpack.c.l.bf16 %v1002_v62 }
  0xc2   :  { %v688_v16 = vpop.f32.mrf.mxu1 }
  0xc3   :  { %v1680_v19 = vunpack.c.l.bf16 %v984_v13  ;;  %v848_v20 = vpack.c.bf16 %v688_v16, %v519_v15  ;;  %v3733_v15 = vld [vmem:[%s8040_s4 + $0x74] sm:$0xf] }
  0xc4   :  { %4870 = vmatmul.msk.bf16.gmra.mxu0 %vm365_vm0, %v5192_v14  ;;  %3999 = vperm.xlu2 %5301, %v3733_v15  }
  0xc5   :  { %v1552_v32 = vunpack.c.l.bf16 %v848_v20  ;;  %v1553_v33 = vunpack.c.h.bf16 %v848_v20  ;;  %4902 = vmatmul.msk.bf16.gmra.mxu1 %vm365_vm0, %v5192_v14  ;;  %v3729_v14 = vld [vmem:[%s8040_s4 + $0x64] sm:$0xf]  ;;  %v3728_v20 = vld [vmem:[%s8040_s4 + $0x60] sm:$0xf] }
  0xc6   :  { %3837 = vperm.xlu1 %5300, %v3715_v21  }
  0xc7   :  { %v1744_v34 = vadd.f32 %v1680_v19, %v1552_v32  ;;  %v1745_v36 = vadd.f32 %v1680_v19, %v1553_v33  ;;  %3828 = vperm.xlu0 %5299, %v3714_v28   ;;  %v1011_v33 = vperm.slane %v5728_v2, %v5743_v11 }
  0xc9   :  { %v1872_v40 = vpack.c.bf16 %v1745_v36, %v1744_v34  ;;  %v521_v41 = vpop.f32.mrf.mxu0 }
  0xca   :  { %v690_v43 = vpop.f32.mrf.mxu1 }
  0xcb   :  { %v849_v47 = vpack.c.bf16 %v690_v43, %v521_v41  ;;  %v1936_v58 = vunpack.c.l.bf16 %v1872_v40  ;;  %v1937_v1 = vunpack.c.h.bf16 %v1872_v40 }
  0xcc   :  { %3972 = vperm.xlu2 %5301, %v3730_v57  }
  0xcd   :  { %v1554_v52 = vunpack.c.l.bf16 %v849_v47  ;;  %v1555_v56 = vunpack.c.h.bf16 %v849_v47  ;;  %v2064_v10 = vmul.f32 0.20019531, %v1936_v58  ;;  %v2065_v21 = vmul.f32 0.20019531, %v1937_v1 }
  0xce   :  { %3810 = vperm.xlu1 %5300, %v3712_v49  }
  0xcf   :  { %v1746_v63 = vadd.f32 %v1681_v44, %v1554_v52  ;;  %v1747_v0 = vadd.f32 %v1681_v44, %v1555_v56  ;;  %3981 = vperm.xlu0 %5299, %v3731_v51   ;;  %v5789_v34 = vmax.f32 %v1936_v58, %v2064_v10  ;;  %v5795_v43 = vmax.f32 %v1937_v1, %v2065_v21  ;;  %v3726_v56 = vld [vmem:[%s8040_s4 + $0x58] sm:$0xf]  ;;  %v3711_v58 = vld [vmem:[%s8040_s4 + $0x1c] sm:$0xf] }
  0xd0   :  { %v1683_v51 = vunpack.c.l.bf16 %v1011_v33  ;;  %v1020_v1 = vperm.slane %v5695_v54, %v5743_v11  ;;  %v3713_v54 = vld [vmem:[%s8040_s4 + $0x24] sm:$0xf] }
  0xd1   :  { %v1873_v4 = vpack.c.bf16 %v1747_v0, %v1746_v63  ;;  %v524_v7 = vpop.f32.mrf.mxu0  ;;  %8105 = vst [vmem:[#allocation7_spill] sm:$0xff] %v5795_v43 }
  0xd2   :  { %v693_v8 = vpop.f32.mrf.mxu1  ;;  %v1684_v15 = vunpack.c.l.bf16 %v1020_v1 }
  0xd3   :  { %v850_v13 = vpack.c.bf16 %v693_v8, %v524_v7  ;;  %v1938_v16 = vunpack.c.l.bf16 %v1873_v4  ;;  %v1939_v19 = vunpack.c.h.bf16 %v1873_v4  ;;  %v5194_v8 = vld [vmem:[%s8037_s1 + $0x50] sm:$0xff] }
  0xd4   :  { %4871 = vmatmul.msk.bf16.gmra.mxu0 %vm365_vm0, %v5193_v3  ;;  %3819 = vperm.xlu2 %5301, %v3713_v54  }
  0xd5   :  { %v1556_v25 = vunpack.c.l.bf16 %v850_v13  ;;  %v1557_v27 = vunpack.c.h.bf16 %v850_v13  ;;  %4903 = vmatmul.msk.bf16.gmra.mxu1 %vm365_vm0, %v5193_v3  ;;  %v2066_v28 = vmul.f32 0.20019531, %v1938_v16  ;;  %v2067_v32 = vmul.f32 0.20019531, %v1939_v19 }
  0xd6   :  { %3963 = vperm.xlu1 %5300, %v3729_v14  }
  0xd7   :  { %v1748_v36 = vadd.f32 %v1682_v12, %v1556_v25  ;;  %v1749_v39 = vadd.f32 %v1682_v12, %v1557_v27  ;;  %3954 = vperm.xlu0 %5299, %v3728_v20   ;;  %v5791_v40 = vmax.f32 %v1938_v16, %v2066_v28  ;;  %v5793_v41 = vmax.f32 %v1939_v19, %v2067_v32  ;;  %v3709_v19 = vld [vmem:[%s8040_s4 + $0x14] sm:$0xf]  ;;  %v3708_v25 = vld [vmem:[%s8040_s4 + $0x10] sm:$0xf] }
  0xd9   :  { %8104 = vst [vmem:[#allocation6_spill] sm:$0xff] %v5793_v41  ;;  %v1874_v47 = vpack.c.bf16 %v1749_v39, %v1748_v36  ;;  %v526_v49 = vpop.f32.mrf.mxu0  ;;  %v1029_v39 = vperm.slane %v5755_v26, %v5743_v11 }
  0xda   :  { %v695_v50 = vpop.f32.mrf.mxu1 }
  0xdb   :  { %v851_v52 = vpack.c.bf16 %v695_v50, %v526_v49  ;;  %v1940_v0 = vunpack.c.l.bf16 %v1874_v47  ;;  %v1941_v7 = vunpack.c.h.bf16 %v1874_v47 }
  0xdd   :  { %v1558_v62 = vunpack.c.l.bf16 %v851_v52  ;;  %v1559_v63 = vunpack.c.h.bf16 %v851_v52  ;;  %v2068_v14 = vmul.f32 0.20019531, %v1940_v0  ;;  %v2069_v27 = vmul.f32 0.20019531, %v1941_v7 }
  0xde   :  { %3936 = vperm.xlu1 %5300, %v3726_v56  }
  0xdf   :  { %v1750_v3 = vadd.f32 %v1683_v51, %v1558_v62  ;;  %v1751_v4 = vadd.f32 %v1683_v51, %v1559_v63  ;;  %3801 = vperm.xlu0 %5299, %v3711_v58   ;;  %v5828_v47 = vmax.f32 %v1940_v0, %v2068_v14  ;;  %v5834_v56 = vmax.f32 %v1941_v7, %v2069_v27  ;;  %v3725_v7 = vld [vmem:[%s8040_s4 + $0x54] sm:$0xf] }
  0xe0   :  { %v1685_v0 = vunpack.c.l.bf16 %v1029_v39  ;;  %v3722_v39 = vld [vmem:[%s8040_s4 + $0x48] sm:$0xf] }
  0xe1   :  { %v1875_v10 = vpack.c.bf16 %v1751_v4, %v1750_v3  ;;  %v529_v12 = vpop.f32.mrf.mxu0  ;;  %8107 = vst [vmem:[#allocation9_spill] sm:$0xff] %v5834_v56  ;;  %v3706_v3 = vld [vmem:[%s8040_s4 + $0x8] sm:$0xf]  ;;  %v3710_v4 = vld [vmem:[%s8040_s4 + $0x18] sm:$0xf] }
  0xe2   :  { %v698_v13 = vpop.f32.mrf.mxu1  ;;  %3792 = vperm.xlu2 %5301, %v3710_v4  }
  0xe3   :  { %v852_v16 = vpack.c.bf16 %v698_v13, %v529_v12  ;;  %v1942_v20 = vunpack.c.l.bf16 %v1875_v10  ;;  %v1943_v21 = vunpack.c.h.bf16 %v1875_v10  ;;  %v1038_v13 = vperm.slane %v5677_v48, %v5743_v11  ;;  %v3727_v48 = vld [vmem:[%s8040_s4 + $0x5c] sm:$0xf] }
  0xe4   :  { %4872 = vmatmul.msk.bf16.gmra.mxu0 %vm365_vm0, %v5194_v8 }
  0xe5   :  { %v1560_v28 = vunpack.c.l.bf16 %v852_v16  ;;  %v1561_v32 = vunpack.c.h.bf16 %v852_v16  ;;  %4904 = vmatmul.msk.bf16.gmra.mxu1 %vm365_vm0, %v5194_v8  ;;  %v2070_v33 = vmul.f32 0.20019531, %v1942_v20  ;;  %v2071_v36 = vmul.f32 0.20019531, %v1943_v21 }
  0xe6   :  { %3783 = vperm.xlu1 %5300, %v3709_v19   ;;  %v5195_v19 = vld [vmem:[%s8037_s1 + $0x58] sm:$0xff]  ;;  %v1686_v27 = vunpack.c.l.bf16 %v1038_v13 }
  0xe7   :  { %v1752_v49 = vadd.f32 %v1684_v15, %v1560_v28  ;;  %v1753_v50 = vadd.f32 %v1684_v15, %v1561_v32  ;;  %3774 = vperm.xlu0 %5299, %v3708_v25   ;;  %v5830_v51 = vmax.f32 %v1942_v20, %v2070_v33  ;;  %v5832_v52 = vmax.f32 %v1943_v21, %v2071_v36  ;;  %v3723_v32 = vld [vmem:[%s8040_s4 + $0x4c] sm:$0xf] }
  0xe9   :  { %8106 = vst [vmem:[#allocation8_spill] sm:$0xff] %v5832_v52  ;;  %v1876_v58 = vpack.c.bf16 %v1753_v50, %v1752_v49  ;;  %v531_v62 = vpop.f32.mrf.mxu0 }
  0xea   :  { %v700_v63 = vpop.f32.mrf.mxu1  ;;  %3945 = vperm.xlu2 %5301, %v3727_v48  }
  0xeb   :  { %v853_v1 = vpack.c.bf16 %v700_v63, %v531_v62  ;;  %v1944_v12 = vunpack.c.l.bf16 %v1876_v58  ;;  %v1945_v16 = vunpack.c.h.bf16 %v1876_v58 }
  0xed   :  { %v1562_v8 = vunpack.c.l.bf16 %v853_v1  ;;  %v1563_v10 = vunpack.c.h.bf16 %v853_v1  ;;  %v2072_v25 = vmul.f32 0.20019531, %v1944_v12  ;;  %v2073_v49 = vmul.f32 0.20019531, %v1945_v16 }
  0xee   :  { %3756 = vperm.xlu1 %5300, %v3706_v3  }
  0xef   :  { %v1754_v14 = vadd.f32 %v1685_v0, %v1562_v8  ;;  %v1755_v15 = vadd.f32 %v1685_v0, %v1563_v10  ;;  %3927 = vperm.xlu0 %5299, %v3725_v7   ;;  %v1047_v0 = vperm.slane %v5672_v46, %v5743_v11  ;;  %v5867_v1 = vmax.f32 %v1944_v12, %v2072_v25 }
  0xf0   :  { %v5873_v10 = vmax.f32 %v1945_v16, %v2073_v49  ;;  %v3724_v16 = vld [vmem:[%s8040_s4 + $0x50] sm:$0xf] }
  0xf1   :  { %v1877_v54 = vpack.c.bf16 %v1755_v15, %v1754_v14  ;;  %v534_v20 = vpop.f32.mrf.mxu0 }
  0xf2   :  { %v703_v21 = vpop.f32.mrf.mxu1  ;;  %8109 = vst [vmem:[#allocation11_spill] sm:$0xff] %v5873_v10  ;;  %3918 = vperm.xlu2 %5301, %v3724_v16   ;;  %v1065_v16 = vperm.slane %v5662_v42, %v5743_v11 }
  0xf3   :  { %v854_v28 = vpack.c.bf16 %v703_v21, %v534_v20  ;;  %v1946_v33 = vunpack.c.l.bf16 %v1877_v54  ;;  %v1947_v36 = vunpack.c.h.bf16 %v1877_v54  ;;  %v3720_v20 = vld [vmem:[%s8040_s4 + $0x40] sm:$0xf]  ;;  %v3705_v21 = vld [vmem:[%s8040_s4 + $0x4] sm:$0xf] }
  0xf4   :  { %4873 = vmatmul.msk.bf16.gmra.mxu0 %vm365_vm0, %v5195_v19  ;;  %v1689_v42 = vunpack.c.l.bf16 %v1065_v16  ;;  %v3721_v16 = vld [vmem:[%s8040_s4 + $0x44] sm:$0xf] }
  0xf5   :  { %v1564_v50 = vunpack.c.l.bf16 %v854_v28  ;;  %v1565_v58 = vunpack.c.h.bf16 %v854_v28  ;;  %4905 = vmatmul.msk.bf16.gmra.mxu1 %vm365_vm0, %v5195_v19  ;;  %v2074_v62 = vmul.f32 0.20019531, %v1946_v33  ;;  %v2075_v63 = vmul.f32 0.20019531, %v1947_v36 }
  0xf6   :  { %3909 = vperm.xlu1 %5300, %v3723_v32   ;;  %v1687_v19 = vunpack.c.l.bf16 %v1047_v0 }
  0xf7   :  { %v1756_v3 = vadd.f32 %v1686_v27, %v1564_v50  ;;  %v1757_v4 = vadd.f32 %v1686_v27, %v1565_v58  ;;  %3900 = vperm.xlu0 %5299, %v3722_v39   ;;  %v5869_v7 = vmax.f32 %v1946_v33, %v2074_v62  ;;  %v5871_v8 = vmax.f32 %v1947_v36, %v2075_v63  ;;  %v5196_v39 = vld [vmem:[%s8037_s1 + $0x60] sm:$0xff]  ;;  %v3707_v63 = vld [vmem:[%s8040_s4 + $0xc] sm:$0xf] }
  0xf8   :  { %v1056_v33 = vperm.slane %v5693_v53, %v5743_v11 }
  0xf9   :  { %8108 = vst [vmem:[#allocation10_spill] sm:$0xff] %v5871_v8  ;;  %v536_v14 = vpop.f32.mrf.mxu0  ;;  %v1878_v12 = vpack.c.bf16 %v1757_v4, %v1756_v3 }
  0xfa   :  { %v705_v15 = vpop.f32.mrf.mxu1  ;;  %3765 = vperm.xlu2 %5301, %v3707_v63  }
  0xfb   :  { %v855_v54 = vpack.c.bf16 %v705_v15, %v536_v14  ;;  %v1948_v48 = vunpack.c.l.bf16 %v1878_v12  ;;  %v1949_v36 = vunpack.c.h.bf16 %v1878_v12  ;;  %v1688_v14 = vunpack.c.l.bf16 %v1056_v33  ;;  %v4596_v15 = vld [vmem:[#allocation2] sm:$0x1] }
  0xfd   :  { %v1566_v25 = vunpack.c.l.bf16 %v855_v54  ;;  %v1567_v27 = vunpack.c.h.bf16 %v855_v54  ;;  %v2076_v3 = vmul.f32 0.20019531, %v1948_v48  ;;  %v2077_v53 = vmul.f32 0.20019531, %v1949_v36 }
  0xfe   :  { %3882 = vperm.xlu1 %5300, %v3720_v20  }
  0xff   :  { %v1758_v28 = vadd.f32 %v1687_v19, %v1566_v25  ;;  %v1759_v32 = vadd.f32 %v1687_v19, %v1567_v27  ;;  %3747 = vperm.xlu0 %5299, %v3705_v21   ;;  %v5900_v21 = vmax.f32 %v1948_v48, %v2076_v3  ;;  %v5906_v33 = vmax.f32 %v1949_v36, %v2077_v53  ;;  %v3704_v48 = vld [vmem:[%s8040_s4] sm:$0xf]  ;;  %v5197_v53 = vld [vmem:[%s8037_s1 + $0x68] sm:$0xff] }
 0x101   :  { %v1879_v49 = vpack.c.bf16 %v1759_v32, %v1758_v28  ;;  %v539_v50 = vpop.f32.mrf.mxu0  ;;  %8111 = vst [vmem:[#allocation13_spill] sm:$0xff] %v5906_v33 }
 0x102   :  { %v708_v58 = vpop.f32.mrf.mxu1  ;;  %3738 = vperm.xlu2 %5301, %v3704_v48  }
 0x103   :  { %v856_v62 = vpack.c.bf16 %v708_v58, %v539_v50  ;;  %v1950_v0 = vunpack.c.l.bf16 %v1879_v49  ;;  %v1951_v4 = vunpack.c.h.bf16 %v1879_v49 }
 0x104   :  { %4874 = vmatmul.msk.bf16.gmra.mxu0 %vm365_vm0, %v5196_v39 }
 0x105   :  { %v1568_v19 = vunpack.c.l.bf16 %v856_v62  ;;  %v1569_v12 = vunpack.c.h.bf16 %v856_v62  ;;  %4906 = vmatmul.msk.bf16.gmra.mxu1 %vm365_vm0, %v5196_v39  ;;  %v2078_v54 = vmul.f32 0.20019531, %v1950_v0  ;;  %v2079_v20 = vmul.f32 0.20019531, %v1951_v4 }
 0x107   :  { %4599 = vperm.xlu0 %5299, %v4596_v15   ;;  %v5902_v25 = vmax.f32 %v1950_v0, %v2078_v54  ;;  %v5904_v27 = vmax.f32 %v1951_v4, %v2079_v20  ;;  %v1760_v28 = vadd.f32 %v1688_v14, %v1568_v19  ;;  %v1761_v32 = vadd.f32 %v1688_v14, %v1569_v12 }
 0x108   :  { %v1074_v14 = vperm.slane %v5609_v23, %v5743_v11 }
 0x109   :  { %8110 = vst [vmem:[#allocation12_spill] sm:$0xff] %v5904_v27  ;;  %v541_v39 = vpop.f32.mrf.mxu0  ;;  %v5915_v63 = vpack.c.bf16 %v1761_v32, %v1760_v28 }
 0x10a   :  { %v710_v50 = vpop.f32.mrf.mxu1  ;;  %v1690_v32 = vunpack.c.l.bf16 %v1074_v14  ;;  %3891 = vperm.xlu2 %5301, %v3721_v16  }
 0x10b   :  { %v857_v62 = vpack.c.bf16 %v710_v50, %v541_v39  ;;  %v1953_v15 = vunpack.c.h.bf16 %v5915_v63 }
 0x10d   :  { %v1570_v0 = vunpack.c.l.bf16 %v857_v62  ;;  %v1571_v36 = vunpack.c.h.bf16 %v857_v62  ;;  %v2081_v23 = vmul.f32 0.20019531, %v1953_v15  ;;  %v1083_v62 = vperm.slane %v5670_v45, %v5743_v11 }
 0x10e   :  { %v1092_v45 = vperm.slane %v5569_v9, %v5743_v11 }
 0x10f   :  { %v1762_v3 = vadd.f32 %v1689_v42, %v1570_v0  ;;  %v1763_v4 = vadd.f32 %v1689_v42, %v1571_v36  ;;  %v5933_v36 = vmax.f32 %v1953_v15, %v2081_v23 }
 0x111   :  { %v5923_v19 = vpack.c.bf16 %v1763_v4, %v1762_v3  ;;  %v544_v12 = vpop.f32.mrf.mxu0  ;;  %8112 = vst [vmem:[#allocation14_spill] sm:$0xff] %v5933_v36 }
 0x112   :  { %v713_v54 = vpop.f32.mrf.mxu1 }
 0x113   :  { %v858_v20 = vpack.c.bf16 %v713_v54, %v544_v12  ;;  %v1955_v28 = vunpack.c.h.bf16 %v5923_v19  ;;  %v1691_v54 = vunpack.c.l.bf16 %v1083_v62  ;;  %v1692_v62 = vunpack.c.l.bf16 %v1092_v45 }
 0x114   :  { %4875 = vmatmul.msk.bf16.gmra.mxu0 %vm365_vm0, %v5197_v53 }
 0x115   :  { %v1572_v39 = vunpack.c.l.bf16 %v858_v20  ;;  %v1573_v50 = vunpack.c.h.bf16 %v858_v20  ;;  %4907 = vmatmul.msk.bf16.gmra.mxu1 %vm365_vm0, %v5197_v53  ;;  %v2083_v42 = vmul.f32 0.20019531, %v1955_v28 }
 0x117   :  { %v1764_v48 = vadd.f32 %v1690_v32, %v1572_v39  ;;  %v1765_v0 = vadd.f32 %v1690_v32, %v1573_v50  ;;  %v5935_v3 = vmax.f32 %v1955_v28, %v2083_v42  ;;  %v5198_v28 = vld [vmem:[%s8037_s1 + $0x70] sm:$0xff] }
 0x119   :  { %8113 = vst [vmem:[#allocation15_spill] sm:$0xff] %v5935_v3  ;;  %v546_v4 = vpop.f32.mrf.mxu0  ;;  %v5939_v16 = vpack.c.bf16 %v1765_v0, %v1764_v48 }
 0x11a   :  { %v715_v14 = vpop.f32.mrf.mxu1 }
 0x11b   :  { %v859_v20 = vpack.c.bf16 %v715_v14, %v546_v4  ;;  %v1957_v15 = vunpack.c.h.bf16 %v5939_v16  ;;  %v1101_v4 = vperm.slane %v5592_v17, %v5743_v11  ;;  %v1110_v17 = vperm.slane %v5607_v22, %v5743_v11 }
 0x11d   :  { %v1574_v53 = vunpack.c.l.bf16 %v859_v20  ;;  %v1575_v2 = vunpack.c.h.bf16 %v859_v20  ;;  %v2085_v48 = vmul.f32 0.20019531, %v1957_v15 }
 0x11f   :  { %v1766_v26 = vadd.f32 %v1691_v54, %v1574_v53  ;;  %v1767_v46 = vadd.f32 %v1691_v54, %v1575_v2  ;;  %v5956_v54 = vmax.f32 %v1957_v15, %v2085_v48  ;;  %v5199_v15 = vld [vmem:[%s8037_s1 + $0x78] sm:$0xff] }
 0x121   :  { %v5947_v32 = vpack.c.bf16 %v1767_v46, %v1766_v26  ;;  %v549_v23 = vpop.f32.mrf.mxu0  ;;  %8115 = vst [vmem:[#allocation17_spill] sm:$0xff] %v5956_v54 }
 0x122   :  { %v718_v39 = vpop.f32.mrf.mxu1 }
 0x123   :  { %v860_v50 = vpack.c.bf16 %v718_v39, %v549_v23  ;;  %v1959_v42 = vunpack.c.h.bf16 %v5947_v32  ;;  %v1693_v23 = vunpack.c.l.bf16 %v1101_v4  ;;  %v1694_v4 = vunpack.c.l.bf16 %v1110_v17 }
 0x124   :  { %4876 = vmatmul.msk.bf16.gmra.mxu0 %vm365_vm0, %v5198_v28 }
 0x125   :  { %v1576_v0 = vunpack.c.l.bf16 %v860_v50  ;;  %v1577_v2 = vunpack.c.h.bf16 %v860_v50  ;;  %4908 = vmatmul.msk.bf16.gmra.mxu1 %vm365_vm0, %v5198_v28  ;;  %v2087_v9 = vmul.f32 0.20019531, %v1959_v42 }
 0x127   :  { %v5954_v14 = vmax.f32 %v1959_v42, %v2087_v9  ;;  %v1768_v26 = vadd.f32 %v1692_v62, %v1576_v0  ;;  %v1769_v46 = vadd.f32 %v1692_v62, %v1577_v2 }
 0x129   :  { %8114 = vst [vmem:[#allocation16_spill] sm:$0xff] %v5954_v14  ;;  %v551_v20 = vpop.f32.mrf.mxu0  ;;  %v5960_v50 = vpack.c.bf16 %v1769_v46, %v1768_v26 }
 0x12a   :  { %v720_v53 = vpop.f32.mrf.mxu1 }
 0x12b   :  { %v861_v39 = vpack.c.bf16 %v720_v53, %v551_v20  ;;  %v1961_v62 = vunpack.c.h.bf16 %v5960_v50  ;;  %v5971_v20 = vpop.permute.xlu0 %1149 }
 0x12d   :  { %v1578_v28 = vunpack.c.l.bf16 %v861_v39  ;;  %v1579_v58 = vunpack.c.h.bf16 %v861_v39  ;;  %v2089_v53 = vmul.f32 0.20019531, %v1961_v62 }
 0x12f   :  { %v1770_v42 = vadd.f32 %v1693_v23, %v1578_v28  ;;  %v1771_v9 = vadd.f32 %v1693_v23, %v1579_v58  ;;  %v1119_v23 = vperm.slane %v5629_v30, %v5743_v11  ;;  %v5979_v17 = vmax.f32 %v1961_v62, %v2089_v53  ;;  %v5200_v53 = vld [vmem:[%s8037_s1 + $0x80] sm:$0xff] }
 0x131   :  { %v5968_v48 = vpack.c.bf16 %v1771_v9, %v1770_v42  ;;  %v554_v0 = vpop.f32.mrf.mxu0  ;;  %8116 = vst [vmem:[#allocation18_spill] sm:$0xff] %v5979_v17  ;;  %v1695_v45 = vunpack.c.l.bf16 %v1119_v23 }
 0x132   :  { %v723_v2 = vpop.f32.mrf.mxu1 }
 0x133   :  { %v862_v26 = vpack.c.bf16 %v723_v2, %v554_v0  ;;  %v1963_v46 = vunpack.c.h.bf16 %v5968_v48  ;;  %v1123_v13 = vpop.permute.xlu0 %1122  ;;  %v1962_v62 = vunpack.c.l.bf16 %v5968_v48 }
 0x134   :  { %4877 = vmatmul.msk.bf16.gmra.mxu0 %vm365_vm0, %v5199_v15  ;;  %v1128_v30 = vperm.slane %v1123_v13, %v5743_v11 }
 0x135   :  { %v1580_v22 = vunpack.c.l.bf16 %v862_v26  ;;  %v1581_v39 = vunpack.c.h.bf16 %v862_v26  ;;  %4909 = vmatmul.msk.bf16.gmra.mxu1 %vm365_vm0, %v5199_v15  ;;  %v2091_v58 = vmul.f32 0.20019531, %v1963_v46 }
 0x137   :  { %v1772_v28 = vadd.f32 %v1694_v4, %v1580_v22  ;;  %v1773_v42 = vadd.f32 %v1694_v4, %v1581_v39  ;;  %v5977_v9 = vmax.f32 %v1963_v46, %v2091_v58 }
 0x139   :  { %v556_v0 = vpop.f32.mrf.mxu0  ;;  %v1886_v12 = vpack.c.bf16 %v1773_v42, %v1772_v28  ;;  %v1960_v42 = vunpack.c.l.bf16 %v5960_v50 }
 0x13a   :  { %v725_v2 = vpop.f32.mrf.mxu1 }
 0x13b   :  { %v863_v44 = vpack.c.bf16 %v725_v2, %v556_v0  ;;  %v1964_v49 = vunpack.c.l.bf16 %v1886_v12  ;;  %v1965_v46 = vunpack.c.h.bf16 %v1886_v12  ;;  %v1958_v12 = vunpack.c.l.bf16 %v5947_v32 }
 0x13c   :  { %v1954_v32 = vunpack.c.l.bf16 %v5923_v19 }
 0x13d   :  { %v1582_v57 = vunpack.c.l.bf16 %v863_v44  ;;  %v1583_v15 = vunpack.c.h.bf16 %v863_v44  ;;  %v2092_v23 = vmul.f32 0.20019531, %v1964_v49  ;;  %v1696_v44 = vunpack.c.l.bf16 %v1128_v30 }
 0x13e   :  { %v2093_v13 = vmul.f32 0.20019531, %v1965_v46  ;;  %v2088_v30 = vmul.f32 0.20019531, %v1960_v42 }
 0x13f   :  { %v1774_v22 = vadd.f32 %v1695_v45, %v1582_v57  ;;  %v1775_v4 = vadd.f32 %v1695_v45, %v1583_v15  ;;  %v2090_v57 = vmul.f32 0.20019531, %v1962_v62  ;;  %v1132_v45 = vpop.permute.xlu1 %1131  ;;  %v2412_v50 = vmax.f32 %v1964_v49, %v2092_v23 }
 0x140   :  { %v1137_v43 = vperm.slane %v1132_v45, %v5743_v11  ;;  %v1952_v49 = vunpack.c.l.bf16 %v5915_v63  ;;  %v2082_v45 = vmul.f32 0.20019531, %v1954_v32 }
 0x141   :  { %v1887_v39 = vpack.c.bf16 %v1775_v4, %v1774_v22  ;;  %v559_v58 = vpop.f32.mrf.mxu0  ;;  %v2410_v10 = vmax.f32 %v1962_v62, %v2090_v57 }
 0x142   :  { %v728_v28 = vpop.f32.mrf.mxu1  ;;  %v1697_v23 = vunpack.c.l.bf16 %v1137_v43  ;;  %v2080_v62 = vmul.f32 0.20019531, %v1952_v49 }
 0x143   :  { %v864_v0 = vpack.c.bf16 %v728_v28, %v559_v58  ;;  %v1966_v2 = vunpack.c.l.bf16 %v1887_v39  ;;  %v1967_v26 = vunpack.c.h.bf16 %v1887_v39  ;;  %v1956_v58 = vunpack.c.l.bf16 %v5939_v16 }
 0x144   :  { %4878 = vmatmul.msk.bf16.gmra.mxu0 %vm365_vm0, %v5200_v53 }
 0x145   :  { %v1584_v48 = vunpack.c.l.bf16 %v864_v0  ;;  %v1585_v15 = vunpack.c.h.bf16 %v864_v0  ;;  %4910 = vmatmul.msk.bf16.gmra.mxu1 %vm365_vm0, %v5200_v53  ;;  %v2094_v22 = vmul.f32 0.20019531, %v1966_v2  ;;  %v2095_v4 = vmul.f32 0.20019531, %v1967_v26 }
 0x146   :  { %v5997_v0 = vmax.f32 %v1965_v46, %v2093_v13  ;;  %v2086_v53 = vmul.f32 0.20019531, %v1958_v12 }
 0x147   :  { %v1776_v39 = vadd.f32 %v1696_v44, %v1584_v48  ;;  %v1777_v28 = vadd.f32 %v1696_v44, %v1585_v15  ;;  %v2414_v41 = vmax.f32 %v1966_v2, %v2094_v22  ;;  %v5994_v56 = vmax.f32 %v1967_v26, %v2095_v4 }
 0x148   :  { %v2408_v26 = vmax.f32 %v1960_v42, %v2088_v30  ;;  %v2084_v2 = vmul.f32 0.20019531, %v1956_v58  ;;  %v1146_v48 = vperm.slane %v5732_v6, %v5743_v11  ;;  %v2402_v4 = vmax.f32 %v1954_v32, %v2082_v45 }
 0x149   :  { %v2526_v52 = vpack.c.bf16 %v2414_v41, %v2412_v50  ;;  %v1888_v8 = vpack.c.bf16 %v1777_v28, %v1776_v39  ;;  %v561_v33 = vpop.f32.mrf.mxu0  ;;  %v2406_v41 = vmax.f32 %v1958_v12, %v2086_v53  ;;  %v2400_v12 = vmax.f32 %v1952_v49, %v2080_v62 }
 0x14a   :  { %v730_v27 = vpop.f32.mrf.mxu1  ;;  %v2524_v13 = vpack.c.bf16 %v2410_v10, %v2408_v26  ;;  %v2404_v22 = vmax.f32 %v1956_v58, %v2084_v2  ;;  %v1698_v30 = vunpack.c.l.bf16 %v1146_v48  ;;  %v1155_v26 = vperm.slane %v5971_v20, %v5743_v11 }
 0x14b   :  { %v865_v44 = vpack.c.bf16 %v730_v27, %v561_v33  ;;  %2960 = vmatpush.bf16.msra.mxu2 %v2526_v52  ;;  %v1968_v57 = vunpack.c.l.bf16 %v1888_v8  ;;  %v1969_v43 = vunpack.c.h.bf16 %v1888_v8  ;;  %v5201_v52 = vld [vmem:[%s8037_s1 + $0x88] sm:$0xff]  ;;  %v2520_v53 = vpack.c.bf16 %v2402_v4, %v2400_v12 }
 0x14c   :  { %v2522_v27 = vpack.c.bf16 %v2406_v41, %v2404_v22  ;;  %v8119_v22 = vpack.c.bf16 %v5902_v25, %v5900_v21 }
 0x14d   :  { %v1586_v19 = vunpack.c.l.bf16 %v865_v44  ;;  %v1587_v46 = vunpack.c.h.bf16 %v865_v44  ;;  %v2096_v50 = vmul.f32 0.20019531, %v1968_v57 }
 0x14f   :  { %v1778_v15 = vadd.f32 %v1697_v23, %v1586_v19  ;;  %v1779_v63 = vadd.f32 %v1697_v23, %v1587_v46  ;;  %2961 = vmatpush.bf16.msra.mxu2 %v2524_v13  ;;  %v2097_v23 = vmul.f32 0.20019531, %v1969_v43  ;;  %v6011_v49 = vmax.f32 %v1968_v57, %v2096_v50  ;;  %v5202_v50 = vld [vmem:[%s8037_s1 + $0x90] sm:$0xff] }
 0x150   :  { %v1699_v57 = vunpack.c.l.bf16 %v1155_v26  ;;  %v1173_v26 = vperm.slane %v5712_v61, %v5743_v11 }
 0x151   :  { %v1889_v33 = vpack.c.bf16 %v1779_v63, %v1778_v15  ;;  %v564_v42 = vpop.f32.mrf.mxu0  ;;  %v6017_v13 = vmax.f32 %v1969_v43, %v2097_v23  ;;  %v1164_v43 = vperm.slane %v5708_v59, %v5743_v11  ;;  %v8121_v59 = vpack.c.bf16 %v5830_v51, %v5828_v47 }
 0x152   :  { %v733_v10 = vpop.f32.mrf.mxu1 }
 0x153   :  { %v866_v39 = vpack.c.bf16 %v733_v10, %v564_v42  ;;  %2962 = vmatpush.bf16.msra.mxu2 %v2522_v27  ;;  %v1970_v6 = vunpack.c.l.bf16 %v1889_v33  ;;  %v1971_v28 = vunpack.c.h.bf16 %v1889_v33  ;;  %8118 = vst [vmem:[#allocation20_spill] sm:$0xff] %v6017_v13  ;;  %v8120_v10 = vpack.c.bf16 %v5869_v7, %v5867_v1  ;;  %v4928_v1 = vld [vmem:[%s8039_s3] sm:$0xf]  ;;  %v5234_v7 = vld [vmem:[%s8039_s3 + $0xc] sm:$0xf0] }
 0x154   :  { %4879 = vmatmul.msk.bf16.gmra.mxu0 %vm365_vm0, %v5201_v52 }
 0x155   :  { %v1588_v58 = vunpack.c.l.bf16 %v866_v39  ;;  %v1589_v32 = vunpack.c.h.bf16 %v866_v39  ;;  %4911 = vmatmul.msk.bf16.gmra.mxu1 %vm365_vm0, %v5201_v52  ;;  %v2098_v8 = vmul.f32 0.20019531, %v1970_v6  ;;  %v2099_v44 = vmul.f32 0.20019531, %v1971_v28 }
 0x157   :  { %v1780_v2 = vadd.f32 %v1698_v30, %v1588_v58  ;;  %v1781_v45 = vadd.f32 %v1698_v30, %v1589_v32  ;;  %2963 = vmatpush.bf16.msra.mxu2 %v2520_v53  ;;  %v6013_v19 = vmax.f32 %v1970_v6, %v2098_v8  ;;  %v6015_v46 = vmax.f32 %v1971_v28, %v2099_v44  ;;  %v6043_v32 = vpop.permute.xlu0 %1401 }
 0x158   :  { %v1700_v6 = vunpack.c.l.bf16 %v1164_v43 }
 0x159   :  { %8117 = vst [vmem:[#allocation19_spill] sm:$0xff] %v6015_v46  ;;  %v1890_v41 = vpack.c.bf16 %v1781_v45, %v1780_v2  ;;  %v566_v48 = vpop.f32.mrf.mxu0  ;;  %v6049_v2 = vor.u32 %v5234_v7, %v4928_v1 }
 0x15a   :  { %v735_v15 = vpop.f32.mrf.mxu1 }
 0x15b   :  { %v867_v63 = vpack.c.bf16 %v735_v15, %v566_v48  ;;  %2964 = vmatpush.bf16.msra.mxu2 %v8119_v22  ;;  %v1972_v52 = vunpack.c.l.bf16 %v1890_v41  ;;  %v1973_v12 = vunpack.c.h.bf16 %v1890_v41  ;;  %8122 = vst [vmem:[#allocation21_spill] sm:$0xff] %v6049_v2  ;;  %v8123_v15 = vpack.c.bf16 %v5791_v40, %v5789_v34  ;;  %v6067_v40 = vpop.permute.xlu1 %1536 }
 0x15c   :  { %8126 = vst [vmem:[#allocation24_spill] sm:$0xff] %v6067_v40 }
 0x15d   :  { %v1590_v4 = vunpack.c.l.bf16 %v867_v63  ;;  %v1591_v27 = vunpack.c.h.bf16 %v867_v63  ;;  %v2100_v39 = vmul.f32 0.20019531, %v1972_v52  ;;  %v2101_v58 = vmul.f32 0.20019531, %v1973_v12 }
 0x15f   :  { %v1782_v33 = vadd.f32 %v1699_v57, %v1590_v4  ;;  %v1783_v42 = vadd.f32 %v1699_v57, %v1591_v27  ;;  %2965 = vmatpush.bf16.msra.mxu2 %v8120_v10  ;;  %v6051_v45 = vmax.f32 %v1972_v52, %v2100_v39  ;;  %v6060_v22 = vmax.f32 %v1973_v12, %v2101_v58 }
 0x161   :  { %v1891_v30 = vpack.c.bf16 %v1783_v42, %v1782_v33  ;;  %v569_v21 = vpop.f32.mrf.mxu0  ;;  %8125 = vst [vmem:[#allocation23_spill] sm:$0xff] %v6060_v22  ;;  %v1701_v33 = vunpack.c.l.bf16 %v1173_v26 }
 0x162   :  { %v738_v25 = vpop.f32.mrf.mxu1 }
 0x163   :  { %v868_v28 = vpack.c.bf16 %v738_v25, %v569_v21  ;;  %2966 = vmatpush.bf16.msra.mxu2 %v8121_v59  ;;  %v1974_v53 = vunpack.c.l.bf16 %v1891_v30  ;;  %v1975_v23 = vunpack.c.h.bf16 %v1891_v30  ;;  %v1182_v30 = vperm.slane %v5730_v5, %v5743_v11  ;;  %v6071_v21 = vpop.permute.xlu0 %1374  ;;  %v5238_v5 = vld [vmem:[%s8039_s3 + $0x2c] sm:$0xf0] }
 0x164   :  { %4880 = vmatmul.msk.bf16.gmra.mxu0 %vm365_vm0, %v5202_v50 }
 0x165   :  { %v1592_v8 = vunpack.c.l.bf16 %v868_v28  ;;  %v1593_v44 = vunpack.c.h.bf16 %v868_v28  ;;  %4912 = vmatmul.msk.bf16.gmra.mxu1 %vm365_vm0, %v5202_v50  ;;  %v2102_v47 = vmul.f32 0.20019531, %v1974_v53  ;;  %v2103_v51 = vmul.f32 0.20019531, %v1975_v23 }
 0x167   :  { %v1784_v41 = vadd.f32 %v1700_v6, %v1592_v8  ;;  %v1785_v48 = vadd.f32 %v1700_v6, %v1593_v44  ;;  %2967 = vmatpush.bf16.msra.mxu2 %v8123_v15  ;;  %v6056_v57 = vmax.f32 %v1974_v53, %v2102_v47  ;;  %v6058_v63 = vmax.f32 %v1975_v23, %v2103_v51  ;;  %v5203_v6 = vld [vmem:[%s8037_s1 + $0x98] sm:$0xff]  ;;  %v4944_v8 = vld [vmem:[%s8039_s3 + $0x20] sm:$0xf] }
 0x168   :  { %v1702_v23 = vunpack.c.l.bf16 %v1182_v30  ;;  %v1191_v15 = vperm.slane %v5697_v55, %v5743_v11 }
 0x169   :  { %8124 = vst [vmem:[#allocation22_spill] sm:$0xff] %v6058_v63  ;;  %v1892_v4 = vpack.c.bf16 %v1785_v48, %v1784_v41  ;;  %v571_v27 = vpop.f32.mrf.mxu0 }
 0x16a   :  { %v740_v43 = vpop.f32.mrf.mxu1  ;;  %2968 = vmatmul.bf16.vlgmr.msra.gmra.mxu2 %v6049_v2 }
 0x16b   :  { %v869_v34 = vpack.c.bf16 %v740_v43, %v571_v27  ;;  %v1976_v50 = vunpack.c.l.bf16 %v1892_v4  ;;  %v1977_v12 = vunpack.c.h.bf16 %v1892_v4  ;;  %v6086_v4 = vor.u32 %v5238_v5, %v4944_v8  ;;  %v6107_v8 = vpop.permute.xlu2 %1392 }
 0x16d   :  { %v1594_v42 = vunpack.c.l.bf16 %v869_v34  ;;  %v1595_v10 = vunpack.c.h.bf16 %v869_v34  ;;  %v2104_v7 = vmul.f32 0.20019531, %v1976_v50  ;;  %v2105_v53 = vmul.f32 0.20019531, %v1977_v12  ;;  %8127 = vst [vmem:[#allocation25_spill] sm:$0xff] %v6086_v4 }
 0x16f   :  { %v1786_v25 = vadd.f32 %v1701_v33, %v1594_v42  ;;  %v1787_v39 = vadd.f32 %v1701_v33, %v1595_v10  ;;  %v6088_v27 = vmax.f32 %v1976_v50, %v2104_v7  ;;  %v6090_v43 = vmax.f32 %v1977_v12, %v2105_v53  ;;  %v6092_v33 = vpop.permute.xlu1 %1383 }
 0x171   :  { %v1893_v28 = vpack.c.bf16 %v1787_v39, %v1786_v25  ;;  %v574_v59 = vpop.f32.mrf.mxu0  ;;  %8128 = vst [vmem:[#allocation26_spill] sm:$0xff] %v6090_v43  ;;  %v6098_v25 = vpop.permute.xlu0 %1527 }
 0x172   :  { %v743_v1 = vpop.f32.mrf.mxu1  ;;  %8130 = vst [vmem:[#allocation28_spill] sm:$0xff] %v6098_v25 }
 0x173   :  { %v870_v58 = vpack.c.bf16 %v743_v1, %v574_v59  ;;  %v1978_v44 = vunpack.c.l.bf16 %v1893_v28  ;;  %v1979_v47 = vunpack.c.h.bf16 %v1893_v28  ;;  %v1703_v28 = vunpack.c.l.bf16 %v1191_v15 }
 0x174   :  { %4881 = vmatmul.msk.bf16.gmra.mxu0 %vm365_vm0, %v5203_v6 }
 0x175   :  { %v1596_v51 = vunpack.c.l.bf16 %v870_v58  ;;  %v1597_v26 = vunpack.c.h.bf16 %v870_v58  ;;  %4913 = vmatmul.msk.bf16.gmra.mxu1 %vm365_vm0, %v5203_v6  ;;  %v2106_v41 = vmul.f32 0.20019531, %v1978_v44  ;;  %v2107_v48 = vmul.f32 0.20019531, %v1979_v47 }
 0x176   :  { %v1200_v58 = vperm.slane %v5649_v38, %v5743_v11  ;;  %v4960_v38 = vld [vmem:[%s8039_s3 + $0x40] sm:$0xf] }
 0x177   :  { %v1788_v34 = vadd.f32 %v1702_v23, %v1596_v51  ;;  %v1789_v42 = vadd.f32 %v1702_v23, %v1597_v26  ;;  %v6094_v10 = vmax.f32 %v1978_v44, %v2106_v41  ;;  %v6096_v30 = vmax.f32 %v1979_v47, %v2107_v48  ;;  %v6109_v47 = vpop.permute.xlu1 %1356  ;;  %v5204_v51 = vld [vmem:[%s8037_s1 + $0xa0] sm:$0xff] }
 0x179   :  { %8129 = vst [vmem:[#allocation27_spill] sm:$0xff] %v6096_v30  ;;  %v1894_v39 = vpack.c.bf16 %v1789_v42, %v1788_v34  ;;  %v576_v6 = vpop.f32.mrf.mxu0  ;;  %v1704_v42 = vunpack.c.l.bf16 %v1200_v58 }
 0x17a   :  { %v745_v12 = vpop.f32.mrf.mxu1  ;;  %2973 = vmatmul.bf16.gmra.mxu2 %v6086_v4 }
 0x17b   :  { %v871_v59 = vpack.c.bf16 %v745_v12, %v576_v6  ;;  %v1980_v53 = vunpack.c.l.bf16 %v1894_v39  ;;  %v1981_v23 = vunpack.c.h.bf16 %v1894_v39  ;;  %v6114_v39 = vpop.permute.xlu0 %1500  ;;  %v5242_v12 = vld [vmem:[%s8039_s3 + $0x4c] sm:$0xf0] }
 0x17c   :  { %8131 = vst [vmem:[#allocation29_spill] sm:$0xff] %v6114_v39 }
 0x17d   :  { %v1598_v1 = vunpack.c.l.bf16 %v871_v59  ;;  %v1599_v7 = vunpack.c.h.bf16 %v871_v59  ;;  %v2108_v15 = vmul.f32 0.20019531, %v1980_v53  ;;  %v2109_v34 = vmul.f32 0.20019531, %v1981_v23 }
 0x17f   :  { %v1790_v5 = vadd.f32 %v1703_v28, %v1598_v1  ;;  %v1791_v44 = vadd.f32 %v1703_v28, %v1599_v7 }
 0x181   :  { %v1895_v26 = vpack.c.bf16 %v1791_v44, %v1790_v5  ;;  %v579_v41 = vpop.f32.mrf.mxu0  ;;  %v6124_v44 = vor.u32 %v5242_v12, %v4960_v38 }
 0x182   :  { %v748_v48 = vpop.f32.mrf.mxu1 }
 0x183   :  { %v872_v6 = vpack.c.bf16 %v748_v48, %v579_v41  ;;  %v1982_v28 = vunpack.c.l.bf16 %v1895_v26  ;;  %v1983_v59 = vunpack.c.h.bf16 %v1895_v26  ;;  %8132 = vst [vmem:[#allocation30_spill] sm:$0xff] %v6124_v44  ;;  %v6126_v41 = vmax.f32 %v1980_v53, %v2108_v15 }
 0x184   :  { %4882 = vmatmul.msk.bf16.gmra.mxu0 %vm365_vm0, %v5204_v51  ;;  %v6128_v48 = vmax.f32 %v1981_v23, %v2109_v34  ;;  %v1209_v26 = vperm.slane %v5710_v60, %v5743_v11  ;;  %v6143_v34 = vpop.permute.xlu1 %1509 }
 0x185   :  { %v1600_v1 = vunpack.c.l.bf16 %v872_v6  ;;  %v1601_v7 = vunpack.c.h.bf16 %v872_v6  ;;  %4914 = vmatmul.msk.bf16.gmra.mxu1 %vm365_vm0, %v5204_v51  ;;  %v2110_v58 = vmul.f32 0.20019531, %v1982_v28  ;;  %v2111_v5 = vmul.f32 0.20019531, %v1983_v59  ;;  %v6136_v6 = vpop.permute.xlu2 %1545  ;;  %8136 = vst [vmem:[#allocation34_spill] sm:$0xff] %v6143_v34 }
 0x186   :  { %8133 = vst [vmem:[#allocation31_spill] sm:$0xff] %v6128_v48  ;;  %v1705_v12 = vunpack.c.l.bf16 %v1209_v26 }
 0x187   :  { %v1792_v20 = vadd.f32 %v1704_v42, %v1600_v1  ;;  %v1793_v52 = vadd.f32 %v1704_v42, %v1601_v7  ;;  %v6130_v50 = vmax.f32 %v1982_v28, %v2110_v58  ;;  %v6132_v16 = vmax.f32 %v1983_v59, %v2111_v5  ;;  %8135 = vst [vmem:[#allocation33_spill] sm:$0xff] %v6136_v6  ;;  %v6145_v28 = vpop.permute.xlu0 %1347  ;;  %v5205_v5 = vld [vmem:[%s8037_s1 + $0xa8] sm:$0xff] }
 0x188   :  { %v1218_v58 = vperm.slane %v5642_v35, %v5743_v11  ;;  %v5246_v35 = vld [vmem:[%s8039_s3 + $0x6c] sm:$0xf0] }
 0x189   :  { %8134 = vst [vmem:[#allocation32_spill] sm:$0xff] %v6132_v16  ;;  %v1896_v51 = vpack.c.bf16 %v1793_v52, %v1792_v20  ;;  %v581_v23 = vpop.f32.mrf.mxu0 }
 0x18a   :  { %v750_v15 = vpop.f32.mrf.mxu1  ;;  %2978 = vmatmul.bf16.gmra.mxu2 %v6124_v44 }
 0x18b   :  { %v873_v42 = vpack.c.bf16 %v750_v15, %v581_v23  ;;  %v1984_v1 = vunpack.c.l.bf16 %v1896_v51  ;;  %v1985_v20 = vunpack.c.h.bf16 %v1896_v51  ;;  %v4976_v51 = vld [vmem:[%s8039_s3 + $0x60] sm:$0xf] }
 0x18c   :  { %v6164_v38 = vor.u32 %v5246_v35, %v4976_v51 }
 0x18d   :  { %v1602_v60 = vunpack.c.l.bf16 %v873_v42  ;;  %v1603_v59 = vunpack.c.h.bf16 %v873_v42  ;;  %v2112_v23 = vmul.f32 0.20019531, %v1984_v1  ;;  %v2113_v26 = vmul.f32 0.20019531, %v1985_v20  ;;  %v6152_v15 = vpop.permute.xlu2 %1518 }
 0x18e   :  { %8137 = vst [vmem:[#allocation35_spill] sm:$0xff] %v6152_v15 }
 0x18f   :  { %v1794_v52 = vadd.f32 %v1705_v12, %v1602_v60  ;;  %v1795_v7 = vadd.f32 %v1705_v12, %v1603_v59  ;;  %v1706_v60 = vunpack.c.l.bf16 %v1218_v58  ;;  %v6160_v59 = vpop.permute.xlu1 %1482  ;;  %8139 = vst [vmem:[#allocation37_spill] sm:$0xff] %v6164_v38  ;;  %v6166_v44 = vmax.f32 %v1984_v1, %v2112_v23  ;;  %v6170_v2 = vpop.permute.xlu0 %1320 }
 0x190   :  { %8138 = vst [vmem:[#allocation36_spill] sm:$0xff] %v6160_v59  ;;  %v6168_v4 = vmax.f32 %v1985_v20, %v2113_v26  ;;  %v1236_v1 = vperm.slane %v5647_v37, %v5743_v11  ;;  %v5250_v37 = vld [vmem:[%s8039_s3 + $0x8c] sm:$0xf0] }
 0x191   :  { %v1897_v53 = vpack.c.bf16 %v1795_v7, %v1794_v52  ;;  %v584_v62 = vpop.f32.mrf.mxu0 }
 0x192   :  { %v753_v61 = vpop.f32.mrf.mxu1  ;;  %8140 = vst [vmem:[#allocation38_spill] sm:$0xff] %v6168_v4 }
 0x193   :  { %v874_v55 = vpack.c.bf16 %v753_v61, %v584_v62  ;;  %v1986_v42 = vunpack.c.l.bf16 %v1897_v53  ;;  %v1987_v12 = vunpack.c.h.bf16 %v1897_v53 }
 0x194   :  { %4883 = vmatmul.msk.bf16.gmra.mxu0 %vm365_vm0, %v5205_v5 }
 0x195   :  { %v1604_v52 = vunpack.c.l.bf16 %v874_v55  ;;  %v1605_v7 = vunpack.c.h.bf16 %v874_v55  ;;  %4915 = vmatmul.msk.bf16.gmra.mxu1 %vm365_vm0, %v5205_v5  ;;  %v2114_v62 = vmul.f32 0.20019531, %v1986_v42  ;;  %v2115_v61 = vmul.f32 0.20019531, %v1987_v12 }
 0x196   :  { %v1227_v55 = vperm.slane %v5631_v31, %v5743_v11 }
 0x197   :  { %v1796_v53 = vadd.f32 %v1706_v60, %v1604_v52  ;;  %v1797_v58 = vadd.f32 %v1706_v60, %v1605_v7  ;;  %v6172_v13 = vmax.f32 %v1986_v42, %v2114_v62  ;;  %v6174_v46 = vmax.f32 %v1987_v12, %v2115_v61  ;;  %v6183_v42 = vpop.permute.xlu2 %1365  ;;  %v6185_v31 = vpop.permute.xlu1 %1329 }
 0x198   :  { %v1707_v35 = vunpack.c.l.bf16 %v1227_v55 }
 0x199   :  { %8141 = vst [vmem:[#allocation39_spill] sm:$0xff] %v6174_v46  ;;  %v1898_v23 = vpack.c.bf16 %v1797_v58, %v1796_v53  ;;  %v586_v20 = vpop.f32.mrf.mxu0  ;;  %v6189_v53 = vpop.permute.xlu0 %1473  ;;  %v5206_v58 = vld [vmem:[%s8037_s1 + $0xb0] sm:$0xff] }
 0x19a   :  { %v755_v26 = vpop.f32.mrf.mxu1  ;;  %2983 = vmatmul.bf16.gmra.mxu2 %v6164_v38  ;;  %8142 = vst [vmem:[#allocation40_spill] sm:$0xff] %v6189_v53 }
 0x19b   :  { %v875_v51 = vpack.c.bf16 %v755_v26, %v586_v20  ;;  %v1988_v52 = vunpack.c.l.bf16 %v1898_v23  ;;  %v1989_v7 = vunpack.c.h.bf16 %v1898_v23  ;;  %v4992_v23 = vld [vmem:[%s8039_s3 + $0x80] sm:$0xf] }
 0x19d   :  { %v1606_v12 = vunpack.c.l.bf16 %v875_v51  ;;  %v1607_v60 = vunpack.c.h.bf16 %v875_v51  ;;  %v2116_v5 = vmul.f32 0.20019531, %v1988_v52  ;;  %v2117_v51 = vmul.f32 0.20019531, %v1989_v7 }
 0x19f   :  { %v1798_v62 = vadd.f32 %v1707_v35, %v1606_v12  ;;  %v1799_v61 = vadd.f32 %v1707_v35, %v1607_v60  ;;  %v1708_v60 = vunpack.c.l.bf16 %v1236_v1  ;;  %v6206_v43 = vmax.f32 %v1989_v7, %v2117_v51  ;;  %v6208_v30 = vpop.permute.xlu2 %1338 }
 0x1a1   :  { %v1899_v55 = vpack.c.bf16 %v1799_v61, %v1798_v62  ;;  %v589_v20 = vpop.f32.mrf.mxu0  ;;  %8144 = vst [vmem:[#allocation42_spill] sm:$0xff] %v6206_v43 }
 0x1a2   :  { %v758_v26 = vpop.f32.mrf.mxu1 }
 0x1a3   :  { %v876_v38 = vpack.c.bf16 %v758_v26, %v589_v20  ;;  %v1990_v35 = vunpack.c.l.bf16 %v1899_v55  ;;  %v1991_v12 = vunpack.c.h.bf16 %v1899_v55  ;;  %v6202_v20 = vor.u32 %v5250_v37, %v4992_v23 }
 0x1a4   :  { %4884 = vmatmul.msk.bf16.gmra.mxu0 %vm365_vm0, %v5206_v58  ;;  %v6204_v26 = vmax.f32 %v1988_v52, %v2116_v5  ;;  %v1254_v23 = vperm.slane %v5596_v18, %v5743_v11  ;;  %v5254_v18 = vld [vmem:[%s8039_s3 + $0xac] sm:$0xf0] }
 0x1a5   :  { %v1608_v22 = vunpack.c.l.bf16 %v876_v38  ;;  %v1609_v63 = vunpack.c.h.bf16 %v876_v38  ;;  %4916 = vmatmul.msk.bf16.gmra.mxu1 %vm365_vm0, %v5206_v58  ;;  %v2118_v62 = vmul.f32 0.20019531, %v1990_v35  ;;  %v2119_v61 = vmul.f32 0.20019531, %v1991_v12  ;;  %8143 = vst [vmem:[#allocation41_spill] sm:$0xff] %v6202_v20  ;;  %v6216_v58 = vpop.permute.xlu1 %1302 }
 0x1a6   :  { %v1245_v38 = vperm.slane %v5627_v29, %v5743_v11 }
 0x1a7   :  { %v1800_v48 = vadd.f32 %v1708_v60, %v1608_v22  ;;  %v1801_v16 = vadd.f32 %v1708_v60, %v1609_v63  ;;  %v6210_v55 = vmax.f32 %v1990_v35, %v2118_v62  ;;  %v6212_v1 = vmax.f32 %v1991_v12, %v2119_v61  ;;  %v6223_v63 = vpop.permute.xlu0 %1446  ;;  %v6227_v4 = vpop.permute.xlu2 %1491 }
 0x1a8   :  { %v1709_v37 = vunpack.c.l.bf16 %v1245_v38  ;;  %8146 = vst [vmem:[#allocation44_spill] sm:$0xff] %v6227_v4 }
 0x1a9   :  { %8145 = vst [vmem:[#allocation43_spill] sm:$0xff] %v6212_v1  ;;  %v1900_v52 = vpack.c.bf16 %v1801_v16, %v1800_v48  ;;  %v591_v7 = vpop.f32.mrf.mxu0  ;;  %v5207_v16 = vld [vmem:[%s8037_s1 + $0xb8] sm:$0xff] }
 0x1aa   :  { %v760_v51 = vpop.f32.mrf.mxu1  ;;  %2988 = vmatmul.bf16.gmra.mxu2 %v6202_v20 }
 0x1ab   :  { %v877_v22 = vpack.c.bf16 %v760_v51, %v591_v7  ;;  %v1992_v29 = vunpack.c.l.bf16 %v1900_v52  ;;  %v1993_v60 = vunpack.c.h.bf16 %v1900_v52  ;;  %v5008_v52 = vld [vmem:[%s8039_s3 + $0xa0] sm:$0xf] }
 0x1ac   :  { %v6244_v43 = vor.u32 %v5254_v18, %v5008_v52  ;;  %v5208_v52 = vld [vmem:[%s8037_s1 + $0xc0] sm:$0xff] }
 0x1ad   :  { %v1610_v35 = vunpack.c.l.bf16 %v877_v22  ;;  %v1611_v12 = vunpack.c.h.bf16 %v877_v22  ;;  %v2120_v7 = vmul.f32 0.20019531, %v1992_v29  ;;  %v2121_v38 = vmul.f32 0.20019531, %v1993_v60 }
 0x1ae   :  { %8147 = vst [vmem:[#allocation45_spill] sm:$0xff] %v6244_v43 }
 0x1af   :  { %v1802_v62 = vadd.f32 %v1709_v37, %v1610_v35  ;;  %v1803_v61 = vadd.f32 %v1709_v37, %v1611_v12  ;;  %v1710_v35 = vunpack.c.l.bf16 %v1254_v23  ;;  %v6238_v12 = vpop.permute.xlu1 %1455  ;;  %v6240_v46 = vpop.permute.xlu0 %1293  ;;  %v6246_v1 = vmax.f32 %v1992_v29, %v2120_v7 }
 0x1b0   :  { %v6248_v6 = vmax.f32 %v1993_v60, %v2121_v38  ;;  %v6261_v7 = vpop.permute.xlu2 %1464 }
 0x1b1   :  { %v1901_v48 = vpack.c.bf16 %v1803_v61, %v1802_v62  ;;  %v594_v5 = vpop.f32.mrf.mxu0  ;;  %8150 = vst [vmem:[#allocation48_spill] sm:$0xff] %v6261_v7 }
 0x1b2   :  { %v763_v20 = vpop.f32.mrf.mxu1  ;;  %8148 = vst [vmem:[#allocation46_spill] sm:$0xff] %v6248_v6 }
 0x1b3   :  { %v878_v51 = vpack.c.bf16 %v763_v20, %v594_v5  ;;  %v1994_v22 = vunpack.c.l.bf16 %v1901_v48  ;;  %v1995_v37 = vunpack.c.h.bf16 %v1901_v48 }
 0x1b4   :  { %4885 = vmatmul.msk.bf16.gmra.mxu0 %vm365_vm0, %v5207_v16 }
 0x1b5   :  { %v1612_v62 = vunpack.c.l.bf16 %v878_v51  ;;  %v1613_v61 = vunpack.c.h.bf16 %v878_v51  ;;  %4917 = vmatmul.msk.bf16.gmra.mxu1 %vm365_vm0, %v5207_v16  ;;  %v2122_v20 = vmul.f32 0.20019531, %v1994_v22  ;;  %v2123_v5 = vmul.f32 0.20019531, %v1995_v37 }
 0x1b6   :  { %v1263_v51 = vperm.slane %v5611_v24, %v5743_v11 }
 0x1b7   :  { %v1804_v48 = vadd.f32 %v1710_v35, %v1612_v62  ;;  %v1805_v23 = vadd.f32 %v1710_v35, %v1613_v61  ;;  %v6250_v40 = vmax.f32 %v1994_v22, %v2122_v20  ;;  %v6252_v25 = vmax.f32 %v1995_v37, %v2123_v5  ;;  %v6263_v62 = vpop.permute.xlu1 %1428  ;;  %v1267_v20 = vpop.permute.xlu0 %1266 }
 0x1b8   :  { %v1711_v22 = vunpack.c.l.bf16 %v1263_v51  ;;  %v1272_v5 = vperm.slane %v1267_v20, %v5743_v11  ;;  %v6275_v20 = vpop.permute.xlu2 %1311 }
 0x1b9   :  { %8149 = vst [vmem:[#allocation47_spill] sm:$0xff] %v6252_v25  ;;  %v2540_v16 = vpack.c.bf16 %v6250_v40, %v6246_v1  ;;  %v596_v18 = vpop.f32.mrf.mxu0  ;;  %v1902_v60 = vpack.c.bf16 %v1805_v23, %v1804_v48 }
 0x1ba   :  { %v765_v29 = vpop.f32.mrf.mxu1  ;;  %2993 = vmatmul.bf16.gmra.mxu2 %v6244_v43 }
 0x1bb   :  { %v879_v38 = vpack.c.bf16 %v765_v29, %v596_v18  ;;  %v1996_v24 = vunpack.c.l.bf16 %v1902_v60  ;;  %v1997_v61 = vunpack.c.h.bf16 %v1902_v60  ;;  %v5258_v60 = vld [vmem:[%s8039_s3 + $0xcc] sm:$0xf0] }
 0x1bd   :  { %v1614_v37 = vunpack.c.l.bf16 %v879_v38  ;;  %v1615_v35 = vunpack.c.h.bf16 %v879_v38  ;;  %v2124_v18 = vmul.f32 0.20019531, %v1996_v24  ;;  %v2125_v51 = vmul.f32 0.20019531, %v1997_v61  ;;  %v5024_v38 = vld [vmem:[%s8039_s3 + $0xc0] sm:$0xf] }
 0x1bf   :  { %v1806_v40 = vadd.f32 %v1711_v22, %v1614_v37  ;;  %v1807_v1 = vadd.f32 %v1711_v22, %v1615_v35  ;;  %v1712_v35 = vunpack.c.l.bf16 %v1272_v5  ;;  %v2444_v25 = vmax.f32 %v1996_v24, %v2124_v18  ;;  %v1276_v5 = vpop.permute.xlu1 %1275 }
 0x1c0   :  { %v6281_v15 = vmax.f32 %v1997_v61, %v2125_v51  ;;  %v1281_v59 = vperm.slane %v1276_v5, %v5743_v11 }
 0x1c1   :  { %v1903_v48 = vpack.c.bf16 %v1807_v1, %v1806_v40  ;;  %v599_v23 = vpop.f32.mrf.mxu0 }
 0x1c2   :  { %v768_v43 = vpop.f32.mrf.mxu1  ;;  %8152 = vst [vmem:[#allocation50_spill] sm:$0xff] %v6281_v15  ;;  %v1713_v61 = vunpack.c.l.bf16 %v1281_v59 }
 0x1c3   :  { %v880_v29 = vpack.c.bf16 %v768_v43, %v599_v23  ;;  %v1998_v22 = vunpack.c.l.bf16 %v1903_v48  ;;  %v1999_v37 = vunpack.c.h.bf16 %v1903_v48  ;;  %v6279_v23 = vor.u32 %v5258_v60, %v5024_v38  ;;  %v1285_v60 = vpop.permute.xlu2 %1284 }
 0x1c4   :  { %4886 = vmatmul.msk.bf16.gmra.mxu0 %vm365_vm0, %v5208_v52 }
 0x1c5   :  { %v1616_v6 = vunpack.c.l.bf16 %v880_v29  ;;  %v1617_v40 = vunpack.c.h.bf16 %v880_v29  ;;  %4918 = vmatmul.msk.bf16.gmra.mxu1 %vm365_vm0, %v5208_v52  ;;  %v2126_v43 = vmul.f32 0.20019531, %v1998_v22  ;;  %v2127_v1 = vmul.f32 0.20019531, %v1999_v37  ;;  %8151 = vst [vmem:[#allocation49_spill] sm:$0xff] %v6279_v23 }
 0x1c7   :  { %v1808_v34 = vadd.f32 %v1712_v35, %v1616_v6  ;;  %v1809_v39 = vadd.f32 %v1712_v35, %v1617_v40  ;;  %v2446_v4 = vmax.f32 %v1998_v22, %v2126_v43  ;;  %v6283_v48 = vmax.f32 %v1999_v37, %v2127_v1  ;;  %v5262_v43 = vld [vmem:[%s8039_s3 + $0xec] sm:$0xf0] }
 0x1c8   :  { %v8154_v40 = vpack.c.bf16 %v6210_v55, %v6204_v26 }
 0x1c9   :  { %8153 = vst [vmem:[#allocation51_spill] sm:$0xff] %v6283_v48  ;;  %v2542_v29 = vpack.c.bf16 %v2446_v4, %v2444_v25  ;;  %v1904_v52 = vpack.c.bf16 %v1809_v39, %v1808_v34  ;;  %v601_v36 = vpop.f32.mrf.mxu0  ;;  %v1290_v4 = vperm.slane %v1285_v60, %v5743_v11  ;;  %v5209_v25 = vld [vmem:[%s8037_s1 + $0xc8] sm:$0xff] }
 0x1ca   :  { %v770_v3 = vpop.f32.mrf.mxu1  ;;  %2998 = vmatmul.bf16.gmra.mxu2 %v6279_v23 }
 0x1cb   :  { %v881_v24 = vpack.c.bf16 %v770_v3, %v601_v36  ;;  %3049 = vmatpush.bf16.msra.mxu3 %v2542_v29  ;;  %v2000_v51 = vunpack.c.l.bf16 %v1904_v52  ;;  %v2001_v38 = vunpack.c.h.bf16 %v1904_v52  ;;  %v1714_v29 = vunpack.c.l.bf16 %v1290_v4 }
 0x1cd   :  { %v1618_v6 = vunpack.c.l.bf16 %v881_v24  ;;  %v1619_v18 = vunpack.c.h.bf16 %v881_v24  ;;  %v2128_v36 = vmul.f32 0.20019531, %v2000_v51  ;;  %v2129_v3 = vmul.f32 0.20019531, %v2001_v38 }
 0x1cf   :  { %v1810_v22 = vadd.f32 %v1713_v61, %v1618_v6  ;;  %v1811_v37 = vadd.f32 %v1713_v61, %v1619_v18  ;;  %3050 = vmatpush.bf16.msra.mxu3 %v2540_v16  ;;  %v5040_v16 = vld [vmem:[%s8039_s3 + $0xe0] sm:$0xf]  ;;  %v6306_v6 = vmax.f32 %v2000_v51, %v2128_v36  ;;  %v6308_v18 = vmax.f32 %v2001_v38, %v2129_v3 }
 0x1d0   :  { %v6304_v55 = vor.u32 %v5262_v43, %v5040_v16 }
 0x1d1   :  { %v1905_v39 = vpack.c.bf16 %v1811_v37, %v1810_v22  ;;  %v604_v34 = vpop.f32.mrf.mxu0  ;;  %v8156_v37 = vpack.c.bf16 %v6172_v13, %v6166_v44  ;;  %v8157_v44 = vpack.c.bf16 %v6130_v50, %v6126_v41 }
 0x1d2   :  { %v773_v35 = vpop.f32.mrf.mxu1  ;;  %8155 = vst [vmem:[#allocation52_spill] sm:$0xff] %v6304_v55 }
 0x1d3   :  { %v882_v59 = vpack.c.bf16 %v773_v35, %v604_v34  ;;  %3051 = vmatpush.bf16.msra.mxu3 %v8154_v40  ;;  %v2002_v1 = vunpack.c.l.bf16 %v1905_v39  ;;  %v2003_v5 = vunpack.c.h.bf16 %v1905_v39 }
 0x1d4   :  { %4887 = vmatmul.msk.bf16.gmra.mxu0 %vm365_vm0, %v5209_v25 }
 0x1d5   :  { %v1620_v52 = vunpack.c.l.bf16 %v882_v59  ;;  %v1621_v24 = vunpack.c.h.bf16 %v882_v59  ;;  %4919 = vmatmul.msk.bf16.gmra.mxu1 %vm365_vm0, %v5209_v25  ;;  %v2130_v61 = vmul.f32 0.20019531, %v2002_v1  ;;  %v2131_v26 = vmul.f32 0.20019531, %v2003_v5 }
 0x1d6   :  { %v1299_v25 = vperm.slane %v6240_v46, %v5743_v11 }
 0x1d7   :  { %v1812_v60 = vadd.f32 %v1714_v29, %v1620_v52  ;;  %v1813_v22 = vadd.f32 %v1714_v29, %v1621_v24  ;;  %3052 = vmatpush.bf16.msra.mxu3 %v8156_v37  ;;  %v6313_v4 = vmax.f32 %v2002_v1, %v2130_v61  ;;  %v6315_v39 = vmax.f32 %v2003_v5, %v2131_v26  ;;  %v5210_v52 = vld [vmem:[%s8037_s1 + $0xd0] sm:$0xff]  ;;  %v5056_v61 = vld [vmem:[%s8039_s3 + $0x100] sm:$0xf] }
 0x1d8   :  { %v1715_v3 = vunpack.c.l.bf16 %v1299_v25  ;;  %v8158_v5 = vpack.c.bf16 %v6094_v10, %v6088_v27  ;;  %v1308_v29 = vperm.slane %v6216_v58, %v5743_v11  ;;  %v8159_v27 = vpack.c.bf16 %v6056_v57, %v6051_v45  ;;  %v5266_v10 = vld [vmem:[%s8039_s3 + $0x10c] sm:$0xf0]  ;;  %v5232_v58 = vld [vmem:[%s8039_s3 + $0x4] sm:$0xf]  ;;  %v4930_v37 = vld [vmem:[%s8039_s3 + $0x10] sm:$0xf0] }
 0x1d9   :  { %v1906_v38 = vpack.c.bf16 %v1813_v22, %v1812_v60  ;;  %v606_v35 = vpop.f32.mrf.mxu0 }
 0x1da   :  { %v775_v36 = vpop.f32.mrf.mxu1  ;;  %3003 = vmatmul.bf16.gmra.mxu2 %v6304_v55 }
 0x1db   :  { %v883_v13 = vpack.c.bf16 %v775_v36, %v606_v35  ;;  %3053 = vmatpush.bf16.msra.mxu3 %v8157_v44  ;;  %v2004_v46 = vunpack.c.l.bf16 %v1906_v38  ;;  %v2005_v16 = vunpack.c.h.bf16 %v1906_v38  ;;  %v1716_v35 = vunpack.c.l.bf16 %v1308_v29 }
 0x1dc   :  { %v6352_v44 = vor.u32 %v5266_v10, %v5056_v61 }
 0x1dd   :  { %v1622_v59 = vunpack.c.l.bf16 %v883_v13  ;;  %v1623_v40 = vunpack.c.h.bf16 %v883_v13  ;;  %v2132_v26 = vmul.f32 0.20019531, %v2004_v46  ;;  %v2133_v60 = vmul.f32 0.20019531, %v2005_v16 }
 0x1de   :  { %8160 = vst [vmem:[#allocation53_spill] sm:$0xff] %v6352_v44 }
 0x1df   :  { %v1814_v43 = vadd.f32 %v1715_v3, %v1622_v59  ;;  %v1815_v1 = vadd.f32 %v1715_v3, %v1623_v40  ;;  %3054 = vmatpush.bf16.msra.mxu3 %v8158_v5  ;;  %v6354_v3 = vor.u32 %v5232_v58, %v4930_v37  ;;  %v6356_v59 = vmax.f32 %v2004_v46, %v2132_v26 }
 0x1e0   :  { %v6358_v40 = vmax.f32 %v2005_v16, %v2133_v60  ;;  %v8162_v5 = vpack.c.bf16 %v6013_v19, %v6011_v49  ;;  %v1326_v37 = vperm.slane %v6170_v2, %v5743_v11  ;;  %v5236_v2 = vld [vmem:[%s8039_s3 + $0x24] sm:$0xf] }
 0x1e1   :  { %v1907_v50 = vpack.c.bf16 %v1815_v1, %v1814_v43  ;;  %v609_v41 = vpop.f32.mrf.mxu0  ;;  %8161 = vst [vmem:[#allocation54_spill] sm:$0xff] %v6354_v3 }
 0x1e2   :  { %v778_v24 = vpop.f32.mrf.mxu1 }
 0x1e3   :  { %v884_v22 = vpack.c.bf16 %v778_v24, %v609_v41  ;;  %3055 = vmatpush.bf16.msra.mxu3 %v8159_v27  ;;  %v2006_v25 = vunpack.c.l.bf16 %v1907_v50  ;;  %v2007_v38 = vunpack.c.h.bf16 %v1907_v50 }
 0x1e4   :  { %4888 = vmatmul.msk.bf16.gmra.mxu0 %vm365_vm0, %v5210_v52 }
 0x1e5   :  { %v1624_v36 = vunpack.c.l.bf16 %v884_v22  ;;  %v1625_v13 = vunpack.c.h.bf16 %v884_v22  ;;  %4920 = vmatmul.msk.bf16.gmra.mxu1 %vm365_vm0, %v5210_v52  ;;  %v2134_v45 = vmul.f32 0.20019531, %v2006_v25  ;;  %v2135_v57 = vmul.f32 0.20019531, %v2007_v38 }
 0x1e6   :  { %v1317_v52 = vperm.slane %v6275_v20, %v5743_v11 }
 0x1e7   :  { %v1816_v43 = vadd.f32 %v1716_v35, %v1624_v36  ;;  %v1817_v1 = vadd.f32 %v1716_v35, %v1625_v13  ;;  %3056 = vmatpush.bf16.msra.mxu3 %v8162_v5  ;;  %v6363_v29 = vmax.f32 %v2006_v25, %v2134_v45  ;;  %v6365_v50 = vmax.f32 %v2007_v38, %v2135_v57  ;;  %v5211_v25 = vld [vmem:[%s8037_s1 + $0xd8] sm:$0xff]  ;;  %v5072_v13 = vld [vmem:[%s8039_s3 + $0x120] sm:$0xf]  ;;  %v4946_v5 = vld [vmem:[%s8039_s3 + $0x30] sm:$0xf0] }
 0x1e8   :  { %v1717_v19 = vunpack.c.l.bf16 %v1317_v52 }
 0x1e9   :  { %v1908_v16 = vpack.c.bf16 %v1817_v1, %v1816_v43  ;;  %v611_v24 = vpop.f32.mrf.mxu0  ;;  %v5270_v1 = vld [vmem:[%s8039_s3 + $0x12c] sm:$0xf0] }
 0x1ea   :  { %v780_v61 = vpop.f32.mrf.mxu1  ;;  %3008 = vmatmul.bf16.gmra.mxu2 %v6352_v44  ;;  %3057 = vmatmul.bf16.vlgmr.msra.gmra.mxu3 %v6354_v3 }
 0x1eb   :  { %v885_v49 = vpack.c.bf16 %v780_v61, %v611_v24  ;;  %v2008_v20 = vunpack.c.l.bf16 %v1908_v16  ;;  %v2009_v27 = vunpack.c.h.bf16 %v1908_v16  ;;  %v1718_v24 = vunpack.c.l.bf16 %v1326_v37 }
 0x1ed   :  { %v1626_v26 = vunpack.c.l.bf16 %v885_v49  ;;  %v1627_v60 = vunpack.c.h.bf16 %v885_v49  ;;  %v6375_v22 = vpop.f32.mrf.mxu2  ;;  %v2136_v45 = vmul.f32 0.20019531, %v2008_v20  ;;  %v2137_v57 = vmul.f32 0.20019531, %v2009_v27 }
 0x1ee   :  { %8163 = vst [vmem:[#allocation55_spill] sm:$0xff] %v6375_v22 }
 0x1ef   :  { %v1818_v10 = vadd.f32 %v1717_v19, %v1626_v26  ;;  %v1819_v58 = vadd.f32 %v1717_v19, %v1627_v60 }
 0x1f1   :  { %v1909_v38 = vpack.c.bf16 %v1819_v58, %v1818_v10  ;;  %v614_v35 = vpop.f32.mrf.mxu0  ;;  %v6398_v10 = vor.u32 %v5270_v1, %v5072_v13  ;;  %v6400_v58 = vor.u32 %v5236_v2, %v4946_v5 }
 0x1f2   :  { %v783_v36 = vpop.f32.mrf.mxu1 }
 0x1f3   :  { %v886_v43 = vpack.c.bf16 %v783_v36, %v614_v35  ;;  %v2010_v52 = vunpack.c.l.bf16 %v1909_v38  ;;  %v2011_v16 = vunpack.c.h.bf16 %v1909_v38  ;;  %8165 = vst [vmem:[#allocation57_spill] sm:$0xff] %v6398_v10  ;;  %v6402_v35 = vmax.f32 %v2008_v20, %v2136_v45 }
 0x1f4   :  { %4889 = vmatmul.msk.bf16.gmra.mxu0 %vm365_vm0, %v5211_v25  ;;  %8166 = vst [vmem:[#allocation58_spill] sm:$0xff] %v6400_v58  ;;  %v6404_v36 = vmax.f32 %v2009_v27, %v2137_v57 }
 0x1f5   :  { %v1628_v61 = vunpack.c.l.bf16 %v886_v43  ;;  %v1629_v49 = vunpack.c.h.bf16 %v886_v43  ;;  %4921 = vmatmul.msk.bf16.gmra.mxu1 %vm365_vm0, %v5211_v25  ;;  %v6396_v19 = vpop.f32.mrf.mxu2  ;;  %v2138_v26 = vmul.f32 0.20019531, %v2010_v52  ;;  %v2139_v60 = vmul.f32 0.20019531, %v2011_v16 }
 0x1f6   :  { %8164 = vst [vmem:[#allocation56_spill] sm:$0xff] %v6396_v19  ;;  %v1335_v25 = vperm.slane %v6185_v31, %v5743_v11 }
 0x1f7   :  { %v1820_v38 = vadd.f32 %v1718_v24, %v1628_v61  ;;  %v1821_v37 = vadd.f32 %v1718_v24, %v1629_v49  ;;  %v6406_v53 = vmax.f32 %v2010_v52, %v2138_v26  ;;  %v6408_v43 = vmax.f32 %v2011_v16, %v2139_v60  ;;  %v5212_v49 = vld [vmem:[%s8037_s1 + $0xe0] sm:$0xff] }
 0x1f8   :  { %v1719_v57 = vunpack.c.l.bf16 %v1335_v25  ;;  %v5274_v25 = vld [vmem:[%s8039_s3 + $0x14c] sm:$0xf0] }
 0x1f9   :  { %v1910_v1 = vpack.c.bf16 %v1821_v37, %v1820_v38  ;;  %v616_v20 = vpop.f32.mrf.mxu0  ;;  %v5088_v37 = vld [vmem:[%s8039_s3 + $0x140] sm:$0xf] }
 0x1fa   :  { %v785_v45 = vpop.f32.mrf.mxu1  ;;  %3013 = vmatmul.bf16.gmra.mxu2 %v6398_v10  ;;  %3062 = vmatmul.bf16.gmra.mxu3 %v6400_v58 }
 0x1fb   :  { %v887_v27 = vpack.c.bf16 %v785_v45, %v616_v20  ;;  %v2012_v31 = vunpack.c.l.bf16 %v1910_v1  ;;  %v2013_v61 = vunpack.c.h.bf16 %v1910_v1  ;;  %v5240_v1 = vld [vmem:[%s8039_s3 + $0x44] sm:$0xf] }
 0x1fd   :  { %v1630_v2 = vunpack.c.l.bf16 %v887_v27  ;;  %v1631_v5 = vunpack.c.h.bf16 %v887_v27  ;;  %v6418_v52 = vpop.f32.mrf.mxu2  ;;  %v2140_v20 = vmul.f32 0.20019531, %v2012_v31  ;;  %v4962_v27 = vld [vmem:[%s8039_s3 + $0x50] sm:$0xf0] }
 0x1fe   :  { %8167 = vst [vmem:[#allocation59_spill] sm:$0xff] %v6418_v52  ;;  %v6443_v34 = vor.u32 %v5240_v1, %v4962_v27  ;;  %v5278_v1 = vld [vmem:[%s8039_s3 + $0x16c] sm:$0xf0]  ;;  %v5244_v27 = vld [vmem:[%s8039_s3 + $0x64] sm:$0xf] }
 0x1ff   :  { %v1822_v16 = vadd.f32 %v1719_v57, %v1630_v2  ;;  %v1823_v24 = vadd.f32 %v1719_v57, %v1631_v5  ;;  %v2141_v5 = vmul.f32 0.20019531, %v2013_v61  ;;  %v6445_v46 = vmax.f32 %v2012_v31, %v2140_v20  ;;  %v5104_v20 = vld [vmem:[%s8039_s3 + $0x160] sm:$0xf] }
 0x200   :  { %8170 = vst [vmem:[#allocation62_spill] sm:$0xff] %v6443_v34 }
 0x201   :  { %v1911_v26 = vpack.c.bf16 %v1823_v24, %v1822_v16  ;;  %v619_v60 = vpop.f32.mrf.mxu0  ;;  %v6449_v13 = vmax.f32 %v2013_v61, %v2141_v5  ;;  %v5213_v61 = vld [vmem:[%s8037_s1 + $0xe8] sm:$0xff]  ;;  %v6480_v5 = vor.u32 %v5278_v1, %v5104_v20  ;;  %v5120_v20 = vld [vmem:[%s8039_s3 + $0x180] sm:$0xf]  ;;  %v5282_v1 = vld [vmem:[%s8039_s3 + $0x18c] sm:$0xf0] }
 0x202   :  { %v788_v38 = vpop.f32.mrf.mxu1 }
 0x203   :  { %v6429_v45 = vpack.c.bf16 %v788_v38, %v619_v60  ;;  %v2014_v57 = vunpack.c.l.bf16 %v1911_v26  ;;  %v2015_v2 = vunpack.c.h.bf16 %v1911_v26  ;;  %v6441_v38 = vor.u32 %v5274_v25, %v5088_v37  ;;  %8173 = vst [vmem:[#allocation65_spill] sm:$0xff] %v6480_v5 }
 0x204   :  { %4890 = vmatmul.msk.bf16.gmra.mxu0 %vm365_vm0, %v5212_v49 }
 0x205   :  { %4922 = vmatmul.msk.bf16.gmra.mxu1 %vm365_vm0, %v5212_v49  ;;  %v6439_v16 = vpop.f32.mrf.mxu2  ;;  %v2142_v24 = vmul.f32 0.20019531, %v2014_v57  ;;  %v2143_v60 = vmul.f32 0.20019531, %v2015_v2  ;;  %8169 = vst [vmem:[#allocation61_spill] sm:$0xff] %v6441_v38 }
 0x206   :  { %8168 = vst [vmem:[#allocation60_spill] sm:$0xff] %v6439_v16 }
 0x207   :  { %v6447_v41 = vmax.f32 %v2014_v57, %v2142_v24  ;;  %v6451_v26 = vmax.f32 %v2015_v2, %v2143_v60  ;;  %v4978_v57 = vld [vmem:[%s8039_s3 + $0x70] sm:$0xf0] }
 0x208   :  { %v6482_v24 = vor.u32 %v5244_v27, %v4978_v57  ;;  %v5248_v27 = vld [vmem:[%s8039_s3 + $0x84] sm:$0xf]  ;;  %v4994_v57 = vld [vmem:[%s8039_s3 + $0x90] sm:$0xf0] }
 0x209   :  { %v621_v10 = vpop.f32.mrf.mxu0  ;;  %v6509_v44 = vor.u32 %v5248_v27, %v4994_v57  ;;  %v1371_v27 = vperm.slane %v6183_v42, %v5743_v11  ;;  %v1344_v57 = vperm.slane %v6208_v30, %v5743_v11 }
 0x20a   :  { %v790_v58 = vpop.f32.mrf.mxu1  ;;  %3018 = vmatmul.bf16.gmra.mxu2 %v6441_v38  ;;  %3067 = vmatmul.bf16.gmra.mxu3 %v6443_v34  ;;  %8174 = vst [vmem:[#allocation66_spill] sm:$0xff] %v6482_v24  ;;  %v5214_v38 = vld [vmem:[%s8037_s1 + $0xf0] sm:$0xff] }
 0x20b   :  { %8178 = vst [vmem:[#allocation70_spill] sm:$0xff] %v6509_v44  ;;  %v1723_v30 = vunpack.c.l.bf16 %v1371_v27 }
 0x20d   :  { %v6459_v31 = vpop.f32.mrf.mxu2 }
 0x20e   :  { %8171 = vst [vmem:[#allocation63_spill] sm:$0xff] %v6459_v31 }
 0x211   :  { %v624_v37 = vpop.f32.mrf.mxu0 }
 0x212   :  { %v793_v25 = vpop.f32.mrf.mxu1 }
 0x214   :  { %4891 = vmatmul.msk.bf16.gmra.mxu0 %vm365_vm0, %v5213_v61 }
 0x215   :  { %4923 = vmatmul.msk.bf16.gmra.mxu1 %vm365_vm0, %v5213_v61  ;;  %v6478_v2 = vpop.f32.mrf.mxu2 }
 0x216   :  { %8172 = vst [vmem:[#allocation64_spill] sm:$0xff] %v6478_v2 }
 0x219   :  { %v626_v60 = vpop.f32.mrf.mxu0 }
 0x21a   :  { %v795_v49 = vpop.f32.mrf.mxu1  ;;  %3023 = vmatmul.bf16.gmra.mxu2 %v6480_v5  ;;  %3072 = vmatmul.bf16.gmra.mxu3 %v6482_v24  ;;  %v6507_v24 = vor.u32 %v5282_v1, %v5120_v20  ;;  %v1380_v20 = vperm.slane %v6071_v21, %v5743_v11  ;;  %v1362_v1 = vperm.slane %v6109_v47, %v5743_v11  ;;  %v5136_v47 = vld [vmem:[%s8039_s3 + $0x1a0] sm:$0xf] }
 0x21b   :  { %v891_v16 = vpack.c.bf16 %v795_v49, %v626_v60 }
 0x21c   :  { %8177 = vst [vmem:[#allocation69_spill] sm:$0xff] %v6507_v24  ;;  %v1724_v42 = vunpack.c.l.bf16 %v1380_v20  ;;  %v1722_v31 = vunpack.c.l.bf16 %v1362_v1 }
 0x21d   :  { %v6486_v51 = vpop.f32.mrf.mxu2  ;;  %v1638_v60 = vunpack.c.l.bf16 %v891_v16 }
 0x21e   :  { %8175 = vst [vmem:[#allocation67_spill] sm:$0xff] %v6486_v51  ;;  %v1398_v51 = vperm.slane %v6107_v8, %v5743_v11  ;;  %v5215_v8 = vld [vmem:[%s8037_s1 + $0xf8] sm:$0xff] }
 0x221   :  { %v629_v34 = vpop.f32.mrf.mxu0 }
 0x222   :  { %v798_v61 = vpop.f32.mrf.mxu1 }
 0x223   :  { %v892_v21 = vpack.c.bf16 %v798_v61, %v629_v34  ;;  %v5010_v34 = vld [vmem:[%s8039_s3 + $0xb0] sm:$0xf0]  ;;  %v889_v61 = vpack.c.bf16 %v790_v58, %v621_v10  ;;  %v1353_v10 = vperm.slane %v6145_v28, %v5743_v11  ;;  %v1632_v58 = vunpack.c.l.bf16 %v6429_v45 }
 0x224   :  { %4892 = vmatmul.msk.bf16.gmra.mxu0 %vm365_vm0, %v5214_v38 }
 0x225   :  { %4924 = vmatmul.msk.bf16.gmra.mxu1 %vm365_vm0, %v5214_v38  ;;  %v6505_v5 = vpop.f32.mrf.mxu2  ;;  %v1389_v38 = vperm.slane %v6092_v33, %v5743_v11  ;;  %v1407_v33 = vperm.slane %v6043_v32, %v5743_v11  ;;  %v5252_v32 = vld [vmem:[%s8039_s3 + $0xa4] sm:$0xf]  ;;  %v1640_v52 = vunpack.c.l.bf16 %v892_v21  ;;  %v1641_v19 = vunpack.c.h.bf16 %v892_v21 }
 0x226   :  { %8176 = vst [vmem:[#allocation68_spill] sm:$0xff] %v6505_v5  ;;  %v6550_v15 = vor.u32 %v5252_v32, %v5010_v34 }
 0x227   :  { %v1833_v32 = vadd.f32 %v1724_v42, %v1641_v19  ;;  %v1727_v28 = vunpack.c.l.bf16 %v1407_v33 }
 0x228   :  { %8182 = vst [vmem:[#allocation74_spill] sm:$0xff] %v6550_v15 }
 0x229   :  { %v631_v3 = vpop.f32.mrf.mxu0 }
 0x22a   :  { %v800_v55 = vpop.f32.mrf.mxu1  ;;  %3028 = vmatmul.bf16.gmra.mxu2 %v6507_v24  ;;  %3077 = vmatmul.bf16.gmra.mxu3 %v6509_v44  ;;  %v1726_v44 = vunpack.c.l.bf16 %v1398_v51  ;;  %v1720_v51 = vunpack.c.l.bf16 %v1344_v57  ;;  %v1639_v57 = vunpack.c.h.bf16 %v891_v16 }
 0x22b   :  { %v893_v24 = vpack.c.bf16 %v800_v55, %v631_v3  ;;  %v5286_v3 = vld [vmem:[%s8039_s3 + $0x1ac] sm:$0xf0] }
 0x22c   :  { %v6548_v22 = vor.u32 %v5286_v3, %v5136_v47  ;;  %v1635_v47 = vunpack.c.h.bf16 %v889_v61  ;;  %v1832_v3 = vadd.f32 %v1724_v42, %v1640_v52  ;;  %v1831_v14 = vadd.f32 %v1723_v30, %v1639_v57 }
 0x22d   :  { %v6513_v23 = vpop.f32.mrf.mxu2  ;;  %v1642_v20 = vunpack.c.l.bf16 %v893_v24  ;;  %v1643_v1 = vunpack.c.h.bf16 %v893_v24 }
 0x22e   :  { %8179 = vst [vmem:[#allocation71_spill] sm:$0xff] %v6513_v23  ;;  %v1725_v23 = vunpack.c.l.bf16 %v1389_v38  ;;  %v890_v38 = vpack.c.bf16 %v793_v25, %v624_v37 }
 0x22f   :  { %8181 = vst [vmem:[#allocation73_spill] sm:$0xff] %v6548_v22 }
 0x230   :  { %v1636_v25 = vunpack.c.l.bf16 %v890_v38  ;;  %v1637_v24 = vunpack.c.h.bf16 %v890_v38  ;;  %v1835_v21 = vadd.f32 %v1725_v23, %v1643_v1  ;;  %v1824_v38 = vadd.f32 %v1720_v51, %v1632_v58 }
 0x231   :  { %v634_v5 = vpop.f32.mrf.mxu0 }
 0x232   :  { %v803_v2 = vpop.f32.mrf.mxu1  ;;  %v1828_v16 = vadd.f32 %v1722_v31, %v1636_v25 }
 0x233   :  { %v894_v55 = vpack.c.bf16 %v803_v2, %v634_v5 }
 0x234   :  { %4893 = vmatmul.msk.bf16.gmra.mxu0 %vm365_vm0, %v5215_v8 }
 0x235   :  { %v1644_v27 = vunpack.c.l.bf16 %v894_v55  ;;  %v1645_v2 = vunpack.c.h.bf16 %v894_v55  ;;  %4925 = vmatmul.msk.bf16.gmra.mxu1 %vm365_vm0, %v5215_v8  ;;  %v6546_v5 = vpop.f32.mrf.mxu2  ;;  %v1633_v8 = vunpack.c.h.bf16 %v6429_v45  ;;  %v1634_v55 = vunpack.c.l.bf16 %v889_v61 }
 0x236   :  { %8180 = vst [vmem:[#allocation72_spill] sm:$0xff] %v6546_v5  ;;  %v1834_v5 = vadd.f32 %v1725_v23, %v1642_v20  ;;  %v1830_v45 = vadd.f32 %v1723_v30, %v1638_v60 }
 0x237   :  { %v1836_v49 = vadd.f32 %v1726_v44, %v1644_v27  ;;  %v1837_v37 = vadd.f32 %v1726_v44, %v1645_v2  ;;  %v1721_v44 = vunpack.c.l.bf16 %v1353_v10  ;;  %v1829_v2 = vadd.f32 %v1722_v31, %v1637_v24  ;;  %v5290_v24 = vld [vmem:[%s8039_s3 + $0x1cc] sm:$0xf0] }
 0x238   :  { %v1825_v20 = vadd.f32 %v1720_v51, %v1633_v8  ;;  %v1917_v19 = vpack.c.bf16 %v1835_v21, %v1834_v5  ;;  %v5152_v5 = vld [vmem:[%s8039_s3 + $0x1c0] sm:$0xf] }
 0x239   :  { %v1918_v34 = vpack.c.bf16 %v1837_v37, %v1836_v49  ;;  %v636_v48 = vpop.f32.mrf.mxu0  ;;  %v1826_v42 = vadd.f32 %v1721_v44, %v1634_v55  ;;  %v1827_v1 = vadd.f32 %v1721_v44, %v1635_v47  ;;  %v1916_v49 = vpack.c.bf16 %v1833_v32, %v1832_v3 }
 0x23a   :  { %v805_v54 = vpop.f32.mrf.mxu1  ;;  %3033 = vmatmul.bf16.gmra.mxu2 %v6548_v22  ;;  %3082 = vmatmul.bf16.gmra.mxu3 %v6550_v15  ;;  %v6560_v10 = vpack.c.bf16 %v1829_v2, %v1828_v16  ;;  %v2026_v30 = vunpack.c.l.bf16 %v1917_v19  ;;  %v2027_v51 = vunpack.c.h.bf16 %v1917_v19 }
 0x23b   :  { %v895_v27 = vpack.c.bf16 %v805_v54, %v636_v48  ;;  %v2028_v37 = vunpack.c.l.bf16 %v1918_v34  ;;  %v2029_v33 = vunpack.c.h.bf16 %v1918_v34  ;;  %v6562_v54 = vpack.c.bf16 %v1831_v14, %v1830_v45 }
 0x23c   :  { %v6564_v48 = vpack.c.bf16 %v1825_v20, %v1824_v38  ;;  %v2024_v57 = vunpack.c.l.bf16 %v1916_v49  ;;  %v2025_v8 = vunpack.c.h.bf16 %v1916_v49  ;;  %v1913_v14 = vpack.c.bf16 %v1827_v1, %v1826_v42 }
 0x23d   :  { %v1646_v23 = vunpack.c.l.bf16 %v895_v27  ;;  %v1647_v61 = vunpack.c.h.bf16 %v895_v27  ;;  %v6558_v52 = vpop.f32.mrf.mxu2  ;;  %v2156_v60 = vmul.f32 0.20019531, %v2028_v37  ;;  %v2157_v3 = vmul.f32 0.20019531, %v2029_v33 }
 0x23e   :  { %8183 = vst [vmem:[#allocation75_spill] sm:$0xff] %v6558_v52  ;;  %v2020_v32 = vunpack.c.l.bf16 %v6560_v10  ;;  %v2022_v34 = vunpack.c.l.bf16 %v6562_v54  ;;  %v2023_v44 = vunpack.c.h.bf16 %v6562_v54  ;;  %v2154_v2 = vmul.f32 0.20019531, %v2026_v30 }
 0x23f   :  { %v1838_v22 = vadd.f32 %v1727_v28, %v1646_v23  ;;  %v1839_v15 = vadd.f32 %v1727_v28, %v1647_v61  ;;  %v2021_v28 = vunpack.c.h.bf16 %v6560_v10  ;;  %v2155_v45 = vmul.f32 0.20019531, %v2027_v51 }
 0x240   :  { %v6586_v20 = vor.u32 %v5290_v24, %v5152_v5  ;;  %v2152_v61 = vmul.f32 0.20019531, %v2024_v57  ;;  %v2153_v19 = vmul.f32 0.20019531, %v2025_v8  ;;  %v2476_v42 = vmax.f32 %v2028_v37, %v2156_v60 }
 0x241   :  { %v1919_v31 = vpack.c.bf16 %v1839_v15, %v1838_v22  ;;  %v639_v58 = vpop.f32.mrf.mxu0  ;;  %v5256_v15 = vld [vmem:[%s8039_s3 + $0xc4] sm:$0xf]  ;;  %v5026_v22 = vld [vmem:[%s8039_s3 + $0xd0] sm:$0xf0]  ;;  %v2477_v49 = vmax.f32 %v2029_v33, %v2157_v3  ;;  %v2151_v10 = vmul.f32 0.20019531, %v2023_v44  ;;  %v2019_v54 = vunpack.c.h.bf16 %v1913_v14 }
 0x242   :  { %v808_v25 = vpop.f32.mrf.mxu1  ;;  %8186 = vst [vmem:[#allocation78_spill] sm:$0xff] %v6586_v20  ;;  %v6588_v23 = vor.u32 %v5256_v15, %v5026_v22  ;;  %v2475_v7 = vmax.f32 %v2027_v51, %v2155_v45  ;;  %v2016_v37 = vunpack.c.l.bf16 %v6564_v48  ;;  %v2017_v33 = vunpack.c.h.bf16 %v6564_v48 }
 0x243   :  { %v6572_v55 = vpack.c.bf16 %v808_v25, %v639_v58  ;;  %v2030_v21 = vunpack.c.l.bf16 %v1919_v31  ;;  %v2031_v47 = vunpack.c.h.bf16 %v1919_v31  ;;  %v2150_v58 = vmul.f32 0.20019531, %v2022_v34 }
 0x244   :  { %8187 = vst [vmem:[#allocation79_spill] sm:$0xff] %v6588_v23  ;;  %v2018_v25 = vunpack.c.l.bf16 %v1913_v14  ;;  %v2472_v24 = vmax.f32 %v2024_v57, %v2152_v61  ;;  %v2473_v60 = vmax.f32 %v2025_v8, %v2153_v19  ;;  %v2148_v14 = vmul.f32 0.20019531, %v2020_v32 }
 0x245   :  { %8184 = vst [vmem:[#allocation76_spill] sm:$0xff] %v6572_v55  ;;  %v6584_v38 = vpop.f32.mrf.mxu2  ;;  %v2158_v27 = vmul.f32 0.20019531, %v2030_v21  ;;  %v2159_v16 = vmul.f32 0.20019531, %v2031_v47  ;;  %v2474_v55 = vmax.f32 %v2026_v30, %v2154_v2  ;;  %v2149_v15 = vmul.f32 0.20019531, %v2021_v28 }
 0x246   :  { %8185 = vst [vmem:[#allocation77_spill] sm:$0xff] %v6584_v38  ;;  %v2146_v30 = vmul.f32 0.20019531, %v2018_v25  ;;  %v2147_v51 = vmul.f32 0.20019531, %v2019_v54  ;;  %v2470_v3 = vmax.f32 %v2022_v34, %v2150_v58  ;;  %v2144_v45 = vmul.f32 0.20019531, %v2016_v37 }
 0x247   :  { %v2478_v1 = vmax.f32 %v2030_v21, %v2158_v27  ;;  %v2479_v31 = vmax.f32 %v2031_v47, %v2159_v16  ;;  %v2556_v21 = vpack.c.bf16 %v2474_v55, %v2472_v24  ;;  %v2557_v47 = vpack.c.bf16 %v2475_v7, %v2473_v60  ;;  %v5168_v7 = vld [vmem:[%s8039_s3 + $0x1e0] sm:$0xf] }
 0x248   :  { %v2471_v27 = vmax.f32 %v2023_v44, %v2151_v10  ;;  %v2468_v16 = vmax.f32 %v2020_v32, %v2148_v14  ;;  %v2469_v2 = vmax.f32 %v2021_v28, %v2149_v15  ;;  %v2145_v48 = vmul.f32 0.20019531, %v2017_v33  ;;  %v5294_v28 = vld [vmem:[%s8039_s3 + $0x1ec] sm:$0xf0]  ;;  %v5042_v44 = vld [vmem:[%s8039_s3 + $0xf0] sm:$0xf0] }
 0x249   :  { %v2558_v52 = vpack.c.bf16 %v2478_v1, %v2476_v42  ;;  %v2559_v38 = vpack.c.bf16 %v2479_v31, %v2477_v49  ;;  %v6590_v17 = vpop.f32.mrf.mxu0  ;;  %v2467_v61 = vmax.f32 %v2019_v54, %v2147_v51  ;;  %v2464_v32 = vmax.f32 %v2016_v37, %v2144_v45 }
 0x24a   :  { %v6592_v5 = vpop.f32.mrf.mxu1  ;;  %3038 = vmatmul.bf16.gmra.mxu2 %v6586_v20  ;;  %3087 = vmatmul.bf16.gmra.mxu3 %v6588_v23  ;;  %v2554_v57 = vpack.c.bf16 %v2470_v3, %v2468_v16  ;;  %v2555_v8 = vpack.c.bf16 %v2471_v27, %v2469_v2  ;;  %v2465_v34 = vmax.f32 %v2017_v33, %v2145_v48 }
 0x24b   :  { %3138 = vmatpush.bf16.msrb.mxu2 %v2558_v52  ;;  %3494 = vmatpush.bf16.msrb.mxu0 %v2559_v38  ;;  %v1434_v52 = vperm.slane %v6263_v62, %v5743_v11  ;;  %v2466_v38 = vmax.f32 %v2018_v25, %v2146_v30  ;;  %v5260_v62 = vld [vmem:[%s8039_s3 + $0xe4] sm:$0xf]  ;;  %v6616_v54 = vor.u32 %v5294_v28, %v5168_v7 }
 0x24c   :  { %v2553_v25 = vpack.c.bf16 %v2467_v61, %v2465_v34  ;;  %v6618_v37 = vor.u32 %v5260_v62, %v5042_v44  ;;  %v8191_v30 = vpack.c.bf16 %v6447_v41, %v6445_v46  ;;  %v8192_v51 = vpack.c.bf16 %v6451_v26, %v6449_v13  ;;  %v5264_v46 = vld [vmem:[%s8039_s3 + $0x104] sm:$0xf]  ;;  %v8206_v62 = vld [vmem:[#allocation48_spill] sm:$0xff] }
 0x24d   :  { %v6598_v22 = vpop.f32.mrf.mxu2  ;;  %v1730_v1 = vunpack.c.l.bf16 %v1434_v52  ;;  %v2552_v10 = vpack.c.bf16 %v2466_v38, %v2464_v32  ;;  %8189 = vst [vmem:[#allocation81_spill] sm:$0xff] %v6616_v54  ;;  %v8195_v3 = vpack.c.bf16 %v6408_v43, %v6404_v36  ;;  %v1452_v27 = vperm.slane %v6223_v63, %v5743_v11  ;;  %v4936_v63 = vld [vmem:[%s8039_s3 + $0x8] sm:$0xf]  ;;  %v5235_v36 = vld [vmem:[%s8039_s3 + $0x14] sm:$0xf0] }
 0x24e   :  { %8190 = vst [vmem:[#allocation82_spill] sm:$0xff] %v6618_v37  ;;  %v8196_v26 = vpack.c.bf16 %v6363_v29, %v6356_v59  ;;  %v8200_v52 = vpack.c.bf16 %v6313_v4, %v6306_v6  ;;  %v1461_v38 = vperm.slane %v6238_v12, %v5743_v11  ;;  %v8203_v6 = vld [vmem:[#allocation18_spill] sm:$0xff]  ;;  %v1470_v44 = vperm.slane %v8206_v62, %v5743_v11  ;;  %v8220_v62 = vld [vmem:[#allocation11_spill] sm:$0xff] }
 0x24f   :  { %3139 = vmatpush.bf16.msrb.mxu2 %v2556_v21  ;;  %3495 = vmatpush.bf16.msrb.mxu0 %v2557_v47  ;;  %v8194_v47 = vpack.c.bf16 %v6406_v53, %v6402_v35  ;;  %v8197_v53 = vpack.c.bf16 %v6365_v50, %v6358_v40  ;;  %v5058_v35 = vld [vmem:[%s8039_s3 + $0x110] sm:$0xf0]  ;;  %v1732_v43 = vunpack.c.l.bf16 %v1452_v27  ;;  %v4937_v40 = vor.u32 %v5235_v36, %v4936_v63  ;;  %v5239_v27 = vld [vmem:[%s8039_s3 + $0x34] sm:$0xf0] }
 0x250   :  { %v6664_v45 = vor.u32 %v5264_v46, %v5058_v35  ;;  %v8204_v4 = vpack.c.bf16 %v5977_v9, %v8203_v6  ;;  %v1734_v46 = vunpack.c.l.bf16 %v1470_v44  ;;  %v8218_v6 = vld [vmem:[#allocation40_spill] sm:$0xff] }
 0x251   :  { %v644_v19 = vpop.f32.mrf.mxu0 }
 0x252   :  { %v813_v42 = vpop.f32.mrf.mxu1  ;;  %8199 = vst [vmem:[#allocation85_spill] sm:$0xff] %v6664_v45 }
 0x253   :  { %v898_v55 = vpack.c.bf16 %v813_v42, %v644_v19  ;;  %3140 = vmatpush.bf16.msrb.mxu2 %v2554_v57  ;;  %3496 = vmatpush.bf16.msrb.mxu0 %v2555_v8  ;;  %v8201_v57 = vpack.c.bf16 %v6315_v39, %v6308_v18  ;;  %v8202_v8 = vpack.c.bf16 %v5994_v56, %v5997_v0  ;;  %v1733_v18 = vunpack.c.l.bf16 %v1461_v38 }
 0x255   :  { %v1652_v49 = vunpack.c.l.bf16 %v898_v55  ;;  %v1653_v31 = vunpack.c.h.bf16 %v898_v55  ;;  %v6614_v58 = vpop.f32.mrf.mxu2 }
 0x256   :  { %8188 = vst [vmem:[#allocation80_spill] sm:$0xff] %v6614_v58  ;;  %v1420_v58 = vpop.permute.xlu0 %1419 }
 0x257   :  { %v1844_v33 = vadd.f32 %v1730_v1, %v1652_v49  ;;  %v1845_v24 = vadd.f32 %v1730_v1, %v1653_v31  ;;  %3141 = vmatpush.bf16.msrb.mxu2 %v2552_v10  ;;  %3497 = vmatpush.bf16.msrb.mxu0 %v2553_v25  ;;  %v8207_v1 = vld [vmem:[#allocation16_spill] sm:$0xff]  ;;  %v8208_v49 = vld [vmem:[#allocation17_spill] sm:$0xff] }
 0x258   :  { %v8209_v31 = vpack.c.bf16 %v8207_v1, %v8208_v49 }
 0x259   :  { %v6620_v60 = vpack.c.bf16 %v1845_v24, %v1844_v33  ;;  %v6622_v14 = vpop.f32.mrf.mxu0  ;;  %v5268_v33 = vld [vmem:[%s8039_s3 + $0x124] sm:$0xf] }
 0x25a   :  { %v6624_v15 = vpop.f32.mrf.mxu1  ;;  %3043 = vmatmul.bf16.gmra.mxu2 %v6616_v54  ;;  %3092 = vmatmul.bf16.gmra.mxu3 %v6618_v37 }
 0x25b   :  { %3142 = vmatpush.bf16.msrb.mxu2 %v8191_v30  ;;  %3498 = vmatpush.bf16.msrb.mxu0 %v8192_v51 }
 0x25d   :  { %v6634_v21 = vpop.f32.mrf.mxu2 }
 0x25e   :  { %8193 = vst [vmem:[#allocation83_spill] sm:$0xff] %v6634_v21 }
 0x25f   :  { %3143 = vmatpush.bf16.msrb.mxu2 %v8194_v47  ;;  %3499 = vmatpush.bf16.msrb.mxu0 %v8195_v3  ;;  %v5074_v47 = vld [vmem:[%s8039_s3 + $0x130] sm:$0xf0]  ;;  %v4952_v3 = vld [vmem:[%s8039_s3 + $0x28] sm:$0xf] }
 0x261   :  { %v649_v16 = vpop.f32.mrf.mxu0 }
 0x262   :  { %v818_v41 = vpop.f32.mrf.mxu1 }
 0x263   :  { %v900_v13 = vpack.c.bf16 %v818_v41, %v649_v16  ;;  %3144 = vmatpush.bf16.msrb.mxu2 %v8196_v26  ;;  %3500 = vmatpush.bf16.msrb.mxu0 %v8197_v53  ;;  %v8211_v26 = vld [vmem:[#allocation14_spill] sm:$0xff] }
 0x265   :  { %v1656_v2 = vunpack.c.l.bf16 %v900_v13  ;;  %v1657_v59 = vunpack.c.h.bf16 %v900_v13  ;;  %v6662_v29 = vpop.f32.mrf.mxu2  ;;  %v8210_v13 = vld [vmem:[#allocation15_spill] sm:$0xff] }
 0x266   :  { %8198 = vst [vmem:[#allocation84_spill] sm:$0xff] %v6662_v29  ;;  %v8212_v53 = vpack.c.bf16 %v8210_v13, %v8211_v26  ;;  %v5272_v26 = vld [vmem:[%s8039_s3 + $0x144] sm:$0xf] }
 0x267   :  { %v1848_v50 = vadd.f32 %v1732_v43, %v1656_v2  ;;  %v1849_v48 = vadd.f32 %v1732_v43, %v1657_v59  ;;  %3145 = vmatpush.bf16.msrb.mxu2 %v8200_v52  ;;  %3501 = vmatpush.bf16.msrb.mxu0 %v8201_v57 }
 0x269   :  { %v1924_v61 = vpack.c.bf16 %v1849_v48, %v1848_v50  ;;  %v651_v19 = vpop.f32.mrf.mxu0  ;;  %v4953_v50 = vor.u32 %v5239_v27, %v4952_v3  ;;  %v8224_v3 = vld [vmem:[#allocation8_spill] sm:$0xff]  ;;  %v8225_v27 = vld [vmem:[#allocation9_spill] sm:$0xff] }
 0x26a   :  { %v820_v42 = vpop.f32.mrf.mxu1  ;;  %3097 = vmatmul.bf16.gmra.mxu3 %v6664_v45  ;;  %3146 = vmatmul.bf16.vlgmr.msrb.gmra.mxu2 %v4937_v40 }
 0x26b   :  { %3316 = vmatpush.bf16.msra.mxu2 %v8202_v8  ;;  %v901_v7 = vpack.c.bf16 %v820_v42, %v651_v19  ;;  %3502 = vmatmul.bf16.vlgmr.msrb.gmra.mxu0 %v4937_v40  ;;  %v2040_v12 = vunpack.c.l.bf16 %v1924_v61  ;;  %v2041_v32 = vunpack.c.h.bf16 %v1924_v61  ;;  %v6709_v40 = vor.u32 %v5268_v33, %v5074_v47  ;;  %v8215_v19 = vld [vmem:[#allocation12_spill] sm:$0xff]  ;;  %v8216_v42 = vld [vmem:[#allocation13_spill] sm:$0xff] }
 0x26d   :  { %v1658_v39 = vunpack.c.l.bf16 %v901_v7  ;;  %v1659_v55 = vunpack.c.h.bf16 %v901_v7  ;;  %v6681_v56 = vpop.f32.mrf.mxu2  ;;  %v6683_v0 = vpop.f32.mrf.mxu3  ;;  %v2168_v24 = vmul.f32 0.20019531, %v2040_v12  ;;  %v2169_v30 = vmul.f32 0.20019531, %v2041_v32  ;;  %8214 = vst [vmem:[#allocation16_spill] sm:$0xff] %v6709_v40 }
 0x26e   :  { %8205 = vst [vmem:[#allocation18_spill] sm:$0xff] %v6681_v56  ;;  %v8217_v7 = vpack.c.bf16 %v8215_v19, %v8216_v42  ;;  %v8227_v42 = vld [vmem:[#allocation6_spill] sm:$0xff] }
 0x26f   :  { %3317 = vmatpush.bf16.msra.mxu2 %v8204_v4  ;;  %v1850_v34 = vadd.f32 %v1733_v18, %v1658_v39  ;;  %v1851_v28 = vadd.f32 %v1733_v18, %v1659_v55  ;;  %v6711_v48 = vmax.f32 %v2040_v12, %v2168_v24  ;;  %v6713_v52 = vmax.f32 %v2041_v32, %v2169_v30 }
 0x270   :  { %v1479_v4 = vperm.slane %v8218_v6, %v5743_v11 }
 0x271   :  { %v1925_v9 = vpack.c.bf16 %v1851_v28, %v1850_v34  ;;  %v654_v10 = vpop.f32.mrf.mxu0  ;;  %v8219_v28 = vld [vmem:[#allocation10_spill] sm:$0xff] }
 0x272   :  { %v823_v25 = vpop.f32.mrf.mxu1  ;;  %v8221_v44 = vpack.c.bf16 %v8219_v28, %v8220_v62  ;;  %v1735_v1 = vunpack.c.l.bf16 %v1479_v4 }
 0x273   :  { %3318 = vmatpush.bf16.msra.mxu2 %v8209_v31  ;;  %v902_v51 = vpack.c.bf16 %v823_v25, %v654_v10  ;;  %v2042_v16 = vunpack.c.l.bf16 %v1925_v9  ;;  %v2043_v41 = vunpack.c.h.bf16 %v1925_v9 }
 0x275   :  { %v1660_v35 = vunpack.c.l.bf16 %v902_v51  ;;  %v1661_v63 = vunpack.c.h.bf16 %v902_v51  ;;  %v6705_v36 = vpop.f32.mrf.mxu2  ;;  %v6707_v43 = vpop.f32.mrf.mxu3  ;;  %v2170_v2 = vmul.f32 0.20019531, %v2042_v16  ;;  %v2171_v59 = vmul.f32 0.20019531, %v2043_v41  ;;  %v8223_v51 = vld [vmem:[#allocation36_spill] sm:$0xff] }
 0x276   :  { %8213 = vst [vmem:[#allocation48_spill] sm:$0xff] %v6705_v36  ;;  %v1488_v47 = vperm.slane %v8223_v51, %v5743_v11 }
 0x277   :  { %3319 = vmatpush.bf16.msra.mxu2 %v8212_v53  ;;  %v1852_v57 = vadd.f32 %v1734_v46, %v1660_v35  ;;  %v1853_v8 = vadd.f32 %v1734_v46, %v1661_v63  ;;  %v6715_v38 = vmax.f32 %v2042_v16, %v2170_v2  ;;  %v6717_v61 = vmax.f32 %v2043_v41, %v2171_v59  ;;  %v5090_v2 = vld [vmem:[%s8039_s3 + $0x150] sm:$0xf0]  ;;  %v4968_v59 = vld [vmem:[%s8039_s3 + $0x48] sm:$0xf] }
 0x278   :  { %v8226_v16 = vpack.c.bf16 %v8224_v3, %v8225_v27  ;;  %v1736_v19 = vunpack.c.l.bf16 %v1488_v47  ;;  %v6760_v62 = vor.u32 %v5272_v26, %v5090_v2  ;;  %v8232_v47 = vld [vmem:[#allocation44_spill] sm:$0xff] }
 0x279   :  { %v1926_v18 = vpack.c.bf16 %v1853_v8, %v1852_v57  ;;  %v656_v12 = vpop.f32.mrf.mxu0  ;;  %v1497_v3 = vperm.slane %v8232_v47, %v5743_v11 }
 0x27a   :  { %v825_v32 = vpop.f32.mrf.mxu1  ;;  %3102 = vmatmul.bf16.gmra.mxu3 %v6709_v40  ;;  %3151 = vmatmul.bf16.gmra.mxu2 %v4953_v50  ;;  %8231 = vst [vmem:[#allocation14_spill] sm:$0xff] %v6760_v62 }
 0x27b   :  { %3320 = vmatpush.bf16.msra.mxu2 %v8217_v7  ;;  %v903_v34 = vpack.c.bf16 %v825_v32, %v656_v12  ;;  %3507 = vmatmul.bf16.gmra.mxu0 %v4953_v50  ;;  %v2044_v25 = vunpack.c.l.bf16 %v1926_v18  ;;  %v2045_v33 = vunpack.c.h.bf16 %v1926_v18  ;;  %v5243_v50 = vld [vmem:[%s8039_s3 + $0x54] sm:$0xf0]  ;;  %v8228_v7 = vld [vmem:[#allocation7_spill] sm:$0xff] }
 0x27c   :  { %v8229_v6 = vpack.c.bf16 %v8227_v42, %v8228_v7 }
 0x27d   :  { %v1662_v49 = vunpack.c.l.bf16 %v903_v34  ;;  %v1663_v31 = vunpack.c.h.bf16 %v903_v34  ;;  %v6732_v9 = vpop.f32.mrf.mxu2  ;;  %v6734_v10 = vpop.f32.mrf.mxu3  ;;  %v2172_v53 = vmul.f32 0.20019531, %v2044_v25  ;;  %v2173_v35 = vmul.f32 0.20019531, %v2045_v33 }
 0x27e   :  { %8222 = vst [vmem:[#allocation17_spill] sm:$0xff] %v6732_v9 }
 0x27f   :  { %3321 = vmatpush.bf16.msra.mxu2 %v8221_v44  ;;  %v1854_v24 = vadd.f32 %v1735_v1, %v1662_v49  ;;  %v1855_v30 = vadd.f32 %v1735_v1, %v1663_v31  ;;  %v4969_v44 = vor.u32 %v5243_v50, %v4968_v59  ;;  %v6762_v1 = vmax.f32 %v2044_v25, %v2172_v53 }
 0x280   :  { %v6764_v49 = vmax.f32 %v2045_v33, %v2173_v35 }
 0x281   :  { %v1927_v41 = vpack.c.bf16 %v1855_v30, %v1854_v24  ;;  %v659_v46 = vpop.f32.mrf.mxu0 }
 0x282   :  { %v828_v13 = vpop.f32.mrf.mxu1 }
 0x283   :  { %3322 = vmatpush.bf16.msra.mxu2 %v8226_v16  ;;  %v904_v63 = vpack.c.bf16 %v828_v13, %v659_v46  ;;  %v2046_v57 = vunpack.c.l.bf16 %v1927_v41  ;;  %v2047_v8 = vunpack.c.h.bf16 %v1927_v41  ;;  %v1737_v13 = vunpack.c.l.bf16 %v1497_v3 }
 0x285   :  { %v1664_v4 = vunpack.c.l.bf16 %v904_v63  ;;  %v1665_v18 = vunpack.c.h.bf16 %v904_v63  ;;  %v6756_v12 = vpop.f32.mrf.mxu2  ;;  %v6758_v32 = vpop.f32.mrf.mxu3  ;;  %v2174_v34 = vmul.f32 0.20019531, %v2046_v57  ;;  %v2175_v28 = vmul.f32 0.20019531, %v2047_v8 }
 0x286   :  { %8230 = vst [vmem:[#allocation15_spill] sm:$0xff] %v6756_v12 }
 0x287   :  { %3323 = vmatpush.bf16.msra.mxu2 %v8229_v6  ;;  %v1856_v31 = vadd.f32 %v1736_v19, %v1664_v4  ;;  %v1857_v24 = vadd.f32 %v1736_v19, %v1665_v18  ;;  %v6766_v30 = vmax.f32 %v2046_v57, %v2174_v34  ;;  %v6768_v51 = vmax.f32 %v2047_v8, %v2175_v28  ;;  %v8234_v8 = vld [vmem:[#allocation29_spill] sm:$0xff]  ;;  %v5276_v4 = vld [vmem:[%s8039_s3 + $0x164] sm:$0xf] }
 0x288   :  { %v1506_v19 = vperm.slane %v8234_v8, %v5743_v11 }
 0x289   :  { %v1928_v27 = vpack.c.bf16 %v1857_v24, %v1856_v31  ;;  %v661_v25 = vpop.f32.mrf.mxu0  ;;  %v4984_v31 = vld [vmem:[%s8039_s3 + $0x68] sm:$0xf]  ;;  %v5247_v24 = vld [vmem:[%s8039_s3 + $0x74] sm:$0xf0] }
 0x28a   :  { %v830_v46 = vpop.f32.mrf.mxu1  ;;  %3107 = vmatmul.bf16.gmra.mxu3 %v6760_v62  ;;  %3156 = vmatmul.bf16.gmra.mxu2 %v4969_v44 }
 0x28b   :  { %v905_v33 = vpack.c.bf16 %v830_v46, %v661_v25  ;;  %3512 = vmatmul.bf16.gmra.mxu0 %v4969_v44  ;;  %v2048_v2 = vunpack.c.l.bf16 %v1928_v27  ;;  %v2049_v59 = vunpack.c.h.bf16 %v1928_v27  ;;  %v5106_v44 = vld [vmem:[%s8039_s3 + $0x170] sm:$0xf0]  ;;  %v1738_v27 = vunpack.c.l.bf16 %v1506_v19 }
 0x28d   :  { %v1666_v26 = vunpack.c.l.bf16 %v905_v33  ;;  %v1667_v53 = vunpack.c.h.bf16 %v905_v33  ;;  %v6777_v35 = vpop.f32.mrf.mxu2  ;;  %v6779_v63 = vpop.f32.mrf.mxu3  ;;  %v2176_v18 = vmul.f32 0.20019531, %v2048_v2  ;;  %v2177_v34 = vmul.f32 0.20019531, %v2049_v59 }
 0x28e   :  { %8233 = vst [vmem:[#allocation12_spill] sm:$0xff] %v6777_v35 }
 0x28f   :  { %v1858_v50 = vadd.f32 %v1737_v13, %v1666_v26  ;;  %v1859_v57 = vadd.f32 %v1737_v13, %v1667_v53  ;;  %v6801_v8 = vmax.f32 %v2048_v2, %v2176_v18 }
 0x291   :  { %v1929_v42 = vpack.c.bf16 %v1859_v57, %v1858_v50  ;;  %v664_v7 = vpop.f32.mrf.mxu0  ;;  %v6799_v50 = vor.u32 %v5276_v4, %v5106_v44  ;;  %v4985_v57 = vor.u32 %v5247_v24, %v4984_v31 }
 0x292   :  { %v833_v6 = vpop.f32.mrf.mxu1 }
 0x293   :  { %v906_v28 = vpack.c.bf16 %v833_v6, %v664_v7  ;;  %v2050_v47 = vunpack.c.l.bf16 %v1929_v42  ;;  %v2051_v3 = vunpack.c.h.bf16 %v1929_v42  ;;  %8236 = vst [vmem:[#allocation40_spill] sm:$0xff] %v6799_v50  ;;  %v6803_v7 = vmax.f32 %v2049_v59, %v2177_v34  ;;  %v8237_v42 = vld [vmem:[#allocation34_spill] sm:$0xff] }
 0x295   :  { %v1668_v25 = vunpack.c.l.bf16 %v906_v28  ;;  %v1669_v46 = vunpack.c.h.bf16 %v906_v28  ;;  %v6795_v33 = vpop.f32.mrf.mxu2  ;;  %v6797_v13 = vpop.f32.mrf.mxu3  ;;  %v2178_v26 = vmul.f32 0.20019531, %v2050_v47  ;;  %v2179_v53 = vmul.f32 0.20019531, %v2051_v3 }
 0x296   :  { %8235 = vst [vmem:[#allocation13_spill] sm:$0xff] %v6795_v33  ;;  %v1515_v28 = vperm.slane %v8237_v42, %v5743_v11 }
 0x297   :  { %v1860_v6 = vadd.f32 %v1738_v27, %v1668_v25  ;;  %v1861_v55 = vadd.f32 %v1738_v27, %v1669_v46  ;;  %v6805_v39 = vmax.f32 %v2050_v47, %v2178_v26  ;;  %v6807_v19 = vmax.f32 %v2051_v3, %v2179_v53  ;;  %v8239_v26 = vld [vmem:[#allocation35_spill] sm:$0xff] }
 0x298   :  { %v1739_v34 = vunpack.c.l.bf16 %v1515_v28  ;;  %v1524_v53 = vperm.slane %v8239_v26, %v5743_v11  ;;  %v5000_v28 = vld [vmem:[%s8039_s3 + $0x88] sm:$0xf] }
 0x299   :  { %v666_v44 = vpop.f32.mrf.mxu0  ;;  %v1930_v59 = vpack.c.bf16 %v1861_v55, %v1860_v6  ;;  %v5280_v55 = vld [vmem:[%s8039_s3 + $0x184] sm:$0xf] }
 0x29a   :  { %v835_v2 = vpop.f32.mrf.mxu1  ;;  %3112 = vmatmul.bf16.gmra.mxu3 %v6799_v50  ;;  %3161 = vmatmul.bf16.gmra.mxu2 %v4985_v57 }
 0x29b   :  { %v907_v18 = vpack.c.bf16 %v835_v2, %v666_v44  ;;  %3517 = vmatmul.bf16.gmra.mxu0 %v4985_v57  ;;  %v2052_v46 = vunpack.c.l.bf16 %v1930_v59  ;;  %v2053_v42 = vunpack.c.h.bf16 %v1930_v59  ;;  %v5122_v57 = vld [vmem:[%s8039_s3 + $0x190] sm:$0xf0]  ;;  %v5251_v44 = vld [vmem:[%s8039_s3 + $0x94] sm:$0xf0] }
 0x29c   :  { %v6838_v50 = vor.u32 %v5280_v55, %v5122_v57  ;;  %v5001_v62 = vor.u32 %v5251_v44, %v5000_v28 }
 0x29d   :  { %v1670_v31 = vunpack.c.l.bf16 %v907_v18  ;;  %v1671_v24 = vunpack.c.h.bf16 %v907_v18  ;;  %v6816_v47 = vpop.f32.mrf.mxu2  ;;  %v6818_v3 = vpop.f32.mrf.mxu3  ;;  %v2180_v59 = vmul.f32 0.20019531, %v2052_v46 }
 0x29e   :  { %8238 = vst [vmem:[#allocation10_spill] sm:$0xff] %v6816_v47 }
 0x29f   :  { %v1862_v27 = vadd.f32 %v1739_v34, %v1670_v31  ;;  %v1863_v25 = vadd.f32 %v1739_v34, %v1671_v24  ;;  %v1740_v34 = vunpack.c.l.bf16 %v1524_v53  ;;  %v2181_v31 = vmul.f32 0.20019531, %v2053_v42  ;;  %8241 = vst [vmem:[#allocation36_spill] sm:$0xff] %v6838_v50 }
 0x2a0   :  { %v6840_v20 = vmax.f32 %v2052_v46, %v2180_v59 }
 0x2a1   :  { %v1931_v16 = vpack.c.bf16 %v1863_v25, %v1862_v27  ;;  %v669_v4 = vpop.f32.mrf.mxu0 }
 0x2a2   :  { %v838_v41 = vpop.f32.mrf.mxu1 }
 0x2a3   :  { %v908_v6 = vpack.c.bf16 %v838_v41, %v669_v4  ;;  %v2054_v2 = vunpack.c.l.bf16 %v1931_v16  ;;  %v2055_v18 = vunpack.c.h.bf16 %v1931_v16  ;;  %v6844_v16 = vmax.f32 %v2053_v42, %v2181_v31 }
 0x2a5   :  { %v1672_v24 = vunpack.c.l.bf16 %v908_v6  ;;  %v1673_v27 = vunpack.c.h.bf16 %v908_v6  ;;  %v6834_v25 = vpop.f32.mrf.mxu2  ;;  %v6836_v26 = vpop.f32.mrf.mxu3  ;;  %v2182_v41 = vmul.f32 0.20019531, %v2054_v2  ;;  %v2183_v4 = vmul.f32 0.20019531, %v2055_v18  ;;  %v8242_v6 = vld [vmem:[#allocation28_spill] sm:$0xff] }
 0x2a6   :  { %8240 = vst [vmem:[#allocation11_spill] sm:$0xff] %v6834_v25  ;;  %v1533_v37 = vperm.slane %v8242_v6, %v5743_v11 }
 0x2a7   :  { %v1864_v54 = vadd.f32 %v1740_v34, %v1672_v24  ;;  %v1865_v40 = vadd.f32 %v1740_v34, %v1673_v27  ;;  %v6842_v45 = vmax.f32 %v2054_v2, %v2182_v41  ;;  %v6846_v53 = vmax.f32 %v2055_v18, %v2183_v4  ;;  %v8244_v24 = vld [vmem:[#allocation24_spill] sm:$0xff] }
 0x2a8   :  { %v1741_v42 = vunpack.c.l.bf16 %v1533_v37  ;;  %v1542_v27 = vperm.slane %v8244_v24, %v5743_v11  ;;  %v5284_v37 = vld [vmem:[%s8039_s3 + $0x1a4] sm:$0xf] }
 0x2a9   :  { %v1932_v25 = vpack.c.bf16 %v1865_v40, %v1864_v54  ;;  %v671_v55 = vpop.f32.mrf.mxu0 }
 0x2aa   :  { %v840_v57 = vpop.f32.mrf.mxu1  ;;  %3117 = vmatmul.bf16.gmra.mxu3 %v6838_v50  ;;  %3166 = vmatmul.bf16.gmra.mxu2 %v5001_v62 }
 0x2ab   :  { %v909_v28 = vpack.c.bf16 %v840_v57, %v671_v55  ;;  %3522 = vmatmul.bf16.gmra.mxu0 %v5001_v62  ;;  %v2056_v34 = vunpack.c.l.bf16 %v1932_v25  ;;  %v2057_v31 = vunpack.c.h.bf16 %v1932_v25  ;;  %v5016_v25 = vld [vmem:[%s8039_s3 + $0xa8] sm:$0xf] }
 0x2ad   :  { %v1674_v44 = vunpack.c.l.bf16 %v909_v28  ;;  %v1675_v2 = vunpack.c.h.bf16 %v909_v28  ;;  %v6855_v59 = vpop.f32.mrf.mxu2  ;;  %v6857_v18 = vpop.f32.mrf.mxu3  ;;  %v2184_v62 = vmul.f32 0.20019531, %v2056_v34  ;;  %v2185_v55 = vmul.f32 0.20019531, %v2057_v31  ;;  %v5138_v28 = vld [vmem:[%s8039_s3 + $0x1b0] sm:$0xf0] }
 0x2ae   :  { %8243 = vst [vmem:[#allocation8_spill] sm:$0xff] %v6855_v59  ;;  %v6877_v50 = vor.u32 %v5284_v37, %v5138_v28  ;;  %v5288_v37 = vld [vmem:[%s8039_s3 + $0x1c4] sm:$0xf] }
 0x2af   :  { %v1866_v54 = vadd.f32 %v1741_v42, %v1674_v44  ;;  %v1867_v40 = vadd.f32 %v1741_v42, %v1675_v2  ;;  %v5255_v42 = vld [vmem:[%s8039_s3 + $0xb4] sm:$0xf0]  ;;  %v6879_v47 = vmax.f32 %v2056_v34, %v2184_v62  ;;  %v6881_v33 = vmax.f32 %v2057_v31, %v2185_v55 }
 0x2b0   :  { %8246 = vst [vmem:[#allocation6_spill] sm:$0xff] %v6877_v50  ;;  %v5017_v59 = vor.u32 %v5255_v42, %v5016_v25 }
 0x2b1   :  { %v1933_v41 = vpack.c.bf16 %v1867_v40, %v1866_v54  ;;  %v674_v4 = vpop.f32.mrf.mxu0  ;;  %v1742_v54 = vunpack.c.l.bf16 %v1542_v27 }
 0x2b2   :  { %v843_v6 = vpop.f32.mrf.mxu1 }
 0x2b3   :  { %v910_v57 = vpack.c.bf16 %v843_v6, %v674_v4  ;;  %v2058_v44 = vunpack.c.l.bf16 %v1933_v41  ;;  %v2059_v2 = vunpack.c.h.bf16 %v1933_v41  ;;  %v8247_v41 = vld [vmem:[#allocation33_spill] sm:$0xff] }
 0x2b5   :  { %v1676_v40 = vunpack.c.l.bf16 %v910_v57  ;;  %v1677_v24 = vunpack.c.h.bf16 %v910_v57  ;;  %v6873_v46 = vpop.f32.mrf.mxu2  ;;  %v6875_v4 = vpop.f32.mrf.mxu3  ;;  %v2186_v6 = vmul.f32 0.20019531, %v2058_v44  ;;  %v2187_v23 = vmul.f32 0.20019531, %v2059_v2 }
 0x2b6   :  { %8245 = vst [vmem:[#allocation9_spill] sm:$0xff] %v6873_v46  ;;  %v1551_v57 = vperm.slane %v8247_v41, %v5743_v11 }
 0x2b7   :  { %v1868_v35 = vadd.f32 %v1742_v54, %v1676_v40  ;;  %v1869_v12 = vadd.f32 %v1742_v54, %v1677_v24  ;;  %v6883_v9 = vmax.f32 %v2058_v44, %v2186_v6  ;;  %v6885_v27 = vmax.f32 %v2059_v2, %v2187_v23  ;;  %v1438_v6 = vpop.permute.xlu2 %1437 }
 0x2b8   :  { %v1743_v55 = vunpack.c.l.bf16 %v1551_v57 }
 0x2b9   :  { %v676_v28 = vpop.f32.mrf.mxu0  ;;  %v1934_v31 = vpack.c.bf16 %v1869_v12, %v1868_v35  ;;  %v5154_v12 = vld [vmem:[%s8039_s3 + $0x1d0] sm:$0xf0]  ;;  %v5032_v35 = vld [vmem:[%s8039_s3 + $0xc8] sm:$0xf] }
 0x2ba   :  { %v845_v34 = vpop.f32.mrf.mxu1  ;;  %3122 = vmatmul.bf16.gmra.mxu3 %v6877_v50  ;;  %3171 = vmatmul.bf16.gmra.mxu2 %v5017_v59  ;;  %v6917_v46 = vor.u32 %v5288_v37, %v5154_v12 }
 0x2bb   :  { %v911_v62 = vpack.c.bf16 %v845_v34, %v676_v28  ;;  %3527 = vmatmul.bf16.gmra.mxu0 %v5017_v59  ;;  %v2060_v40 = vunpack.c.l.bf16 %v1934_v31  ;;  %v2061_v24 = vunpack.c.h.bf16 %v1934_v31  ;;  %v5259_v59 = vld [vmem:[%s8039_s3 + $0xd4] sm:$0xf0] }
 0x2bc   :  { %v5033_v50 = vor.u32 %v5259_v59, %v5032_v35 }
 0x2bd   :  { %v1678_v23 = vunpack.c.l.bf16 %v911_v62  ;;  %v1679_v25 = vunpack.c.h.bf16 %v911_v62  ;;  %v6894_v42 = vpop.f32.mrf.mxu2  ;;  %v6896_v44 = vpop.f32.mrf.mxu3  ;;  %v2188_v28 = vmul.f32 0.20019531, %v2060_v40  ;;  %v2189_v31 = vmul.f32 0.20019531, %v2061_v24 }
 0x2be   :  { %8248 = vst [vmem:[#allocation7_spill] sm:$0xff] %v6894_v42  ;;  %v899_v62 = vpack.c.bf16 %v6624_v15, %v6622_v14 }
 0x2bf   :  { %v1870_v2 = vadd.f32 %v1743_v55, %v1678_v23  ;;  %v1871_v54 = vadd.f32 %v1743_v55, %v1679_v25  ;;  %v2508_v42 = vmax.f32 %v2060_v40, %v2188_v28  ;;  %v2509_v56 = vmax.f32 %v2061_v24, %v2189_v31  ;;  %v1411_v12 = vpop.permute.xlu2 %1410 }
 0x2c0   :  { %v1654_v21 = vunpack.c.l.bf16 %v899_v62  ;;  %v1655_v14 = vunpack.c.h.bf16 %v899_v62  ;;  %v1416_v40 = vperm.slane %v1411_v12, %v5743_v11  ;;  %v5292_v62 = vld [vmem:[%s8039_s3 + $0x1e4] sm:$0xf]  ;;  %v2036_v12 = vunpack.c.l.bf16 %v6620_v60 }
 0x2c1   :  { %v1935_v41 = vpack.c.bf16 %v1871_v54, %v1870_v2  ;;  %v1443_v54 = vperm.slane %v1438_v6, %v5743_v11  ;;  %v1425_v6 = vperm.slane %v1420_v58, %v5743_v11 }
 0x2c2   :  { %v1728_v28 = vunpack.c.l.bf16 %v1416_v40  ;;  %v2037_v40 = vunpack.c.h.bf16 %v6620_v60 }
 0x2c3   :  { %v2062_v57 = vunpack.c.l.bf16 %v1935_v41  ;;  %v2063_v34 = vunpack.c.h.bf16 %v1935_v41  ;;  %v897_v41 = vpack.c.bf16 %v6592_v5, %v6590_v17  ;;  %v1731_v37 = vunpack.c.l.bf16 %v1443_v54 }
 0x2c5   :  { %v6912_v55 = vpop.f32.mrf.mxu2  ;;  %v6914_v23 = vpop.f32.mrf.mxu3  ;;  %v2190_v25 = vmul.f32 0.20019531, %v2062_v57  ;;  %v2191_v2 = vmul.f32 0.20019531, %v2063_v34  ;;  %v1650_v24 = vunpack.c.l.bf16 %v897_v41  ;;  %v1651_v35 = vunpack.c.h.bf16 %v897_v41 }
 0x2c6   :  { %8249 = vst [vmem:[#allocation44_spill] sm:$0xff] %v6912_v55  ;;  %v1846_v17 = vadd.f32 %v1731_v37, %v1654_v21  ;;  %v1847_v5 = vadd.f32 %v1731_v37, %v1655_v14  ;;  %v8256_v37 = vpack.c.bf16 %v6807_v19, %v6803_v7  ;;  %v2165_v7 = vmul.f32 0.20019531, %v2037_v40 }
 0x2c7   :  { %v2510_v36 = vmax.f32 %v2062_v57, %v2190_v25  ;;  %v2511_v29 = vmax.f32 %v2063_v34, %v2191_v2  ;;  %v8251_v57 = vpack.c.bf16 %v6883_v9, %v6879_v47  ;;  %v8253_v2 = vpack.c.bf16 %v6842_v45, %v6840_v20  ;;  %v5048_v47 = vld [vmem:[%s8039_s3 + $0xe8] sm:$0xf] }
 0x2c8   :  { %v1923_v31 = vpack.c.bf16 %v1847_v5, %v1846_v17  ;;  %v8254_v9 = vpack.c.bf16 %v6846_v53, %v6844_v16 }
 0x2c9   :  { %v2574_v15 = vpack.c.bf16 %v2510_v36, %v2508_v42  ;;  %v2575_v55 = vpack.c.bf16 %v2511_v29, %v2509_v56  ;;  %v1729_v56 = vunpack.c.l.bf16 %v1425_v6  ;;  %v8250_v36 = vld [vmem:[#allocation76_spill] sm:$0xff]  ;;  %v8255_v6 = vpack.c.bf16 %v6805_v39, %v6801_v8 }
 0x2ca   :  { %3127 = vmatmul.bf16.gmra.mxu3 %v6917_v46  ;;  %3176 = vmatmul.bf16.gmra.mxu2 %v5033_v50  ;;  %v1648_v42 = vunpack.c.l.bf16 %v8250_v36  ;;  %v1649_v58 = vunpack.c.h.bf16 %v8250_v36  ;;  %v2038_v45 = vunpack.c.l.bf16 %v1923_v31  ;;  %v2039_v41 = vunpack.c.h.bf16 %v1923_v31 }
 0x2cb   :  { %3227 = vmatpush.bf16.msrb.mxu3 %v2574_v15  ;;  %3583 = vmatpush.bf16.msrb.mxu1 %v2575_v55  ;;  %v1842_v21 = vadd.f32 %v1729_v56, %v1650_v24  ;;  %v1843_v34 = vadd.f32 %v1729_v56, %v1651_v35  ;;  %v8257_v56 = vpack.c.bf16 %v6766_v30, %v6762_v1  ;;  %v2164_v8 = vmul.f32 0.20019531, %v2036_v12 }
 0x2cc   :  { %3532 = vmatmul.bf16.gmra.mxu0 %v5033_v50  ;;  %v8252_v50 = vpack.c.bf16 %v6885_v27, %v6881_v33  ;;  %v1840_v55 = vadd.f32 %v1728_v28, %v1648_v42  ;;  %v1841_v25 = vadd.f32 %v1728_v28, %v1649_v58  ;;  %v5170_v33 = vld [vmem:[%s8039_s3 + $0x1f0] sm:$0xf0]  ;;  %v5263_v27 = vld [vmem:[%s8039_s3 + $0xf4] sm:$0xf0]  ;;  %v2166_v24 = vmul.f32 0.20019531, %v2038_v45 }
 0x2cd   :  { %v6924_v59 = vpop.f32.mrf.mxu2  ;;  %v6926_v29 = vpop.f32.mrf.mxu3  ;;  %v1921_v16 = vpack.c.bf16 %v1843_v34, %v1842_v21  ;;  %v6958_v53 = vor.u32 %v5292_v62, %v5170_v33  ;;  %v5049_v14 = vor.u32 %v5263_v27, %v5048_v47  ;;  %v2167_v35 = vmul.f32 0.20019531, %v2039_v41 }
 0x2ce   :  { %v1920_v15 = vpack.c.bf16 %v1841_v25, %v1840_v55  ;;  %v8258_v39 = vpack.c.bf16 %v6768_v51, %v6764_v49  ;;  %v2486_v58 = vmax.f32 %v2038_v45, %v2166_v24  ;;  %v8259_v1 = vpack.c.bf16 %v6715_v38, %v6711_v48  ;;  %v8266_v24 = vld [vmem:[#allocation46_spill] sm:$0xff] }
 0x2cf   :  { %3228 = vmatpush.bf16.msrb.mxu3 %v8251_v57  ;;  %3584 = vmatpush.bf16.msrb.mxu1 %v8252_v50  ;;  %v2034_v17 = vunpack.c.l.bf16 %v1921_v16  ;;  %v2035_v5 = vunpack.c.h.bf16 %v1921_v16  ;;  %v2487_v57 = vmax.f32 %v2039_v41, %v2167_v35  ;;  %v8260_v49 = vpack.c.bf16 %v6717_v61, %v6713_v52  ;;  %v5267_v52 = vld [vmem:[%s8039_s3 + $0x114] sm:$0xf0]  ;;  %v5233_v61 = vld [vmem:[%s8039_s3 + $0xc] sm:$0xf] }
 0x2d0   :  { %v2032_v19 = vunpack.c.l.bf16 %v1920_v15  ;;  %v2033_v36 = vunpack.c.h.bf16 %v1920_v15  ;;  %v2484_v30 = vmax.f32 %v2036_v12, %v2164_v8  ;;  %v2485_v51 = vmax.f32 %v2037_v40, %v2165_v7  ;;  %v8262_v15 = vld [vmem:[#allocation50_spill] sm:$0xff]  ;;  %v8265_v40 = vld [vmem:[#allocation47_spill] sm:$0xff] }
 0x2d1   :  { %v2162_v50 = vmul.f32 0.20019531, %v2034_v17  ;;  %v2163_v28 = vmul.f32 0.20019531, %v2035_v5  ;;  %v8267_v35 = vpack.c.bf16 %v8265_v40, %v8266_v24  ;;  %v8269_v8 = vld [vmem:[#allocation42_spill] sm:$0xff]  ;;  %v8286_v40 = vld [vmem:[#allocation19_spill] sm:$0xff]  ;;  %v8287_v24 = vld [vmem:[#allocation20_spill] sm:$0xff] }
 0x2d2   :  { %v2160_v21 = vmul.f32 0.20019531, %v2032_v19  ;;  %v2161_v34 = vmul.f32 0.20019531, %v2033_v36  ;;  %v2562_v31 = vpack.c.bf16 %v2486_v58, %v2484_v30  ;;  %v2563_v62 = vpack.c.bf16 %v2487_v57, %v2485_v51  ;;  %v4954_v58 = vld [vmem:[%s8039_s3 + $0x38] sm:$0xf0]  ;;  %v8271_v57 = vld [vmem:[#allocation56_spill] sm:$0xff] }
 0x2d3   :  { %3229 = vmatpush.bf16.msrb.mxu3 %v8253_v2  ;;  %3585 = vmatpush.bf16.msrb.mxu1 %v8254_v9  ;;  %v2482_v55 = vmax.f32 %v2034_v17, %v2162_v50  ;;  %v2483_v25 = vmax.f32 %v2035_v5, %v2163_v28  ;;  %v5064_v2 = vld [vmem:[%s8039_s3 + $0x108] sm:$0xf]  ;;  %v4938_v9 = vld [vmem:[%s8039_s3 + $0x18] sm:$0xf0]  ;;  %v3061_v50 = vadd.f32 %v6707_v43, %v8271_v57 }
 0x2d4   :  { %v2480_v48 = vmax.f32 %v2032_v19, %v2160_v21  ;;  %v2481_v38 = vmax.f32 %v2033_v36, %v2161_v34  ;;  %v5065_v41 = vor.u32 %v5267_v52, %v5064_v2  ;;  %v4941_v16 = vor.u32 %v5233_v61, %v4938_v9  ;;  %v5080_v19 = vld [vmem:[%s8039_s3 + $0x128] sm:$0xf]  ;;  %v5237_v36 = vld [vmem:[%s8039_s3 + $0x2c] sm:$0xf] }
 0x2d5   :  { %v6954_v54 = vpop.f32.mrf.mxu2  ;;  %v6956_v20 = vpop.f32.mrf.mxu3  ;;  %v8272_v28 = vld [vmem:[#allocation39_spill] sm:$0xff] }
 0x2d6   :  { %v2560_v27 = vpack.c.bf16 %v2482_v55, %v2480_v48  ;;  %v2561_v45 = vpack.c.bf16 %v2483_v25, %v2481_v38  ;;  %v8276_v55 = vld [vmem:[#allocation31_spill] sm:$0xff]  ;;  %v8280_v38 = vld [vmem:[#allocation26_spill] sm:$0xff] }
 0x2d7   :  { %3230 = vmatpush.bf16.msrb.mxu3 %v8255_v6  ;;  %3586 = vmatpush.bf16.msrb.mxu1 %v8256_v37  ;;  %v8264_v37 = vld [vmem:[#allocation55_spill] sm:$0xff] }
 0x2d8   :  { %v3059_v12 = vadd.f32 %v6683_v0, %v8264_v37  ;;  %v5271_v0 = vld [vmem:[%s8039_s3 + $0x134] sm:$0xf0]  ;;  %v8278_v2 = vld [vmem:[#allocation59_spill] sm:$0xff] }
 0x2d9   :  { %v5081_v34 = vor.u32 %v5271_v0, %v5080_v19  ;;  %v3064_v43 = vadd.f32 %v6734_v10, %v8278_v2  ;;  %v8279_v48 = vld [vmem:[#allocation27_spill] sm:$0xff]  ;;  %v5275_v10 = vld [vmem:[%s8039_s3 + $0x154] sm:$0xf0] }
 0x2da   :  { %3132 = vmatmul.bf16.gmra.mxu3 %v6958_v53  ;;  %3181 = vmatmul.bf16.gmra.mxu2 %v5049_v14  ;;  %v8281_v52 = vpack.c.bf16 %v8279_v48, %v8280_v38  ;;  %v8285_v37 = vld [vmem:[#allocation60_spill] sm:$0xff]  ;;  %v8289_v0 = vld [vmem:[#allocation63_spill] sm:$0xff] }
 0x2db   :  { %3231 = vmatpush.bf16.msrb.mxu3 %v8257_v56  ;;  %3587 = vmatpush.bf16.msrb.mxu1 %v8258_v39  ;;  %v8268_v39 = vld [vmem:[#allocation43_spill] sm:$0xff] }
 0x2dc   :  { %3537 = vmatmul.bf16.gmra.mxu0 %v5049_v14  ;;  %v8261_v14 = vld [vmem:[#allocation51_spill] sm:$0xff]  ;;  %v8270_v7 = vpack.c.bf16 %v8268_v39, %v8269_v8 }
 0x2dd   :  { %v6975_v60 = vpop.f32.mrf.mxu2  ;;  %v6977_v42 = vpop.f32.mrf.mxu3  ;;  %v8263_v6 = vpack.c.bf16 %v8261_v14, %v8262_v15  ;;  %v5096_v14 = vld [vmem:[%s8039_s3 + $0x148] sm:$0xf]  ;;  %v5241_v15 = vld [vmem:[%s8039_s3 + $0x4c] sm:$0xf] }
 0x2de   :  { %v8291_v2 = vld [vmem:[#allocation67_spill] sm:$0xff] }
 0x2df   :  { %3232 = vmatpush.bf16.msrb.mxu3 %v8259_v1  ;;  %3588 = vmatpush.bf16.msrb.mxu1 %v8260_v49  ;;  %v8273_v1 = vld [vmem:[#allocation38_spill] sm:$0xff] }
 0x2e0   :  { %v8274_v49 = vpack.c.bf16 %v8272_v28, %v8273_v1  ;;  %v5279_v28 = vld [vmem:[%s8039_s3 + $0x174] sm:$0xf0]  ;;  %v5245_v1 = vld [vmem:[%s8039_s3 + $0x6c] sm:$0xf] }
 0x2e3   :  { %3233 = vmatpush.bf16.msrb.mxu3 %v2562_v31  ;;  %3589 = vmatpush.bf16.msrb.mxu1 %v2563_v62  ;;  %v4957_v31 = vor.u32 %v5237_v36, %v4954_v58  ;;  %v8275_v62 = vld [vmem:[#allocation32_spill] sm:$0xff]  ;;  %v3069_v36 = vadd.f32 %v6779_v63, %v8289_v0  ;;  %v4986_v63 = vld [vmem:[%s8039_s3 + $0x78] sm:$0xf0] }
 0x2e4   :  { %v8277_v25 = vpack.c.bf16 %v8275_v62, %v8276_v55  ;;  %v8294_v0 = vld [vmem:[#allocation72_spill] sm:$0xff] }
 0x2e5   :  { %v6997_v33 = vpop.f32.mrf.mxu2  ;;  %v6999_v47 = vpop.f32.mrf.mxu3 }
 0x2e7   :  { %3234 = vmatpush.bf16.msrb.mxu3 %v2560_v27  ;;  %3590 = vmatpush.bf16.msrb.mxu1 %v2561_v45  ;;  %v8282_v45 = vld [vmem:[#allocation22_spill] sm:$0xff] }
 0x2ea   :  { %3186 = vmatmul.bf16.gmra.mxu2 %v5065_v41  ;;  %3235 = vmatmul.bf16.vlgmr.msrb.gmra.mxu3 %v4941_v16 }
 0x2eb   :  { %3405 = vmatpush.bf16.msra.mxu3 %v8263_v6  ;;  %3591 = vmatmul.bf16.vlgmr.msrb.gmra.mxu1 %v4941_v16  ;;  %v4970_v6 = vld [vmem:[%s8039_s3 + $0x58] sm:$0xf0] }
 0x2ec   :  { %3542 = vmatmul.bf16.gmra.mxu0 %v5065_v41  ;;  %v8283_v41 = vld [vmem:[#allocation23_spill] sm:$0xff]  ;;  %v4973_v19 = vor.u32 %v5241_v15, %v4970_v6 }
 0x2ed   :  { %v7009_v17 = vpop.f32.mrf.mxu3  ;;  %v3147_v5 = vpop.f32.mrf.mxu2  ;;  %v8284_v16 = vpack.c.bf16 %v8282_v45, %v8283_v41  ;;  %v5249_v45 = vld [vmem:[%s8039_s3 + $0x8c] sm:$0xf]  ;;  %v8292_v41 = vld [vmem:[#allocation68_spill] sm:$0xff] }
 0x2ee   :  { %v7011_v56 = vadd.f32 %v3147_v5, %v3059_v12  ;;  %v3066_v12 = vadd.f32 %v6758_v32, %v8285_v37 }
 0x2ef   :  { %3406 = vmatpush.bf16.msra.mxu3 %v8267_v35  ;;  %v8288_v35 = vpack.c.bf16 %v8286_v40, %v8287_v24 }
 0x2f3   :  { %3407 = vmatpush.bf16.msra.mxu3 %v8270_v7  ;;  %v5097_v7 = vor.u32 %v5275_v10, %v5096_v14 }
 0x2f5   :  { %v7033_v30 = vpop.f32.mrf.mxu3  ;;  %v3149_v51 = vpop.f32.mrf.mxu2 }
 0x2f6   :  { %v7035_v21 = vadd.f32 %v3149_v51, %v3061_v50  ;;  %v5112_v50 = vld [vmem:[%s8039_s3 + $0x168] sm:$0xf] }
 0x2f7   :  { %3408 = vmatpush.bf16.msra.mxu3 %v8274_v49  ;;  %v8290_v49 = vld [vmem:[#allocation64_spill] sm:$0xff]  ;;  %v5113_v55 = vor.u32 %v5279_v28, %v5112_v50 }
 0x2f8   :  { %v3071_v51 = vadd.f32 %v6797_v13, %v8290_v49  ;;  %v5128_v13 = vld [vmem:[%s8039_s3 + $0x188] sm:$0xf] }
 0x2f9   :  { %v8295_v49 = vld [vmem:[#allocation75_spill] sm:$0xff] }
 0x2fa   :  { %3191 = vmatmul.bf16.gmra.mxu2 %v5081_v34  ;;  %3240 = vmatmul.bf16.gmra.mxu3 %v4957_v31 }
 0x2fb   :  { %3409 = vmatpush.bf16.msra.mxu3 %v8277_v25  ;;  %3596 = vmatmul.bf16.gmra.mxu1 %v4957_v31  ;;  %v4989_v25 = vor.u32 %v5245_v1, %v4986_v63 }
 0x2fc   :  { %3547 = vmatmul.bf16.gmra.mxu0 %v5081_v34 }
 0x2fd   :  { %v7045_v61 = vpop.f32.mrf.mxu3  ;;  %v3152_v9 = vpop.f32.mrf.mxu2 }
 0x2fe   :  { %v7047_v27 = vadd.f32 %v3152_v9, %v3064_v43  ;;  %v3074_v43 = vadd.f32 %v6818_v3, %v8291_v2  ;;  %v5283_v9 = vld [vmem:[%s8039_s3 + $0x194] sm:$0xf0]  ;;  %v5002_v3 = vld [vmem:[%s8039_s3 + $0x98] sm:$0xf0] }
 0x2ff   :  { %3410 = vmatpush.bf16.msra.mxu3 %v8281_v52  ;;  %v7121_v6 = vor.u32 %v5283_v9, %v5128_v13  ;;  %v5005_v37 = vor.u32 %v5249_v45, %v5002_v3  ;;  %v5291_v2 = vld [vmem:[%s8039_s3 + $0x1d4] sm:$0xf0] }
 0x303   :  { %3411 = vmatpush.bf16.msra.mxu3 %v8284_v16  ;;  %v3076_v16 = vadd.f32 %v6836_v26, %v8292_v41  ;;  %v5144_v26 = vld [vmem:[%s8039_s3 + $0x1a8] sm:$0xf] }
 0x305   :  { %v7069_v5 = vpop.f32.mrf.mxu3  ;;  %v3154_v39 = vpop.f32.mrf.mxu2 }
 0x306   :  { %v7071_v8 = vadd.f32 %v3154_v39, %v3066_v12  ;;  %v8293_v12 = vld [vmem:[#allocation71_spill] sm:$0xff] }
 0x307   :  { %3412 = vmatpush.bf16.msra.mxu3 %v8288_v35  ;;  %v3079_v40 = vadd.f32 %v6857_v18, %v8293_v12  ;;  %v5018_v18 = vld [vmem:[%s8039_s3 + $0xb8] sm:$0xf0] }
 0x30a   :  { %3196 = vmatmul.bf16.gmra.mxu2 %v5097_v7  ;;  %3245 = vmatmul.bf16.gmra.mxu3 %v4973_v19 }
 0x30b   :  { %3601 = vmatmul.bf16.gmra.mxu1 %v4973_v19  ;;  %v5253_v19 = vld [vmem:[%s8039_s3 + $0xac] sm:$0xf] }
 0x30c   :  { %3552 = vmatmul.bf16.gmra.mxu0 %v5097_v7  ;;  %v5287_v7 = vld [vmem:[%s8039_s3 + $0x1b4] sm:$0xf0]  ;;  %v5021_v63 = vor.u32 %v5253_v19, %v5018_v18 }
 0x30d   :  { %v7075_v58 = vpop.f32.mrf.mxu3  ;;  %v3157_v32 = vpop.f32.mrf.mxu2  ;;  %v7148_v1 = vor.u32 %v5287_v7, %v5144_v26  ;;  %v5261_v26 = vld [vmem:[%s8039_s3 + $0xec] sm:$0xf] }
 0x30e   :  { %v7077_v57 = vadd.f32 %v3157_v32, %v3069_v36  ;;  %v3081_v36 = vadd.f32 %v6875_v4, %v8294_v0  ;;  %v5160_v4 = vld [vmem:[%s8039_s3 + $0x1c8] sm:$0xf] }
 0x30f   :  { %v7175_v41 = vor.u32 %v5291_v2, %v5160_v4  ;;  %v5066_v2 = vld [vmem:[%s8039_s3 + $0x118] sm:$0xf0] }
 0x315   :  { %v7093_v34 = vpop.f32.mrf.mxu3  ;;  %v3159_v31 = vpop.f32.mrf.mxu2 }
 0x316   :  { %v7095_v62 = vadd.f32 %v3159_v31, %v3071_v51  ;;  %v3084_v51 = vadd.f32 %v6896_v44, %v8295_v49  ;;  %v5034_v44 = vld [vmem:[%s8039_s3 + $0xd8] sm:$0xf0] }
 0x31a   :  { %3201 = vmatmul.bf16.gmra.mxu2 %v5113_v55  ;;  %3250 = vmatmul.bf16.gmra.mxu3 %v4989_v25 }
 0x31b   :  { %3606 = vmatmul.bf16.gmra.mxu1 %v4989_v25 }
 0x31c   :  { %3557 = vmatmul.bf16.gmra.mxu0 %v5113_v55 }
 0x31d   :  { %v7099_v48 = vpop.f32.mrf.mxu3  ;;  %v3162_v38 = vpop.f32.mrf.mxu2 }
 0x31e   :  { %v7101_v52 = vadd.f32 %v3162_v38, %v3074_v43  ;;  %v5257_v43 = vld [vmem:[%s8039_s3 + $0xcc] sm:$0xf]  ;;  %v8296_v38 = vld [vmem:[#allocation77_spill] sm:$0xff] }
 0x31f   :  { %v3086_v13 = vadd.f32 %v6914_v23, %v8296_v38  ;;  %v5176_v23 = vld [vmem:[%s8039_s3 + $0x1e8] sm:$0xf] }
 0x325   :  { %v7117_v14 = vpop.f32.mrf.mxu3  ;;  %v3164_v10 = vpop.f32.mrf.mxu2 }
 0x326   :  { %v7119_v15 = vadd.f32 %v3164_v10, %v3076_v16  ;;  %v5037_v16 = vor.u32 %v5257_v43, %v5034_v44  ;;  %v3089_v10 = vadd.f32 %v6926_v29, %v6598_v22  ;;  %v5050_v22 = vld [vmem:[%s8039_s3 + $0xf8] sm:$0xf0]  ;;  %v8297_v29 = vld [vmem:[#allocation80_spill] sm:$0xff] }
 0x327   :  { %v3091_v7 = vadd.f32 %v6956_v20, %v8297_v29  ;;  %v5265_v20 = vld [vmem:[%s8039_s3 + $0x10c] sm:$0xf]  ;;  %v8299_v43 = vld [vmem:[#allocation84_spill] sm:$0xff]  ;;  %v5082_v29 = vld [vmem:[%s8039_s3 + $0x138] sm:$0xf0] }
 0x328   :  { %v3096_v44 = vadd.f32 %v6999_v47, %v8299_v43  ;;  %v5269_v47 = vld [vmem:[%s8039_s3 + $0x12c] sm:$0xf] }
 0x32a   :  { %3206 = vmatmul.bf16.gmra.mxu2 %v7121_v6  ;;  %3255 = vmatmul.bf16.gmra.mxu3 %v5005_v37 }
 0x32b   :  { %3611 = vmatmul.bf16.gmra.mxu1 %v5005_v37 }
 0x32d   :  { %v7126_v24 = vpop.f32.mrf.mxu3  ;;  %v3167_v35 = vpop.f32.mrf.mxu2 }
 0x32e   :  { %v7128_v39 = vadd.f32 %v3167_v35, %v3079_v40  ;;  %v5295_v35 = vld [vmem:[%s8039_s3 + $0x1f4] sm:$0xf0] }
 0x335   :  { %v7144_v32 = vpop.f32.mrf.mxu3  ;;  %v3169_v50 = vpop.f32.mrf.mxu2 }
 0x336   :  { %v7146_v28 = vadd.f32 %v3169_v50, %v3081_v36  ;;  %v7202_v36 = vor.u32 %v5295_v35, %v5176_v23  ;;  %v5053_v50 = vor.u32 %v5261_v26, %v5050_v22 }
 0x33a   :  { %3211 = vmatmul.bf16.gmra.mxu2 %v7148_v1  ;;  %3260 = vmatmul.bf16.gmra.mxu3 %v5021_v63 }
 0x33b   :  { %3616 = vmatmul.bf16.gmra.mxu1 %v5021_v63  ;;  %v8298_v63 = vld [vmem:[#allocation83_spill] sm:$0xff] }
 0x33c   :  { %v3094_v49 = vadd.f32 %v6977_v42, %v8298_v63 }
 0x33d   :  { %v7153_v31 = vpop.f32.mrf.mxu3  ;;  %v3172_v55 = vpop.f32.mrf.mxu2 }
 0x33e   :  { %v7155_v25 = vadd.f32 %v3172_v55, %v3084_v51 }
 0x345   :  { %v7171_v9 = vpop.f32.mrf.mxu3  ;;  %v3174_v45 = vpop.f32.mrf.mxu2 }
 0x346   :  { %v7173_v3 = vadd.f32 %v3174_v45, %v3086_v13  ;;  %v5069_v45 = vor.u32 %v5265_v20, %v5066_v2  ;;  %v8304_v20 = vld [vmem:[#allocation17_spill] sm:$0xff] }
 0x347   :  { %v3104_v2 = vadd.f32 %v7045_v61, %v8304_v20 }
 0x34a   :  { %3216 = vmatmul.bf16.gmra.mxu2 %v7175_v41  ;;  %3265 = vmatmul.bf16.gmra.mxu3 %v5037_v16 }
 0x34b   :  { %3621 = vmatmul.bf16.gmra.mxu1 %v5037_v16  ;;  %v8300_v16 = vld [vmem:[#allocation21_spill] sm:$0xff] }
 0x34d   :  { %v7180_v37 = vpop.f32.mrf.mxu3  ;;  %v3177_v12 = vpop.f32.mrf.mxu2 }
 0x34e   :  { %v7182_v40 = vadd.f32 %v3177_v12, %v3089_v10  ;;  %v8301_v10 = vld [vmem:[#allocation18_spill] sm:$0xff] }
 0x34f   :  { %v3099_v12 = vadd.f32 %v7009_v17, %v8301_v10 }
 0x355   :  { %v7198_v19 = vpop.f32.mrf.mxu3  ;;  %v3179_v18 = vpop.f32.mrf.mxu2 }
 0x356   :  { %v7200_v0 = vadd.f32 %v3179_v18, %v3091_v7  ;;  %v8302_v7 = vld [vmem:[#allocation48_spill] sm:$0xff] }
 0x357   :  { %v3101_v18 = vadd.f32 %v7033_v30, %v8302_v7 }
 0x35a   :  { %3221 = vmatmul.bf16.gmra.mxu2 %v7202_v36  ;;  %3270 = vmatmul.bf16.gmra.mxu3 %v5053_v50 }
 0x35b   :  { %3626 = vmatmul.bf16.gmra.mxu1 %v5053_v50 }
 0x35d   :  { %v7207_v51 = vpop.f32.mrf.mxu3  ;;  %v3182_v55 = vpop.f32.mrf.mxu2 }
 0x35e   :  { %v7209_v4 = vadd.f32 %v3182_v55, %v3094_v49  ;;  %v8303_v55 = vld [vmem:[#allocation25_spill] sm:$0xff] }
 0x365   :  { %v7219_v38 = vpop.f32.mrf.mxu3  ;;  %v3184_v13 = vpop.f32.mrf.mxu2 }
 0x366   :  { %v7221_v42 = vadd.f32 %v3184_v13, %v3096_v44 }
 0x36a   :  { %3275 = vmatmul.bf16.gmra.mxu3 %v5069_v45  ;;  %3324 = vmatmul.bf16.vlgmr.msra.gmra.mxu2 %v8300_v16  ;;  %v8305_v16 = vld [vmem:[#allocation15_spill] sm:$0xff] }
 0x36b   :  { %3631 = vmatmul.bf16.gmra.mxu1 %v5069_v45  ;;  %v5098_v45 = vld [vmem:[%s8039_s3 + $0x158] sm:$0xf0]  ;;  %v3106_v10 = vadd.f32 %v7069_v5, %v8305_v16 }
 0x36d   :  { %v3187_v23 = vpop.f32.mrf.mxu2  ;;  %v3236_v35 = vpop.f32.mrf.mxu3 }
 0x36e   :  { %v7226_v26 = vadd.f32 %v3187_v23, %v3099_v12  ;;  %v7229_v22 = vadd.f32 %v3236_v35, %v7011_v56  ;;  %v5085_v56 = vor.u32 %v5269_v47, %v5082_v29  ;;  %v8306_v47 = vld [vmem:[#allocation30_spill] sm:$0xff]  ;;  %v8307_v29 = vld [vmem:[#allocation12_spill] sm:$0xff] }
 0x36f   :  { %v3109_v7 = vadd.f32 %v7075_v58, %v8307_v29 }
 0x375   :  { %v3189_v50 = vpop.f32.mrf.mxu2  ;;  %v3238_v17 = vpop.f32.mrf.mxu3 }
 0x376   :  { %v7239_v63 = vadd.f32 %v3189_v50, %v3101_v18  ;;  %v7242_v49 = vadd.f32 %v3238_v17, %v7035_v21  ;;  %v5273_v21 = vld [vmem:[%s8039_s3 + $0x14c] sm:$0xf] }
 0x37a   :  { %3280 = vmatmul.bf16.gmra.mxu3 %v5085_v56  ;;  %3329 = vmatmul.bf16.gmra.mxu2 %v8303_v55  ;;  %v8308_v55 = vld [vmem:[#allocation13_spill] sm:$0xff] }
 0x37b   :  { %3636 = vmatmul.bf16.gmra.mxu1 %v5085_v56  ;;  %v5114_v56 = vld [vmem:[%s8039_s3 + $0x178] sm:$0xf0]  ;;  %v3111_v20 = vadd.f32 %v7093_v34, %v8308_v55 }
 0x37d   :  { %v3192_v43 = vpop.f32.mrf.mxu2  ;;  %v3241_v44 = vpop.f32.mrf.mxu3 }
 0x37e   :  { %v7247_v13 = vadd.f32 %v3192_v43, %v3104_v2  ;;  %v7250_v30 = vadd.f32 %v3241_v44, %v7047_v27  ;;  %v5101_v27 = vor.u32 %v5273_v21, %v5098_v45  ;;  %v8309_v21 = vld [vmem:[#allocation37_spill] sm:$0xff]  ;;  %v8310_v45 = vld [vmem:[#allocation10_spill] sm:$0xff] }
 0x37f   :  { %v3114_v16 = vadd.f32 %v7099_v48, %v8310_v45 }
 0x385   :  { %v3194_v12 = vpop.f32.mrf.mxu2  ;;  %v3243_v61 = vpop.f32.mrf.mxu3 }
 0x386   :  { %v7260_v23 = vadd.f32 %v3194_v12, %v3106_v10  ;;  %v7263_v35 = vadd.f32 %v3243_v61, %v7071_v8  ;;  %v5277_v8 = vld [vmem:[%s8039_s3 + $0x16c] sm:$0xf] }
 0x38a   :  { %3285 = vmatmul.bf16.gmra.mxu3 %v5101_v27  ;;  %3334 = vmatmul.bf16.gmra.mxu2 %v8306_v47  ;;  %v8311_v47 = vld [vmem:[#allocation11_spill] sm:$0xff] }
 0x38b   :  { %3641 = vmatmul.bf16.gmra.mxu1 %v5101_v27  ;;  %v5130_v27 = vld [vmem:[%s8039_s3 + $0x198] sm:$0xf0]  ;;  %v3116_v29 = vadd.f32 %v7117_v14, %v8311_v47 }
 0x38d   :  { %v3197_v18 = vpop.f32.mrf.mxu2  ;;  %v3246_v50 = vpop.f32.mrf.mxu3 }
 0x38e   :  { %v7268_v17 = vadd.f32 %v3197_v18, %v3109_v7  ;;  %v7271_v5 = vadd.f32 %v3246_v50, %v7077_v57  ;;  %v5117_v57 = vor.u32 %v5277_v8, %v5114_v56  ;;  %v8312_v8 = vld [vmem:[#allocation41_spill] sm:$0xff]  ;;  %v8313_v56 = vld [vmem:[#allocation8_spill] sm:$0xff] }
 0x38f   :  { %v3119_v55 = vadd.f32 %v7126_v24, %v8313_v56  ;;  %v8317_v56 = vld [vmem:[#allocation44_spill] sm:$0xff] }
 0x395   :  { %v3199_v2 = vpop.f32.mrf.mxu2  ;;  %v3248_v58 = vpop.f32.mrf.mxu3 }
 0x396   :  { %v7281_v43 = vadd.f32 %v3199_v2, %v3111_v20  ;;  %v7284_v44 = vadd.f32 %v3248_v58, %v7095_v62  ;;  %v5281_v62 = vld [vmem:[%s8039_s3 + $0x18c] sm:$0xf] }
 0x39a   :  { %3290 = vmatmul.bf16.gmra.mxu3 %v5117_v57  ;;  %3339 = vmatmul.bf16.gmra.mxu2 %v8309_v21  ;;  %v8314_v21 = vld [vmem:[#allocation9_spill] sm:$0xff] }
 0x39b   :  { %3646 = vmatmul.bf16.gmra.mxu1 %v5117_v57  ;;  %v5146_v57 = vld [vmem:[%s8039_s3 + $0x1b8] sm:$0xf0]  ;;  %v3121_v45 = vadd.f32 %v7144_v32, %v8314_v21  ;;  %v3129_v21 = vadd.f32 %v7180_v37, %v6924_v59 }
 0x39d   :  { %v3202_v10 = vpop.f32.mrf.mxu2  ;;  %v3251_v12 = vpop.f32.mrf.mxu3 }
 0x39e   :  { %v7289_v61 = vadd.f32 %v3202_v10, %v3114_v16  ;;  %v7292_v34 = vadd.f32 %v3251_v12, %v7101_v52  ;;  %v7307_v52 = vor.u32 %v5281_v62, %v5130_v27  ;;  %v8315_v62 = vld [vmem:[#allocation45_spill] sm:$0xff]  ;;  %v8316_v27 = vld [vmem:[#allocation7_spill] sm:$0xff] }
 0x39f   :  { %v3124_v47 = vadd.f32 %v7153_v31, %v8316_v27  ;;  %v3131_v27 = vadd.f32 %v7198_v19, %v6954_v54 }
 0x3a5   :  { %v3204_v7 = vpop.f32.mrf.mxu2  ;;  %v3253_v48 = vpop.f32.mrf.mxu3 }
 0x3a6   :  { %v7302_v18 = vadd.f32 %v3204_v7, %v3116_v29  ;;  %v7305_v50 = vadd.f32 %v3253_v48, %v7119_v15  ;;  %v5285_v15 = vld [vmem:[%s8039_s3 + $0x1ac] sm:$0xf] }
 0x3aa   :  { %3295 = vmatmul.bf16.gmra.mxu3 %v7307_v52  ;;  %3344 = vmatmul.bf16.gmra.mxu2 %v8312_v8  ;;  %v5162_v8 = vld [vmem:[%s8039_s3 + $0x1d8] sm:$0xf0] }
 0x3ad   :  { %v3207_v20 = vpop.f32.mrf.mxu2  ;;  %v3256_v2 = vpop.f32.mrf.mxu3 }
 0x3ae   :  { %v7313_v58 = vadd.f32 %v3207_v20, %v3119_v55  ;;  %v7316_v14 = vadd.f32 %v3256_v2, %v7128_v39  ;;  %v7331_v39 = vor.u32 %v5285_v15, %v5146_v57  ;;  %v3126_v55 = vadd.f32 %v7171_v9, %v8317_v56  ;;  %v8318_v57 = vld [vmem:[#allocation49_spill] sm:$0xff] }
 0x3b5   :  { %v3209_v16 = vpop.f32.mrf.mxu2  ;;  %v3258_v24 = vpop.f32.mrf.mxu3 }
 0x3b6   :  { %v7326_v10 = vadd.f32 %v3209_v16, %v3121_v45  ;;  %v7329_v12 = vadd.f32 %v3258_v24, %v7146_v28  ;;  %v5289_v28 = vld [vmem:[%s8039_s3 + $0x1cc] sm:$0xf] }
 0x3ba   :  { %3300 = vmatmul.bf16.gmra.mxu3 %v7331_v39  ;;  %3349 = vmatmul.bf16.gmra.mxu2 %v8315_v62  ;;  %v5178_v62 = vld [vmem:[%s8039_s3 + $0x1f8] sm:$0xf0] }
 0x3bd   :  { %v3212_v29 = vpop.f32.mrf.mxu2  ;;  %v3261_v7 = vpop.f32.mrf.mxu3 }
 0x3be   :  { %v7337_v48 = vadd.f32 %v3212_v29, %v3124_v47  ;;  %v7340_v32 = vadd.f32 %v3261_v7, %v7155_v25  ;;  %v7355_v25 = vor.u32 %v5289_v28, %v5162_v8  ;;  %v8319_v7 = vld [vmem:[#allocation52_spill] sm:$0xff]  ;;  %v3134_v28 = vadd.f32 %v7207_v51, %v6975_v60 }
 0x3c5   :  { %v3214_v20 = vpop.f32.mrf.mxu2  ;;  %v3263_v31 = vpop.f32.mrf.mxu3 }
 0x3c6   :  { %v7350_v2 = vadd.f32 %v3214_v20, %v3126_v55  ;;  %v7353_v15 = vadd.f32 %v3263_v31, %v7173_v3  ;;  %v5293_v3 = vld [vmem:[%s8039_s3 + $0x1ec] sm:$0xf]  ;;  %v8322_v20 = vld [vmem:[#allocation54_spill] sm:$0xff]  ;;  %v8323_v31 = vld [vmem:[#allocation53_spill] sm:$0xff] }
 0x3ca   :  { %3305 = vmatmul.bf16.gmra.mxu3 %v7355_v25  ;;  %3354 = vmatmul.bf16.gmra.mxu2 %v8318_v57 }
 0x3cd   :  { %v3217_v45 = vpop.f32.mrf.mxu2  ;;  %v3266_v16 = vpop.f32.mrf.mxu3 }
 0x3ce   :  { %v7361_v24 = vadd.f32 %v3217_v45, %v3129_v21  ;;  %v7364_v9 = vadd.f32 %v3266_v16, %v7182_v40  ;;  %v7379_v40 = vor.u32 %v5293_v3, %v5178_v62  ;;  %v8326_v45 = vld [vmem:[#allocation58_spill] sm:$0xff] }
 0x3d5   :  { %v3219_v47 = vpop.f32.mrf.mxu2  ;;  %v3268_v59 = vpop.f32.mrf.mxu3 }
 0x3d6   :  { %v7374_v37 = vadd.f32 %v3219_v47, %v3131_v27  ;;  %v7377_v29 = vadd.f32 %v3268_v59, %v7200_v0  ;;  %v8330_v27 = vld [vmem:[#allocation62_spill] sm:$0xff] }
 0x3da   :  { %3310 = vmatmul.bf16.gmra.mxu3 %v7379_v40  ;;  %3359 = vmatmul.bf16.gmra.mxu2 %v8319_v7 }
 0x3dd   :  { %v3222_v8 = vpop.f32.mrf.mxu2  ;;  %v3271_v56 = vpop.f32.mrf.mxu3 }
 0x3de   :  { %v7385_v55 = vadd.f32 %v3222_v8, %v3134_v28  ;;  %v7388_v54 = vadd.f32 %v3271_v56, %v7209_v4  ;;  %v8327_v4 = vld [vmem:[#allocation57_spill] sm:$0xff]  ;;  %v7417_v28 = vpop.permute.xlu2 %3873  ;;  %v8335_v8 = vld [vmem:[#allocation66_spill] sm:$0xff] }
 0x3df   :  { %8334 = vst [vmem:[#allocation50_spill] sm:$0xff] %v7417_v28  ;;  %v8368_v28 = vld [vmem:[#allocation16_spill] sm:$0xff] }
 0x3e0   :  { %8320 = vst [vmem:[#allocation29_spill] sm:$0xff] %v7388_v54 }
 0x3e5   :  { %v3273_v19 = vpop.f32.mrf.mxu3 }
 0x3e6   :  { %v7391_v0 = vadd.f32 %v3273_v19, %v7221_v42 }
 0x3e8   :  { %8321 = vst [vmem:[#allocation34_spill] sm:$0xff] %v7391_v0 }
 0x3ea   :  { %3413 = vmatmul.bf16.vlgmr.msra.gmra.mxu3 %v8322_v20  ;;  %3364 = vmatmul.bf16.gmra.mxu2 %v8323_v31  ;;  %v7426_v20 = vpop.permute.xlu0 %4008 }
 0x3eb   :  { %8338 = vst [vmem:[#allocation47_spill] sm:$0xff] %v7426_v20 }
 0x3ed   :  { %v3276_v57 = vpop.f32.mrf.mxu3 }
 0x3ee   :  { %v7396_v21 = vadd.f32 %v3276_v57, %v7226_v26  ;;  %v8331_v26 = vld [vmem:[#allocation61_spill] sm:$0xff] }
 0x3f0   :  { %8324 = vst [vmem:[#allocation35_spill] sm:$0xff] %v7396_v21 }
 0x3f2   :  { %v7433_v57 = vpop.permute.xlu0 %3855 }
 0x3f5   :  { %v3278_v60 = vpop.f32.mrf.mxu3 }
 0x3f6   :  { %v7399_v51 = vadd.f32 %v3278_v60, %v7239_v63  ;;  %v8340_v60 = vld [vmem:[#allocation70_spill] sm:$0xff] }
 0x3f8   :  { %8325 = vst [vmem:[#allocation28_spill] sm:$0xff] %v7399_v51 }
 0x3fa   :  { %3418 = vmatmul.bf16.gmra.mxu3 %v8326_v45  ;;  %3369 = vmatmul.bf16.gmra.mxu2 %v8327_v4 }
 0x3fd   :  { %v3281_v16 = vpop.f32.mrf.mxu3 }
 0x3fe   :  { %v7404_v42 = vadd.f32 %v3281_v16, %v7247_v13  ;;  %v7419_v13 = vpop.f32.mrf.mxu2 }
 0x400   :  { %8328 = vst [vmem:[#allocation24_spill] sm:$0xff] %v7404_v42 }
 0x405   :  { %v3283_v3 = vpop.f32.mrf.mxu3 }
 0x406   :  { %v7407_v62 = vadd.f32 %v3283_v3, %v7260_v23  ;;  %v8336_v23 = vld [vmem:[#allocation65_spill] sm:$0xff]  ;;  %v7443_v3 = vpop.permute.xlu0 %3828 }
 0x408   :  { %8329 = vst [vmem:[#allocation33_spill] sm:$0xff] %v7407_v62 }
 0x40a   :  { %3423 = vmatmul.bf16.gmra.mxu3 %v8330_v27  ;;  %3374 = vmatmul.bf16.gmra.mxu2 %v8331_v26 }
 0x40d   :  { %v3286_v47 = vpop.f32.mrf.mxu3 }
 0x40e   :  { %v7412_v63 = vadd.f32 %v3286_v47, %v7268_v17  ;;  %v7428_v17 = vpop.permute.xlu2 %3846 }
 0x410   :  { %8332 = vst [vmem:[#allocation76_spill] sm:$0xff] %v7412_v63 }
 0x415   :  { %v3288_v59 = vpop.f32.mrf.mxu3 }
 0x416   :  { %v7415_v7 = vadd.f32 %v3288_v59, %v7281_v43  ;;  %v7436_v45 = vpop.permute.xlu2 %3999  ;;  %v8346_v59 = vld [vmem:[#allocation74_spill] sm:$0xff] }
 0x417   :  { %8341 = vst [vmem:[#allocation43_spill] sm:$0xff] %v7436_v45  ;;  %v8352_v45 = vld [vmem:[#allocation79_spill] sm:$0xff] }
 0x418   :  { %8333 = vst [vmem:[#allocation51_spill] sm:$0xff] %v7415_v7 }
 0x41a   :  { %3428 = vmatmul.bf16.gmra.mxu3 %v8335_v8  ;;  %3379 = vmatmul.bf16.gmra.mxu2 %v8336_v23  ;;  %v7453_v8 = vpop.permute.xlu0 %3981 }
 0x41b   :  { %8347 = vst [vmem:[#allocation32_spill] sm:$0xff] %v7453_v8 }
 0x41d   :  { %v3291_v56 = vpop.f32.mrf.mxu3 }
 0x41e   :  { %v7424_v19 = vadd.f32 %v3291_v56, %v7289_v61  ;;  %v7441_v61 = vpop.permute.xlu1 %3864  ;;  %v7445_v27 = vpop.permute.xlu2 %3972 }
 0x41f   :  { %8343 = vst [vmem:[#allocation56_spill] sm:$0xff] %v7445_v27 }
 0x420   :  { %8337 = vst [vmem:[#allocation55_spill] sm:$0xff] %v7424_v19 }
 0x422   :  { %v7465_v20 = vpop.permute.xlu0 %3954 }
 0x423   :  { %8351 = vst [vmem:[#allocation26_spill] sm:$0xff] %v7465_v20 }
 0x425   :  { %v3293_v31 = vpop.f32.mrf.mxu3 }
 0x426   :  { %v7431_v43 = vadd.f32 %v3293_v31, %v7302_v18  ;;  %v7450_v47 = vpop.permute.xlu1 %4017  ;;  %v7458_v56 = vpop.permute.xlu2 %3819 }
 0x427   :  { %8345 = vst [vmem:[#allocation38_spill] sm:$0xff] %v7450_v47  ;;  %v3592_v47 = vpop.f32.mrf.mxu1 }
 0x428   :  { %8339 = vst [vmem:[#allocation46_spill] sm:$0xff] %v7431_v43 }
 0x42a   :  { %3433 = vmatmul.bf16.gmra.mxu3 %v8340_v60 }
 0x42d   :  { %v3296_v4 = vpop.f32.mrf.mxu3 }
 0x42e   :  { %v7439_v16 = vadd.f32 %v3296_v4, %v7313_v58  ;;  %v7460_v31 = vpop.permute.xlu1 %3990 }
 0x42f   :  { %8349 = vst [vmem:[#allocation59_spill] sm:$0xff] %v7460_v31 }
 0x430   :  { %8342 = vst [vmem:[#allocation42_spill] sm:$0xff] %v7439_v16 }
 0x435   :  { %v3298_v26 = vpop.f32.mrf.mxu3 }
 0x436   :  { %v7448_v18 = vadd.f32 %v3298_v26, %v7326_v10  ;;  %v3325_v10 = vpop.f32.mrf.mxu2  ;;  %v3503_v26 = vpop.f32.mrf.mxu0 }
 0x438   :  { %8344 = vst [vmem:[#allocation39_spill] sm:$0xff] %v7448_v18 }
 0x43a   :  { %3438 = vmatmul.bf16.gmra.mxu3 %v8346_v59  ;;  %v7467_v59 = vpop.permute.xlu2 %3792 }
 0x43d   :  { %v3301_v23 = vpop.f32.mrf.mxu3 }
 0x43e   :  { %v7456_v58 = vadd.f32 %v3301_v23, %v7337_v48  ;;  %v7470_v48 = vpop.permute.xlu1 %3837  ;;  %v3327_v31 = vpop.f32.mrf.mxu2 }
 0x440   :  { %8348 = vst [vmem:[#allocation31_spill] sm:$0xff] %v7456_v58  ;;  %v8354_v58 = vld [vmem:[#allocation69_spill] sm:$0xff] }
 0x441   :  { %3384 = vmatmul.bf16.gmra.mxu2 %v8354_v58  ;;  %v8357_v58 = vld [vmem:[#allocation82_spill] sm:$0xff] }
 0x442   :  { %v7480_v27 = vpop.permute.xlu2 %3945 }
 0x443   :  { %8355 = vst [vmem:[#allocation23_spill] sm:$0xff] %v7480_v27 }
 0x445   :  { %v3303_v60 = vpop.f32.mrf.mxu3 }
 0x446   :  { %v7463_v4 = vadd.f32 %v3303_v60, %v7350_v2  ;;  %v3505_v2 = vpop.f32.mrf.mxu0  ;;  %3562 = vmatmul.bf16.gmra.mxu0 %v7121_v6  ;;  %v7477_v60 = vpop.permute.xlu0 %3801 }
 0x447   :  { %v7485_v16 = vpop.f32.mrf.mxu2 }
 0x448   :  { %8350 = vst [vmem:[#allocation27_spill] sm:$0xff] %v7463_v4  ;;  %v3594_v4 = vpop.f32.mrf.mxu1  ;;  %3651 = vmatmul.bf16.gmra.mxu1 %v7307_v52 }
 0x44a   :  { %3443 = vmatmul.bf16.gmra.mxu3 %v8352_v45  ;;  %v7496_v20 = vpop.permute.xlu2 %3918 }
 0x44b   :  { %8358 = vst [vmem:[#allocation19_spill] sm:$0xff] %v7496_v20 }
 0x44d   :  { %v3306_v8 = vpop.f32.mrf.mxu3 }
 0x44e   :  { %v7473_v23 = vadd.f32 %v3306_v8, %v7361_v24  ;;  %v7487_v24 = vpop.permute.xlu1 %3810  ;;  %v7489_v8 = vpop.f32.mrf.mxu0 }
 0x450   :  { %8353 = vst [vmem:[#allocation22_spill] sm:$0xff] %v7473_v23  ;;  %v7492_v6 = vpop.f32.mrf.mxu1  ;;  %v7494_v23 = vpop.permute.xlu0 %3774 }
 0x452   :  { %v7521_v63 = vpop.permute.xlu2 %3765 }
 0x455   :  { %v3308_v45 = vpop.f32.mrf.mxu3 }
 0x456   :  { %v7483_v18 = vadd.f32 %v3308_v45, %v7374_v37  ;;  %v7501_v37 = vpop.f32.mrf.mxu2  ;;  %v8360_v45 = vld [vmem:[#allocation73_spill] sm:$0xff]  ;;  %v7507_v27 = vpop.permute.xlu1 %3963 }
 0x457   :  { %3389 = vmatmul.bf16.gmra.mxu2 %v8360_v45  ;;  %8361 = vst [vmem:[#allocation63_spill] sm:$0xff] %v7507_v27  ;;  %v8364_v27 = vld [vmem:[#allocation85_spill] sm:$0xff] }
 0x458   :  { %8356 = vst [vmem:[#allocation60_spill] sm:$0xff] %v7483_v18  ;;  %v7504_v18 = vpop.f32.mrf.mxu0  ;;  %3567 = vmatmul.bf16.gmra.mxu0 %v7148_v1  ;;  %v7511_v19 = vpop.f32.mrf.mxu1  ;;  %3656 = vmatmul.bf16.gmra.mxu1 %v7331_v39 }
 0x45a   :  { %3448 = vmatmul.bf16.gmra.mxu3 %v8357_v58  ;;  %v3136_v58 = vadd.f32 %v7219_v38, %v6997_v33 }
 0x45d   :  { %v3311_v52 = vpop.f32.mrf.mxu3 }
 0x45e   :  { %v7499_v43 = vadd.f32 %v3311_v52, %v7385_v55  ;;  %v3225_v55 = vadd.f32 %v7419_v13, %v3136_v58  ;;  %v7515_v52 = vpop.permute.xlu0 %3927  ;;  %v7519_v45 = vpop.f32.mrf.mxu2  ;;  %v8366_v58 = vld [vmem:[#allocation78_spill] sm:$0xff] }
 0x45f   :  { %8362 = vst [vmem:[#allocation64_spill] sm:$0xff] %v7515_v52  ;;  %v7528_v38 = vpop.permute.xlu1 %3936  ;;  %v3739_v52 = vpop.permute.xlu2 %3738 }
 0x460   :  { %8359 = vst [vmem:[#allocation20_spill] sm:$0xff] %v7499_v43  ;;  %v7523_v1 = vpop.f32.mrf.mxu0  ;;  %v7526_v33 = vpop.f32.mrf.mxu1 }
 0x461   :  { %8365 = vst [vmem:[#allocation68_spill] sm:$0xff] %v7528_v38 }
 0x465   :  { %v3313_v43 = vpop.f32.mrf.mxu3 }
 0x466   :  { %v7517_v7 = vadd.f32 %v3313_v43, %v3225_v55  ;;  %v7530_v13 = vpop.f32.mrf.mxu2  ;;  %v7533_v43 = vpop.permute.xlu0 %3900 }
 0x467   :  { %3394 = vmatmul.bf16.gmra.mxu2 %v8366_v58  ;;  %8367 = vst [vmem:[#allocation71_spill] sm:$0xff] %v7533_v43  ;;  %v7543_v38 = vpop.permute.xlu1 %3783 }
 0x468   :  { %8363 = vst [vmem:[#allocation67_spill] sm:$0xff] %v7517_v7  ;;  %v7535_v7 = vpop.f32.mrf.mxu0  ;;  %3572 = vmatmul.bf16.gmra.mxu0 %v7175_v41  ;;  %v7539_v42 = vpop.f32.mrf.mxu1  ;;  %3661 = vmatmul.bf16.gmra.mxu1 %v7355_v25 }
 0x46a   :  { %3453 = vmatmul.bf16.gmra.mxu3 %v8364_v27  ;;  %v3744_v27 = vperm.slane %v3739_v52, %v5743_v11 }
 0x46c   :  { %v4088_v58 = vunpack.c.l.bf16 %v3744_v27 }
 0x46d   :  { %v3414_v39 = vpop.f32.mrf.mxu3 }
 0x46e   :  { %v3415_v20 = vadd.f32 %v3414_v39, %v3325_v10  ;;  %v7545_v51 = vpop.f32.mrf.mxu2 }
 0x470   :  { %v3504_v55 = vadd.f32 %v3503_v26, %v3415_v20  ;;  %v7547_v52 = vpop.f32.mrf.mxu0 }
 0x472   :  { %v3593_v62 = vadd.f32 %v3592_v47, %v3504_v55  ;;  %v3748_v47 = vpop.permute.xlu0 %3747 }
 0x473   :  { %v3753_v55 = vperm.slane %v3748_v47, %v5743_v11 }
 0x474   :  { %v3672_v10 = vpack.c.bf16 %v3593_v62, %v7229_v22  ;;  %v7551_v22 = vpop.f32.mrf.mxu1 }
 0x475   :  { %v3416_v39 = vpop.f32.mrf.mxu3 }
 0x476   :  { %v4024_v43 = vunpack.c.l.bf16 %v3672_v10  ;;  %v4025_v20 = vunpack.c.h.bf16 %v3672_v10  ;;  %v3417_v26 = vadd.f32 %v3416_v39, %v3327_v31  ;;  %v4089_v31 = vunpack.c.l.bf16 %v3753_v55 }
 0x478   :  { %v4120_v41 = vadd.f32 %v4088_v58, %v4024_v43  ;;  %v4121_v21 = vadd.f32 %v4088_v58, %v4025_v20  ;;  %v3506_v0 = vadd.f32 %v3505_v2, %v3417_v26  ;;  %v7555_v2 = vpop.f32.mrf.mxu2  ;;  %v8369_v58 = vld [vmem:[#allocation81_spill] sm:$0xff]  ;;  %v3757_v26 = vpop.permute.xlu1 %3756 }
 0x479   :  { %3399 = vmatmul.bf16.gmra.mxu2 %v8369_v58  ;;  %v7559_v47 = vpop.f32.mrf.mxu0  ;;  %3577 = vmatmul.bf16.gmra.mxu0 %v7202_v36 }
 0x47a   :  { %v3595_v25 = vadd.f32 %v3594_v4, %v3506_v0  ;;  %3458 = vmatmul.bf16.gmra.mxu3 %v8368_v28  ;;  %v4184_v62 = vpack.c.bf16 %v4121_v21, %v4120_v41 }
 0x47c   :  { %v3673_v27 = vpack.c.bf16 %v3595_v25, %v7242_v49  ;;  %v4216_v20 = vunpack.c.l.bf16 %v4184_v62  ;;  %v3762_v49 = vperm.slane %v3757_v26, %v5743_v11  ;;  %v4217_v21 = vunpack.c.h.bf16 %v4184_v62 }
 0x47d   :  { %v3419_v10 = vpop.f32.mrf.mxu3 }
 0x47e   :  { %v4026_v39 = vunpack.c.l.bf16 %v3673_v27  ;;  %v4027_v54 = vunpack.c.h.bf16 %v3673_v27  ;;  %v3420_v43 = vadd.f32 %v3419_v10, %v7485_v16  ;;  %v7564_v16 = vpop.f32.mrf.mxu1  ;;  %3666 = vmatmul.bf16.gmra.mxu1 %v7379_v40  ;;  %v4280_v25 = vmul.f32 0.20019531, %v4216_v20 }
 0x480   :  { %v4122_v0 = vadd.f32 %v4089_v31, %v4026_v39  ;;  %v4123_v4 = vadd.f32 %v4089_v31, %v4027_v54  ;;  %v3509_v28 = vadd.f32 %v7489_v8, %v3420_v43  ;;  %v4090_v8 = vunpack.c.l.bf16 %v3762_v49  ;;  %v7569_v62 = vpop.f32.mrf.mxu2 }
 0x481   :  { %v4281_v39 = vmul.f32 0.20019531, %v4217_v21  ;;  %v7571_v26 = vmax.f32 %v4216_v20, %v4280_v25  ;;  %v8370_v20 = vld [vmem:[#allocation14_spill] sm:$0xff] }
 0x482   :  { %v3598_v41 = vadd.f32 %v7492_v6, %v3509_v28  ;;  %v4185_v55 = vpack.c.bf16 %v4123_v4, %v4122_v0 }
 0x483   :  { %v7578_v49 = vmax.f32 %v4217_v21, %v4281_v39 }
 0x484   :  { %v3674_v27 = vpack.c.bf16 %v3598_v41, %v7250_v30  ;;  %v4218_v54 = vunpack.c.l.bf16 %v4185_v55  ;;  %v4219_v10 = vunpack.c.h.bf16 %v4185_v55  ;;  %v7574_v30 = vpop.f32.mrf.mxu0 }
 0x485   :  { %v3421_v31 = vpop.f32.mrf.mxu3 }
 0x486   :  { %v4028_v43 = vunpack.c.l.bf16 %v3674_v27  ;;  %v4029_v36 = vunpack.c.h.bf16 %v3674_v27  ;;  %v3422_v58 = vadd.f32 %v3421_v31, %v7501_v37  ;;  %v4282_v6 = vmul.f32 0.20019531, %v4218_v54  ;;  %v7586_v25 = vpop.f32.mrf.mxu1 }
 0x487   :  { %v4283_v28 = vmul.f32 0.20019531, %v4219_v10  ;;  %v3771_v37 = vperm.slane %v7521_v63, %v5743_v11 }
 0x488   :  { %v4124_v40 = vadd.f32 %v4090_v8, %v4028_v43  ;;  %v4125_v0 = vadd.f32 %v4090_v8, %v4029_v36  ;;  %v3511_v4 = vadd.f32 %v7504_v18, %v3422_v58  ;;  %v7576_v41 = vmax.f32 %v4218_v54, %v4282_v6 }
 0x489   :  { %v7580_v55 = vmax.f32 %v4219_v10, %v4283_v28  ;;  %v4091_v31 = vunpack.c.l.bf16 %v3771_v37 }
 0x48a   :  { %v3600_v27 = vadd.f32 %v7511_v19, %v3511_v4  ;;  %3463 = vmatmul.bf16.gmra.mxu3 %v8370_v20  ;;  %v4186_v8 = vpack.c.bf16 %v4125_v0, %v4124_v40  ;;  %v7594_v19 = vpop.f32.mrf.mxu2  ;;  %v3780_v40 = vperm.slane %v7494_v23, %v5743_v11 }
 0x48c   :  { %v3675_v21 = vpack.c.bf16 %v3600_v27, %v7263_v35  ;;  %v4220_v36 = vunpack.c.l.bf16 %v4186_v8  ;;  %v7597_v4 = vpop.f32.mrf.mxu0  ;;  %v4221_v0 = vunpack.c.h.bf16 %v4186_v8 }
 0x48d   :  { %v3424_v10 = vpop.f32.mrf.mxu3 }
 0x48e   :  { %v4030_v39 = vunpack.c.l.bf16 %v3675_v21  ;;  %v4031_v43 = vunpack.c.h.bf16 %v3675_v21  ;;  %v3425_v63 = vadd.f32 %v3424_v10, %v7519_v45  ;;  %v7602_v37 = vpop.f32.mrf.mxu1  ;;  %v4284_v20 = vmul.f32 0.20019531, %v4220_v36 }
 0x490   :  { %v4126_v58 = vadd.f32 %v4091_v31, %v4030_v39  ;;  %v4127_v6 = vadd.f32 %v4091_v31, %v4031_v43  ;;  %v3514_v28 = vadd.f32 %v7523_v1, %v3425_v63  ;;  %v4092_v39 = vunpack.c.l.bf16 %v3780_v40 }
 0x491   :  { %v4285_v43 = vmul.f32 0.20019531, %v4221_v0  ;;  %v7608_v8 = vmax.f32 %v4220_v36, %v4284_v20  ;;  %v8371_v36 = vld [vmem:[#allocation40_spill] sm:$0xff] }
 0x492   :  { %v3603_v35 = vadd.f32 %v7526_v33, %v3514_v28  ;;  %v4187_v27 = vpack.c.bf16 %v4127_v6, %v4126_v58  ;;  %v7606_v18 = vpop.f32.mrf.mxu2 }
 0x493   :  { %v7615_v40 = vmax.f32 %v4221_v0, %v4285_v43 }
 0x494   :  { %v3676_v45 = vpack.c.bf16 %v3603_v35, %v7271_v5  ;;  %v4222_v21 = vunpack.c.l.bf16 %v4187_v27  ;;  %v4223_v10 = vunpack.c.h.bf16 %v4187_v27  ;;  %v7611_v5 = vpop.f32.mrf.mxu0 }
 0x495   :  { %v3426_v31 = vpop.f32.mrf.mxu3 }
 0x496   :  { %v4032_v1 = vunpack.c.l.bf16 %v3676_v45  ;;  %v4033_v63 = vunpack.c.h.bf16 %v3676_v45  ;;  %v3427_v54 = vadd.f32 %v3426_v31, %v7530_v13  ;;  %v4286_v23 = vmul.f32 0.20019531, %v4222_v21  ;;  %v7623_v20 = vpop.f32.mrf.mxu1 }
 0x497   :  { %v4287_v33 = vmul.f32 0.20019531, %v4223_v10  ;;  %v3789_v13 = vperm.slane %v7543_v38, %v5743_v11 }
 0x498   :  { %v4128_v28 = vadd.f32 %v4092_v39, %v4032_v1  ;;  %v4129_v58 = vadd.f32 %v4092_v39, %v4033_v63  ;;  %v3516_v6 = vadd.f32 %v7535_v7, %v3427_v54  ;;  %v7613_v35 = vmax.f32 %v4222_v21, %v4286_v23 }
 0x499   :  { %v7617_v27 = vmax.f32 %v4223_v10, %v4287_v33  ;;  %v4093_v39 = vunpack.c.l.bf16 %v3789_v13 }
 0x49a   :  { %v3605_v45 = vadd.f32 %v7539_v42, %v3516_v6  ;;  %3468 = vmatmul.bf16.gmra.mxu3 %v8371_v36  ;;  %v4188_v54 = vpack.c.bf16 %v4129_v58, %v4128_v28  ;;  %v7631_v42 = vpop.f32.mrf.mxu2  ;;  %v3798_v28 = vperm.slane %v7467_v59, %v5743_v11 }
 0x49c   :  { %v3677_v0 = vpack.c.bf16 %v3605_v45, %v7284_v44  ;;  %v4224_v1 = vunpack.c.l.bf16 %v4188_v54  ;;  %v7634_v6 = vpop.f32.mrf.mxu0  ;;  %v4225_v58 = vunpack.c.h.bf16 %v4188_v54 }
 0x49d   :  { %v3429_v10 = vpop.f32.mrf.mxu3 }
 0x49e   :  { %v4034_v31 = vunpack.c.l.bf16 %v3677_v0  ;;  %v4035_v43 = vunpack.c.h.bf16 %v3677_v0  ;;  %v3430_v38 = vadd.f32 %v3429_v10, %v7545_v51  ;;  %v7639_v13 = vpop.f32.mrf.mxu1  ;;  %v4288_v36 = vmul.f32 0.20019531, %v4224_v1 }
 0x4a0   :  { %v4130_v63 = vadd.f32 %v4093_v39, %v4034_v31  ;;  %v4131_v23 = vadd.f32 %v4093_v39, %v4035_v43  ;;  %v3519_v33 = vadd.f32 %v7547_v52, %v3430_v38  ;;  %v4094_v31 = vunpack.c.l.bf16 %v3798_v28 }
 0x4a1   :  { %v4289_v43 = vmul.f32 0.20019531, %v4225_v58  ;;  %v7645_v54 = vmax.f32 %v4224_v1, %v4288_v36  ;;  %v8372_v1 = vld [vmem:[#allocation36_spill] sm:$0xff] }
 0x4a2   :  { %v3608_v44 = vadd.f32 %v7551_v22, %v3519_v33  ;;  %v4189_v45 = vpack.c.bf16 %v4131_v23, %v4130_v63  ;;  %v7643_v59 = vpop.f32.mrf.mxu2 }
 0x4a3   :  { %v7652_v28 = vmax.f32 %v4225_v58, %v4289_v43 }
 0x4a4   :  { %v3678_v51 = vpack.c.bf16 %v3608_v44, %v7292_v34  ;;  %v4226_v0 = vunpack.c.l.bf16 %v4189_v45  ;;  %v4227_v10 = vunpack.c.h.bf16 %v4189_v45  ;;  %v7650_v44 = vpop.f32.mrf.mxu0 }
 0x4a5   :  { %v3431_v39 = vpop.f32.mrf.mxu3 }
 0x4a6   :  { %v4036_v52 = vunpack.c.l.bf16 %v3678_v51  ;;  %v4037_v38 = vunpack.c.h.bf16 %v3678_v51  ;;  %v3432_v21 = vadd.f32 %v3431_v39, %v7555_v2  ;;  %v4290_v7 = vmul.f32 0.20019531, %v4226_v0 }
 0x4a7   :  { %v4291_v22 = vmul.f32 0.20019531, %v4227_v10  ;;  %v3807_v2 = vperm.slane %v7477_v60, %v5743_v11 }
 0x4a8   :  { %v4132_v33 = vadd.f32 %v4094_v31, %v4036_v52  ;;  %v4133_v63 = vadd.f32 %v4094_v31, %v4037_v38  ;;  %v3521_v23 = vadd.f32 %v7559_v47, %v3432_v21  ;;  %v7648_v34 = vmax.f32 %v4226_v0, %v4290_v7  ;;  %v7662_v31 = vpop.f32.mrf.mxu1 }
 0x4a9   :  { %v7654_v45 = vmax.f32 %v4227_v10, %v4291_v22  ;;  %v4095_v0 = vunpack.c.l.bf16 %v3807_v2  ;;  %v3816_v22 = vperm.slane %v7487_v24, %v5743_v11 }
 0x4aa   :  { %v3610_v51 = vadd.f32 %v7564_v16, %v3521_v23  ;;  %3473 = vmatmul.bf16.gmra.mxu3 %v8372_v1  ;;  %v4190_v47 = vpack.c.bf16 %v4133_v63, %v4132_v33  ;;  %v7671_v33 = vpop.f32.mrf.mxu2 }
 0x4ac   :  { %v3679_v21 = vpack.c.bf16 %v3610_v51, %v7305_v50  ;;  %v4228_v16 = vunpack.c.l.bf16 %v4190_v47  ;;  %v4229_v63 = vunpack.c.h.bf16 %v4190_v47  ;;  %v7674_v51 = vpop.f32.mrf.mxu0 }
 0x4ad   :  { %v3434_v58 = vpop.f32.mrf.mxu3 }
 0x4ae   :  { %v4038_v10 = vunpack.c.l.bf16 %v3679_v21  ;;  %v4039_v39 = vunpack.c.h.bf16 %v3679_v21  ;;  %v3435_v60 = vadd.f32 %v3434_v58, %v7569_v62  ;;  %v4292_v2 = vmul.f32 0.20019531, %v4228_v16 }
 0x4af   :  { %v4096_v58 = vunpack.c.l.bf16 %v3816_v22 }
 0x4b0   :  { %v4134_v43 = vadd.f32 %v4095_v0, %v4038_v10  ;;  %v4135_v52 = vadd.f32 %v4095_v0, %v4039_v39  ;;  %v3524_v38 = vadd.f32 %v7574_v30, %v3435_v60  ;;  %v7677_v10 = vpop.f32.mrf.mxu1  ;;  %v4293_v30 = vmul.f32 0.20019531, %v4229_v63 }
 0x4b1   :  { %v7680_v7 = vmax.f32 %v4228_v16, %v4292_v2 }
 0x4b2   :  { %v3613_v23 = vadd.f32 %v7586_v25, %v3524_v38  ;;  %v4191_v50 = vpack.c.bf16 %v4135_v52, %v4134_v43  ;;  %v7695_v2 = vpop.f32.mrf.mxu2 }
 0x4b4   :  { %v3680_v1 = vpack.c.bf16 %v3613_v23, %v7316_v14  ;;  %v4230_v62 = vunpack.c.l.bf16 %v4191_v50  ;;  %v4231_v21 = vunpack.c.h.bf16 %v4191_v50  ;;  %v7685_v23 = vmax.f32 %v4229_v63, %v4293_v30 }
 0x4b5   :  { %v3436_v0 = vpop.f32.mrf.mxu3  ;;  %v3825_v50 = vperm.slane %v7458_v56, %v5743_v11 }
 0x4b6   :  { %v4040_v39 = vunpack.c.l.bf16 %v3680_v1  ;;  %v4041_v24 = vunpack.c.h.bf16 %v3680_v1  ;;  %v3437_v60 = vadd.f32 %v3436_v0, %v7594_v19  ;;  %v4294_v47 = vmul.f32 0.20019531, %v4230_v62  ;;  %v8373_v19 = vld [vmem:[#allocation6_spill] sm:$0xff] }
 0x4b7   :  { %v4295_v25 = vmul.f32 0.20019531, %v4231_v21  ;;  %v4097_v0 = vunpack.c.l.bf16 %v3825_v50 }
 0x4b8   :  { %v4136_v43 = vadd.f32 %v4096_v58, %v4040_v39  ;;  %v4137_v52 = vadd.f32 %v4096_v58, %v4041_v24  ;;  %v3526_v38 = vadd.f32 %v7597_v4, %v3437_v60  ;;  %v7683_v14 = vmax.f32 %v4230_v62, %v4294_v47  ;;  %v7703_v39 = vpop.f32.mrf.mxu1 }
 0x4b9   :  { %v7687_v22 = vmax.f32 %v4231_v21, %v4295_v25  ;;  %v7700_v21 = vpop.f32.mrf.mxu0 }
 0x4ba   :  { %v3615_v1 = vadd.f32 %v7602_v37, %v3526_v38  ;;  %3478 = vmatmul.bf16.gmra.mxu3 %v8373_v19  ;;  %v4192_v58 = vpack.c.bf16 %v4137_v52, %v4136_v43  ;;  %v3834_v43 = vperm.slane %v7443_v3, %v5743_v11  ;;  %v7710_v36 = vpop.f32.mrf.mxu2 }
 0x4bc   :  { %v3681_v63 = vpack.c.bf16 %v3615_v1, %v7329_v12  ;;  %v4232_v24 = vunpack.c.l.bf16 %v4192_v58  ;;  %v4233_v52 = vunpack.c.h.bf16 %v4192_v58 }
 0x4bd   :  { %v3439_v62 = vpop.f32.mrf.mxu3 }
 0x4be   :  { %v4042_v56 = vunpack.c.l.bf16 %v3681_v63  ;;  %v4043_v30 = vunpack.c.h.bf16 %v3681_v63  ;;  %v3440_v37 = vadd.f32 %v3439_v62, %v7606_v18  ;;  %v4296_v1 = vmul.f32 0.20019531, %v4232_v24 }
 0x4bf   :  { %v4098_v18 = vunpack.c.l.bf16 %v3834_v43 }
 0x4c0   :  { %v4138_v60 = vadd.f32 %v4097_v0, %v4042_v56  ;;  %v4139_v47 = vadd.f32 %v4097_v0, %v4043_v30  ;;  %v3529_v25 = vadd.f32 %v7611_v5, %v3440_v37  ;;  %v4297_v56 = vmul.f32 0.20019531, %v4233_v52  ;;  %v7720_v43 = vpop.f32.mrf.mxu1 }
 0x4c1   :  { %v7713_v3 = vpop.f32.mrf.mxu0  ;;  %v7715_v58 = vmax.f32 %v4232_v24, %v4296_v1 }
 0x4c2   :  { %v3618_v12 = vadd.f32 %v7623_v20, %v3529_v25  ;;  %v4193_v38 = vpack.c.bf16 %v4139_v47, %v4138_v60 }
 0x4c4   :  { %v3682_v50 = vpack.c.bf16 %v3618_v12, %v7340_v32  ;;  %v4234_v19 = vunpack.c.l.bf16 %v4193_v38  ;;  %v4235_v63 = vunpack.c.h.bf16 %v4193_v38  ;;  %v7722_v12 = vmax.f32 %v4233_v52, %v4297_v56 }
 0x4c5   :  { %v3441_v62 = vpop.f32.mrf.mxu3 }
 0x4c6   :  { %v4044_v0 = vunpack.c.l.bf16 %v3682_v50  ;;  %v4045_v30 = vunpack.c.h.bf16 %v3682_v50  ;;  %v3442_v5 = vadd.f32 %v3441_v62, %v7631_v42  ;;  %v4298_v37 = vmul.f32 0.20019531, %v4234_v19 }
 0x4c7   :  { %v4299_v20 = vmul.f32 0.20019531, %v4235_v63  ;;  %v3843_v42 = vperm.slane %v7470_v48, %v5743_v11  ;;  %v7736_v48 = vpop.f32.mrf.mxu2 }
 0x4c8   :  { %v4140_v60 = vadd.f32 %v4098_v18, %v4044_v0  ;;  %v4141_v47 = vadd.f32 %v4098_v18, %v4045_v30  ;;  %v3531_v32 = vadd.f32 %v7634_v6, %v3442_v5  ;;  %v7718_v25 = vmax.f32 %v4234_v19, %v4298_v37 }
 0x4c9   :  { %v7724_v38 = vmax.f32 %v4235_v63, %v4299_v20  ;;  %v4099_v18 = vunpack.c.l.bf16 %v3843_v42  ;;  %v3852_v5 = vperm.slane %v7428_v17, %v5743_v11  ;;  %v7741_v37 = vpop.f32.mrf.mxu0 }
 0x4ca   :  { %v3620_v50 = vadd.f32 %v7639_v13, %v3531_v32  ;;  %3483 = vmatmul.bf16.gmra.mxu3 %v6917_v46  ;;  %v4194_v1 = vpack.c.bf16 %v4141_v47, %v4140_v60  ;;  %v7744_v47 = vpop.f32.mrf.mxu1 }
 0x4cc   :  { %v3683_v19 = vpack.c.bf16 %v3620_v50, %v7353_v15  ;;  %v4236_v13 = vunpack.c.l.bf16 %v4194_v1  ;;  %v4237_v20 = vunpack.c.h.bf16 %v4194_v1 }
 0x4cd   :  { %v3444_v52 = vpop.f32.mrf.mxu3 }
 0x4ce   :  { %v4046_v63 = vunpack.c.l.bf16 %v3683_v19  ;;  %v4047_v62 = vunpack.c.h.bf16 %v3683_v19  ;;  %v3445_v56 = vadd.f32 %v3444_v52, %v7643_v59  ;;  %v4300_v32 = vmul.f32 0.20019531, %v4236_v13 }
 0x4cf   :  { %v4100_v19 = vunpack.c.l.bf16 %v3852_v5 }
 0x4d0   :  { %v4142_v0 = vadd.f32 %v4099_v18, %v4046_v63  ;;  %v4143_v46 = vadd.f32 %v4099_v18, %v4047_v62  ;;  %v3534_v30 = vadd.f32 %v7650_v44, %v3445_v56  ;;  %v4301_v18 = vmul.f32 0.20019531, %v4237_v20 }
 0x4d1   :  { %v7748_v56 = vmax.f32 %v4236_v13, %v4300_v32  ;;  %v7765_v32 = vpop.f32.mrf.mxu0 }
 0x4d2   :  { %v3623_v15 = vadd.f32 %v7662_v31, %v3534_v30  ;;  %v4195_v60 = vpack.c.bf16 %v4143_v46, %v4142_v0 }
 0x4d4   :  { %v3684_v59 = vpack.c.bf16 %v3623_v15, %v7364_v9  ;;  %v4238_v42 = vunpack.c.l.bf16 %v4195_v60  ;;  %v4239_v50 = vunpack.c.h.bf16 %v4195_v60  ;;  %v7753_v9 = vpop.f32.mrf.mxu2  ;;  %v7755_v15 = vmax.f32 %v4237_v20, %v4301_v18 }
 0x4d5   :  { %v3446_v52 = vpop.f32.mrf.mxu3  ;;  %v3861_v60 = vperm.slane %v7433_v57, %v5743_v11 }
 0x4d6   :  { %v4048_v44 = vunpack.c.l.bf16 %v3684_v59  ;;  %v4049_v63 = vunpack.c.h.bf16 %v3684_v59  ;;  %v3447_v17 = vadd.f32 %v3446_v52, %v7671_v33  ;;  %v4302_v62 = vmul.f32 0.20019531, %v4238_v42 }
 0x4d7   :  { %v4303_v1 = vmul.f32 0.20019531, %v4239_v50 }
 0x4d8   :  { %v4144_v31 = vadd.f32 %v4100_v19, %v4048_v44  ;;  %v4145_v0 = vadd.f32 %v4100_v19, %v4049_v63  ;;  %v3536_v46 = vadd.f32 %v7674_v51, %v3447_v17  ;;  %v7751_v30 = vmax.f32 %v4238_v42, %v4302_v62 }
 0x4d9   :  { %v7757_v5 = vmax.f32 %v4239_v50, %v4303_v1  ;;  %v7770_v50 = vpop.f32.mrf.mxu1  ;;  %v4101_v19 = vunpack.c.l.bf16 %v3861_v60  ;;  %v3870_v17 = vperm.slane %v7441_v61, %v5743_v11  ;;  %v8374_v60 = vld [vmem:[#allocation29_spill] sm:$0xff] }
 0x4da   :  { %v3625_v33 = vadd.f32 %v7677_v10, %v3536_v46  ;;  %3488 = vmatmul.bf16.gmra.mxu3 %v6958_v53  ;;  %v4196_v51 = vpack.c.bf16 %v4145_v0, %v4144_v31  ;;  %v7779_v46 = vpop.permute.xlu1 %3909 }
 0x4dc   :  { %v3685_v20 = vpack.c.bf16 %v3625_v33, %v7377_v29  ;;  %v4240_v53 = vunpack.c.l.bf16 %v4196_v51  ;;  %v4241_v62 = vunpack.c.h.bf16 %v4196_v51  ;;  %v7777_v31 = vpop.f32.mrf.mxu2 }
 0x4dd   :  { %v3449_v42 = vpop.f32.mrf.mxu3 }
 0x4de   :  { %v4050_v57 = vunpack.c.l.bf16 %v3685_v20  ;;  %v4051_v52 = vunpack.c.h.bf16 %v3685_v20  ;;  %v3450_v10 = vadd.f32 %v3449_v42, %v7695_v2  ;;  %v4304_v0 = vmul.f32 0.20019531, %v4240_v53 }
 0x4df   :  { %v4102_v42 = vunpack.c.l.bf16 %v3870_v17 }
 0x4e0   :  { %v4146_v18 = vadd.f32 %v4101_v19, %v4050_v57  ;;  %v4147_v44 = vadd.f32 %v4101_v19, %v4051_v52  ;;  %v3539_v63 = vadd.f32 %v7700_v21, %v3450_v10  ;;  %v7782_v57 = vpop.f32.mrf.mxu0  ;;  %v4305_v21 = vmul.f32 0.20019531, %v4241_v62 }
 0x4e1   :  { %v7785_v10 = vpop.f32.mrf.mxu1 }
 0x4e2   :  { %v3628_v1 = vadd.f32 %v7703_v39, %v3539_v63  ;;  %v4197_v29 = vpack.c.bf16 %v4147_v44, %v4146_v18  ;;  %v7787_v18 = vmax.f32 %v4240_v53, %v4304_v0  ;;  %v7792_v17 = vmax.f32 %v4241_v62, %v4305_v21 }
 0x4e4   :  { %v3686_v33 = vpack.c.bf16 %v3628_v1, %v8374_v60  ;;  %v4242_v2 = vunpack.c.l.bf16 %v4197_v29  ;;  %v4243_v20 = vunpack.c.h.bf16 %v4197_v29 }
 0x4e5   :  { %v3451_v19 = vpop.f32.mrf.mxu3 }
 0x4e6   :  { %v4052_v52 = vunpack.c.l.bf16 %v3686_v33  ;;  %v4053_v61 = vunpack.c.h.bf16 %v3686_v33  ;;  %v3452_v51 = vadd.f32 %v3451_v19, %v7710_v36  ;;  %v4306_v39 = vmul.f32 0.20019531, %v4242_v2  ;;  %v8375_v33 = vld [vmem:[#allocation50_spill] sm:$0xff] }
 0x4e7   :  { %v4307_v44 = vmul.f32 0.20019531, %v4243_v20  ;;  %v3879_v16 = vperm.slane %v8375_v33, %v5743_v11  ;;  %v8376_v19 = vld [vmem:[#allocation34_spill] sm:$0xff]  ;;  %v8377_v33 = vld [vmem:[#allocation35_spill] sm:$0xff] }
 0x4e8   :  { %v4148_v63 = vadd.f32 %v4102_v42, %v4052_v52  ;;  %v4149_v4 = vadd.f32 %v4102_v42, %v4053_v61  ;;  %v3541_v1 = vadd.f32 %v7713_v3, %v3452_v51  ;;  %v7790_v29 = vmax.f32 %v4242_v2, %v4306_v39  ;;  %v7804_v52 = vpop.f32.mrf.mxu2 }
 0x4e9   :  { %v7794_v60 = vmax.f32 %v4243_v20, %v4307_v44  ;;  %v4103_v62 = vunpack.c.l.bf16 %v3879_v16  ;;  %v3883_v20 = vpop.permute.xlu1 %3882 }
 0x4ea   :  { %v3630_v36 = vadd.f32 %v7720_v43, %v3541_v1  ;;  %v4516_v53 = vpack.c.bf16 %v7790_v29, %v7787_v18  ;;  %v4198_v0 = vpack.c.bf16 %v4149_v4, %v4148_v63  ;;  %v7807_v43 = vpop.f32.mrf.mxu0  ;;  %v3888_v63 = vperm.slane %v3883_v20, %v5743_v11  ;;  %v7811_v29 = vpop.f32.mrf.mxu1 }
 0x4eb   :  { %v4517_v42 = vpack.c.bf16 %v7794_v60, %v7792_v17  ;;  %v3892_v20 = vpop.permute.xlu2 %3891 }
 0x4ec   :  { %v3687_v3 = vpack.c.bf16 %v3630_v36, %v8376_v19  ;;  %v4244_v39 = vunpack.c.l.bf16 %v4198_v0  ;;  %v4245_v1 = vunpack.c.h.bf16 %v4198_v0 }
 0x4ed   :  { %v3454_v2 = vpop.f32.mrf.mxu3 }
 0x4ee   :  { %v4054_v21 = vunpack.c.l.bf16 %v3687_v3  ;;  %v4055_v61 = vunpack.c.h.bf16 %v3687_v3  ;;  %v3455_v51 = vadd.f32 %v3454_v2, %v7736_v48  ;;  %v4308_v60 = vmul.f32 0.20019531, %v4244_v39 }
 0x4ef   :  { %v4104_v3 = vunpack.c.l.bf16 %v3888_v63  ;;  %v4309_v6 = vmul.f32 0.20019531, %v4245_v1 }
 0x4f0   :  { %v4150_v44 = vadd.f32 %v4103_v62, %v4054_v21  ;;  %v4151_v18 = vadd.f32 %v4103_v62, %v4055_v61  ;;  %v3544_v4 = vadd.f32 %v7741_v37, %v3455_v51  ;;  %v4468_v0 = vmax.f32 %v4244_v39, %v4308_v60  ;;  %v7816_v24 = vpop.f32.mrf.mxu2  ;;  %v8378_v60 = vld [vmem:[#allocation28_spill] sm:$0xff] }
 0x4f2   :  { %v4199_v17 = vpack.c.bf16 %v4151_v18, %v4150_v44  ;;  %v3633_v16 = vadd.f32 %v7744_v47, %v3544_v4  ;;  %v7819_v63 = vpop.f32.mrf.mxu0  ;;  %v7823_v59 = vpop.f32.mrf.mxu1 }
 0x4f4   :  { %v3688_v36 = vpack.c.bf16 %v3633_v16, %v8377_v33  ;;  %v4246_v19 = vunpack.c.l.bf16 %v4199_v17  ;;  %v4247_v48 = vunpack.c.h.bf16 %v4199_v17  ;;  %v4469_v16 = vmax.f32 %v4245_v1, %v4309_v6 }
 0x4f5   :  { %v3456_v2 = vpop.f32.mrf.mxu3  ;;  %v3897_v33 = vperm.slane %v3892_v20, %v5743_v11 }
 0x4f6   :  { %v4056_v21 = vunpack.c.l.bf16 %v3688_v36  ;;  %v4057_v62 = vunpack.c.h.bf16 %v3688_v36  ;;  %v3457_v37 = vadd.f32 %v3456_v2, %v7753_v9  ;;  %v4310_v61 = vmul.f32 0.20019531, %v4246_v19 }
 0x4f7   :  { %v4311_v51 = vmul.f32 0.20019531, %v4247_v48 }
 0x4f8   :  { %v4152_v44 = vadd.f32 %v4104_v3, %v4056_v21  ;;  %v4153_v47 = vadd.f32 %v4104_v3, %v4057_v62  ;;  %v3546_v18 = vadd.f32 %v7765_v32, %v3457_v37  ;;  %v4470_v4 = vmax.f32 %v4246_v19, %v4310_v61  ;;  %v8379_v37 = vld [vmem:[#allocation71_spill] sm:$0xff]  ;;  %v7830_v20 = vpop.f32.mrf.mxu2 }
 0x4f9   :  { %v4471_v17 = vmax.f32 %v4247_v48, %v4311_v51  ;;  %v4105_v32 = vunpack.c.l.bf16 %v3897_v33  ;;  %v3906_v61 = vperm.slane %v8379_v37, %v5743_v11 }
 0x4fa   :  { %v3635_v36 = vadd.f32 %v7770_v50, %v3546_v18  ;;  %v4518_v9 = vpack.c.bf16 %v4470_v4, %v4468_v0  ;;  %v4200_v39 = vpack.c.bf16 %v4153_v47, %v4152_v44  ;;  %v7833_v47 = vpop.f32.mrf.mxu0  ;;  %v8381_v4 = vpack.c.bf16 %v7751_v30, %v7748_v56  ;;  %v7842_v33 = vpop.f32.mrf.mxu1 }
 0x4fb   :  { %v4519_v2 = vpack.c.bf16 %v4471_v17, %v4469_v16  ;;  %v4106_v16 = vunpack.c.l.bf16 %v3906_v61 }
 0x4fc   :  { %v3689_v13 = vpack.c.bf16 %v3635_v36, %v8378_v60  ;;  %4544 = vmatpush.bf16.msrb.mxu2 %v4518_v9  ;;  %v4248_v48 = vunpack.c.l.bf16 %v4200_v39  ;;  %v4249_v0 = vunpack.c.h.bf16 %v4200_v39 }
 0x4fd   :  { %4570 = vmatpush.bf16.msra.mxu0 %v4519_v2  ;;  %v3459_v3 = vpop.f32.mrf.mxu3 }
 0x4fe   :  { %v4058_v19 = vunpack.c.l.bf16 %v3689_v13  ;;  %v4059_v6 = vunpack.c.h.bf16 %v3689_v13  ;;  %v3460_v1 = vadd.f32 %v3459_v3, %v7777_v31  ;;  %v4312_v13 = vmul.f32 0.20019531, %v4248_v48  ;;  %v8380_v31 = vld [vmem:[#allocation24_spill] sm:$0xff] }
 0x500   :  { %v4154_v21 = vadd.f32 %v4105_v32, %v4058_v19  ;;  %v4155_v62 = vadd.f32 %v4105_v32, %v4059_v6  ;;  %v3549_v50 = vadd.f32 %v7782_v57, %v3460_v1  ;;  %4545 = vmatpush.bf16.msrb.mxu2 %v4516_v53  ;;  %v7845_v60 = vmax.f32 %v4248_v48, %v4312_v13 }
 0x501   :  { %4571 = vmatpush.bf16.msra.mxu0 %v4517_v42  ;;  %v8382_v42 = vpack.c.bf16 %v7757_v5, %v7755_v15  ;;  %v8383_v15 = vpack.c.bf16 %v7718_v25, %v7715_v58  ;;  %v8384_v19 = vpack.c.bf16 %v7724_v38, %v7722_v12  ;;  %v3915_v1 = vperm.slane %v7779_v46, %v5743_v11  ;;  %v3380_v25 = vpop.f32.mrf.mxu2 }
 0x502   :  { %v3638_v51 = vadd.f32 %v7785_v10, %v3549_v50  ;;  %v4201_v44 = vpack.c.bf16 %v4155_v62, %v4154_v21  ;;  %v4313_v10 = vmul.f32 0.20019531, %v4249_v0  ;;  %v8385_v62 = vld [vmem:[#allocation33_spill] sm:$0xff]  ;;  %v8386_v38 = vpack.c.bf16 %v7683_v14, %v7680_v7  ;;  %v8389_v14 = vld [vmem:[#allocation19_spill] sm:$0xff] }
 0x503   :  { %v8387_v50 = vpack.c.bf16 %v7687_v22, %v7685_v23  ;;  %v4107_v37 = vunpack.c.l.bf16 %v3915_v1  ;;  %v8388_v7 = vpack.c.bf16 %v7648_v34, %v7645_v54  ;;  %v3924_v23 = vperm.slane %v8389_v14, %v5743_v11 }
 0x504   :  { %v3690_v18 = vpack.c.bf16 %v3638_v51, %v8380_v31  ;;  %4546 = vmatpush.bf16.msrb.mxu2 %v8381_v4  ;;  %v4250_v57 = vunpack.c.l.bf16 %v4201_v44  ;;  %v4251_v53 = vunpack.c.h.bf16 %v4201_v44  ;;  %v7856_v6 = vmax.f32 %v4249_v0, %v4313_v10  ;;  %v3647_v44 = vpop.f32.mrf.mxu1 }
 0x505   :  { %4572 = vmatpush.bf16.msra.mxu0 %v8382_v42  ;;  %v3461_v17 = vpop.f32.mrf.mxu3  ;;  %v8390_v22 = vpack.c.bf16 %v7654_v45, %v7652_v28  ;;  %v8391_v42 = vld [vmem:[#allocation76_spill] sm:$0xff]  ;;  %v4108_v10 = vunpack.c.l.bf16 %v3924_v23 }
 0x506   :  { %v4060_v36 = vunpack.c.l.bf16 %v3690_v18  ;;  %v4061_v9 = vunpack.c.h.bf16 %v3690_v18  ;;  %v3462_v2 = vadd.f32 %v3461_v17, %v7804_v52  ;;  %v4314_v39 = vmul.f32 0.20019531, %v4250_v57 }
 0x507   :  { %v4315_v56 = vmul.f32 0.20019531, %v4251_v53 }
 0x508   :  { %v4156_v30 = vadd.f32 %v4106_v16, %v4060_v36  ;;  %v4157_v3 = vadd.f32 %v4106_v16, %v4061_v9  ;;  %v3551_v32 = vadd.f32 %v7807_v43, %v3462_v2  ;;  %4547 = vmatpush.bf16.msrb.mxu2 %v8383_v15  ;;  %v7851_v5 = vmax.f32 %v4250_v57, %v4314_v39 }
 0x509   :  { %4573 = vmatpush.bf16.msra.mxu0 %v8384_v19  ;;  %v7858_v52 = vmax.f32 %v4251_v53, %v4315_v56  ;;  %v8393_v36 = vpack.c.bf16 %v7617_v27, %v7615_v40  ;;  %v3382_v45 = vpop.f32.mrf.mxu2  ;;  %v8394_v40 = vpack.c.bf16 %v7576_v41, %v7571_v26  ;;  %v8395_v19 = vpack.c.bf16 %v7580_v55, %v7578_v49 }
 0x50a   :  { %v3640_v48 = vadd.f32 %v7811_v29, %v3551_v32  ;;  %v4202_v43 = vpack.c.bf16 %v4157_v3, %v4156_v30  ;;  %v3558_v29 = vpop.f32.mrf.mxu0 }
 0x50c   :  { %v3691_v12 = vpack.c.bf16 %v3640_v48, %v8385_v62  ;;  %4548 = vmatpush.bf16.msrb.mxu2 %v8386_v38  ;;  %v4252_v13 = vunpack.c.l.bf16 %v4202_v43  ;;  %v4253_v57 = vunpack.c.h.bf16 %v4202_v43  ;;  %v8396_v43 = vld [vmem:[#allocation64_spill] sm:$0xff]  ;;  %v8397_v38 = vld [vmem:[#allocation51_spill] sm:$0xff] }
 0x50d   :  { %4574 = vmatpush.bf16.msra.mxu0 %v8387_v50  ;;  %v3464_v46 = vpop.f32.mrf.mxu3  ;;  %v3933_v62 = vperm.slane %v8396_v43, %v5743_v11 }
 0x50e   :  { %v4062_v61 = vunpack.c.l.bf16 %v3691_v12  ;;  %v4063_v0 = vunpack.c.h.bf16 %v3691_v12  ;;  %v3465_v51 = vadd.f32 %v3464_v46, %v7816_v24  ;;  %v4316_v16 = vmul.f32 0.20019531, %v4252_v13 }
 0x50f   :  { %v4317_v9 = vmul.f32 0.20019531, %v4253_v57  ;;  %v4109_v50 = vunpack.c.l.bf16 %v3933_v62 }
 0x510   :  { %v4158_v31 = vadd.f32 %v4107_v37, %v4062_v61  ;;  %v4159_v18 = vadd.f32 %v4107_v37, %v4063_v0  ;;  %v3554_v4 = vadd.f32 %v7819_v63, %v3465_v51  ;;  %4549 = vmatpush.bf16.msrb.mxu2 %v8388_v7  ;;  %v8392_v63 = vpack.c.bf16 %v7613_v35, %v7608_v8 }
 0x511   :  { %4575 = vmatpush.bf16.msra.mxu0 %v8390_v22  ;;  %v7893_v3 = vmax.f32 %v4252_v13, %v4316_v16  ;;  %v7904_v1 = vmax.f32 %v4253_v57, %v4317_v9  ;;  %v3385_v0 = vpop.f32.mrf.mxu2 }
 0x512   :  { %v3643_v24 = vadd.f32 %v7823_v59, %v3554_v4  ;;  %v4203_v53 = vpack.c.bf16 %v4159_v18, %v4158_v31  ;;  %v3560_v30 = vpop.f32.mrf.mxu0 }
 0x514   :  { %v3692_v17 = vpack.c.bf16 %v3643_v24, %v8391_v42  ;;  %4550 = vmatpush.bf16.msrb.mxu2 %v8392_v63  ;;  %v4254_v54 = vunpack.c.l.bf16 %v4203_v53  ;;  %v4255_v34 = vunpack.c.h.bf16 %v4203_v53  ;;  %v8399_v53 = vld [vmem:[#allocation55_spill] sm:$0xff] }
 0x515   :  { %4576 = vmatpush.bf16.msra.mxu0 %v8393_v36  ;;  %v3466_v28 = vpop.f32.mrf.mxu3 }
 0x516   :  { %v4064_v2 = vunpack.c.l.bf16 %v3692_v17  ;;  %v4065_v59 = vunpack.c.h.bf16 %v3692_v17  ;;  %v3467_v39 = vadd.f32 %v3466_v28, %v7830_v20  ;;  %v4318_v56 = vmul.f32 0.20019531, %v4254_v54  ;;  %v3649_v20 = vpop.f32.mrf.mxu1 }
 0x517   :  { %v4319_v8 = vmul.f32 0.20019531, %v4255_v34 }
 0x518   :  { %v4160_v35 = vadd.f32 %v4108_v10, %v4064_v2  ;;  %v4161_v32 = vadd.f32 %v4108_v10, %v4065_v59  ;;  %v3556_v15 = vadd.f32 %v7833_v47, %v3467_v39  ;;  %4551 = vmatpush.bf16.msrb.mxu2 %v8394_v40  ;;  %v7899_v27 = vmax.f32 %v4254_v54, %v4318_v56 }
 0x519   :  { %4577 = vmatpush.bf16.msra.mxu0 %v8395_v19  ;;  %v7906_v48 = vmax.f32 %v4255_v34, %v4319_v8  ;;  %v3387_v56 = vpop.f32.mrf.mxu2 }
 0x51a   :  { %v3645_v47 = vadd.f32 %v7842_v33, %v3556_v15  ;;  %v4204_v12 = vpack.c.bf16 %v4161_v32, %v4160_v35  ;;  %v8398_v33 = vld [vmem:[#allocation68_spill] sm:$0xff]  ;;  %v3563_v7 = vpop.f32.mrf.mxu0  ;;  %v8400_v32 = vld [vmem:[#allocation23_spill] sm:$0xff] }
 0x51b   :  { %v3942_v4 = vperm.slane %v8398_v33, %v5743_v11  ;;  %v3951_v15 = vperm.slane %v8400_v32, %v5743_v11 }
 0x51c   :  { %v3693_v49 = vpack.c.bf16 %v3645_v47, %v8397_v38  ;;  %v4256_v51 = vunpack.c.l.bf16 %v4204_v12  ;;  %v4257_v14 = vunpack.c.h.bf16 %v4204_v12 }
 0x51d   :  { %v3469_v55 = vpop.f32.mrf.mxu3  ;;  %v4110_v63 = vunpack.c.l.bf16 %v3942_v4 }
 0x51e   :  { %v4066_v46 = vunpack.c.l.bf16 %v3693_v49  ;;  %v4067_v37 = vunpack.c.h.bf16 %v3693_v49  ;;  %v3470_v61 = vadd.f32 %v3469_v55, %v3380_v25  ;;  %v3652_v57 = vpop.f32.mrf.mxu1  ;;  %v4320_v24 = vmul.f32 0.20019531, %v4256_v51 }
 0x51f   :  { %v4321_v54 = vmul.f32 0.20019531, %v4257_v14  ;;  %v4111_v49 = vunpack.c.l.bf16 %v3951_v15  ;;  %v8404_v15 = vld [vmem:[#allocation63_spill] sm:$0xff] }
 0x520   :  { %v4162_v13 = vadd.f32 %v4109_v50, %v4066_v46  ;;  %v4163_v31 = vadd.f32 %v4109_v50, %v4067_v37  ;;  %v3559_v18 = vadd.f32 %v3558_v29, %v3470_v61  ;;  %v7919_v28 = vmax.f32 %v4256_v51, %v4320_v24 }
 0x521   :  { %v7923_v8 = vmax.f32 %v4257_v14, %v4321_v54  ;;  %v3390_v14 = vpop.f32.mrf.mxu2 }
 0x522   :  { %v3648_v23 = vadd.f32 %v3647_v44, %v3559_v18  ;;  %v4205_v22 = vpack.c.bf16 %v4163_v31, %v4162_v13  ;;  %v3565_v43 = vpop.f32.mrf.mxu0  ;;  %v8402_v13 = vld [vmem:[#allocation26_spill] sm:$0xff] }
 0x523   :  { %v3960_v31 = vperm.slane %v8402_v13, %v5743_v11 }
 0x524   :  { %v3694_v16 = vpack.c.bf16 %v3648_v23, %v8399_v53  ;;  %v4258_v42 = vunpack.c.l.bf16 %v4205_v22  ;;  %v4259_v17 = vunpack.c.h.bf16 %v4205_v22  ;;  %v8403_v22 = vld [vmem:[#allocation42_spill] sm:$0xff] }
 0x525   :  { %v3471_v25 = vpop.f32.mrf.mxu3 }
 0x526   :  { %v4068_v34 = vunpack.c.l.bf16 %v3694_v16  ;;  %v4069_v10 = vunpack.c.h.bf16 %v3694_v16  ;;  %v3472_v36 = vadd.f32 %v3471_v25, %v3382_v45  ;;  %v4322_v29 = vmul.f32 0.20019531, %v4258_v42  ;;  %v3654_v38 = vpop.f32.mrf.mxu1 }
 0x527   :  { %v4323_v9 = vmul.f32 0.20019531, %v4259_v17 }
 0x528   :  { %v4164_v2 = vadd.f32 %v4110_v63, %v4068_v34  ;;  %v4165_v59 = vadd.f32 %v4110_v63, %v4069_v10  ;;  %v3561_v44 = vadd.f32 %v3560_v30, %v3472_v36  ;;  %v7921_v39 = vmax.f32 %v4258_v42, %v4322_v29  ;;  %v8401_v30 = vld [vmem:[#allocation46_spill] sm:$0xff] }
 0x529   :  { %v7925_v35 = vmax.f32 %v4259_v17, %v4323_v9  ;;  %v4112_v42 = vunpack.c.l.bf16 %v3960_v31 }
 0x52a   :  { %v3650_v40 = vadd.f32 %v3649_v20, %v3561_v44  ;;  %v4206_v19 = vpack.c.bf16 %v4165_v59, %v4164_v2  ;;  %v4524_v45 = vpack.c.bf16 %v7921_v39, %v7919_v28  ;;  %v3568_v63 = vpop.f32.mrf.mxu0  ;;  %v8421_v28 = vpack.c.bf16 %v7858_v52, %v7856_v6 }
 0x52b   :  { %v4525_v62 = vpack.c.bf16 %v7925_v35, %v7923_v8 }
 0x52c   :  { %v3695_v47 = vpack.c.bf16 %v3650_v40, %v8401_v30  ;;  %v4260_v37 = vunpack.c.l.bf16 %v4206_v19  ;;  %v4261_v18 = vunpack.c.h.bf16 %v4206_v19  ;;  %v3969_v40 = vperm.slane %v8404_v15, %v5743_v11 }
 0x52d   :  { %v3474_v12 = vpop.f32.mrf.mxu3 }
 0x52e   :  { %v4070_v55 = vunpack.c.l.bf16 %v3695_v47  ;;  %v4071_v50 = vunpack.c.h.bf16 %v3695_v47  ;;  %v3475_v46 = vadd.f32 %v3474_v12, %v3385_v0  ;;  %v4324_v23 = vmul.f32 0.20019531, %v4260_v37  ;;  %v3657_v10 = vpop.f32.mrf.mxu1  ;;  %v8405_v12 = vld [vmem:[#allocation39_spill] sm:$0xff] }
 0x52f   :  { %v4325_v0 = vmul.f32 0.20019531, %v4261_v18 }
 0x530   :  { %v4166_v61 = vadd.f32 %v4111_v49, %v4070_v55  ;;  %v4167_v51 = vadd.f32 %v4111_v49, %v4071_v50  ;;  %v3564_v20 = vadd.f32 %v3563_v7, %v3475_v46  ;;  %v7937_v36 = vmax.f32 %v4260_v37, %v4324_v23 }
 0x531   :  { %v7941_v44 = vmax.f32 %v4261_v18, %v4325_v0  ;;  %v4113_v50 = vunpack.c.l.bf16 %v3969_v40  ;;  %v8406_v18 = vld [vmem:[#allocation56_spill] sm:$0xff] }
 0x532   :  { %v3653_v33 = vadd.f32 %v3652_v57, %v3564_v20  ;;  %v4207_v4 = vpack.c.bf16 %v4167_v51, %v4166_v61  ;;  %v3570_v51 = vpop.f32.mrf.mxu0 }
 0x534   :  { %v3696_v24 = vpack.c.bf16 %v3653_v33, %v8403_v22  ;;  %v4262_v53 = vunpack.c.l.bf16 %v4207_v4  ;;  %v4263_v16 = vunpack.c.h.bf16 %v4207_v4  ;;  %v3978_v33 = vperm.slane %v8406_v18, %v5743_v11 }
 0x535   :  { %v3476_v17 = vpop.f32.mrf.mxu3 }
 0x536   :  { %v4072_v25 = vunpack.c.l.bf16 %v3696_v24  ;;  %v4073_v54 = vunpack.c.h.bf16 %v3696_v24  ;;  %v3477_v34 = vadd.f32 %v3476_v17, %v3387_v56  ;;  %v4326_v7 = vmul.f32 0.20019531, %v4262_v53  ;;  %v3659_v4 = vpop.f32.mrf.mxu1 }
 0x537   :  { %v4327_v29 = vmul.f32 0.20019531, %v4263_v16 }
 0x538   :  { %v4168_v57 = vadd.f32 %v4112_v42, %v4072_v25  ;;  %v4169_v9 = vadd.f32 %v4112_v42, %v4073_v54  ;;  %v3566_v2 = vadd.f32 %v3565_v43, %v3477_v34  ;;  %v7939_v59 = vmax.f32 %v4262_v53, %v4326_v7  ;;  %v3392_v43 = vpop.f32.mrf.mxu2 }
 0x539   :  { %v7943_v32 = vmax.f32 %v4263_v16, %v4327_v29  ;;  %v8407_v16 = vld [vmem:[#allocation31_spill] sm:$0xff]  ;;  %v4114_v25 = vunpack.c.l.bf16 %v3978_v33 }
 0x53a   :  { %v3655_v19 = vadd.f32 %v3654_v38, %v3566_v2  ;;  %v4208_v30 = vpack.c.bf16 %v4169_v9, %v4168_v57  ;;  %v4526_v56 = vpack.c.bf16 %v7939_v59, %v7937_v36  ;;  %v8419_v36 = vpack.c.bf16 %v7906_v48, %v7904_v1 }
 0x53b   :  { %v4527_v47 = vpack.c.bf16 %v7943_v32, %v7941_v44  ;;  %v8420_v44 = vpack.c.bf16 %v7851_v5, %v7845_v60 }
 0x53c   :  { %v3697_v49 = vpack.c.bf16 %v3655_v19, %v8405_v12  ;;  %v4264_v20 = vunpack.c.l.bf16 %v4208_v30  ;;  %v4265_v23 = vunpack.c.h.bf16 %v4208_v30  ;;  %v3573_v30 = vpop.f32.mrf.mxu0 }
 0x53d   :  { %v3479_v55 = vpop.f32.mrf.mxu3 }
 0x53e   :  { %v4074_v46 = vunpack.c.l.bf16 %v3697_v49  ;;  %v4075_v37 = vunpack.c.h.bf16 %v3697_v49  ;;  %v3480_v61 = vadd.f32 %v3479_v55, %v3390_v14  ;;  %v4328_v53 = vmul.f32 0.20019531, %v4264_v20  ;;  %v8408_v55 = vld [vmem:[#allocation32_spill] sm:$0xff] }
 0x53f   :  { %v4329_v14 = vmul.f32 0.20019531, %v4265_v23 }
 0x540   :  { %v4170_v13 = vadd.f32 %v4113_v50, %v4074_v46  ;;  %v4171_v31 = vadd.f32 %v4113_v50, %v4075_v37  ;;  %v3569_v38 = vadd.f32 %v3568_v63, %v3480_v61  ;;  %v3395_v63 = vpop.f32.mrf.mxu2  ;;  %v7955_v9 = vmax.f32 %v4264_v20, %v4328_v53  ;;  %v3662_v61 = vpop.f32.mrf.mxu1 }
 0x541   :  { %v7959_v12 = vmax.f32 %v4265_v23, %v4329_v14  ;;  %v3987_v50 = vperm.slane %v8408_v55, %v5743_v11 }
 0x542   :  { %v3658_v22 = vadd.f32 %v3657_v10, %v3569_v38  ;;  %v4209_v24 = vpack.c.bf16 %v4171_v31, %v4170_v13 }
 0x543   :  { %v4115_v38 = vunpack.c.l.bf16 %v3987_v50 }
 0x544   :  { %v3698_v42 = vpack.c.bf16 %v3658_v22, %v8407_v16  ;;  %v4266_v17 = vunpack.c.l.bf16 %v4209_v24  ;;  %v4267_v0 = vunpack.c.h.bf16 %v4209_v24  ;;  %v3575_v14 = vpop.f32.mrf.mxu0 }
 0x545   :  { %v3481_v54 = vpop.f32.mrf.mxu3 }
 0x546   :  { %v4076_v34 = vunpack.c.l.bf16 %v3698_v42  ;;  %v4077_v7 = vunpack.c.h.bf16 %v3698_v42  ;;  %v3482_v29 = vadd.f32 %v3481_v54, %v3392_v43  ;;  %v4330_v57 = vmul.f32 0.20019531, %v4266_v17 }
 0x547   :  { %v4331_v2 = vmul.f32 0.20019531, %v4267_v0 }
 0x548   :  { %v4172_v15 = vadd.f32 %v4114_v25, %v4076_v34  ;;  %v4173_v40 = vadd.f32 %v4114_v25, %v4077_v7  ;;  %v3571_v10 = vadd.f32 %v3570_v51, %v3482_v29  ;;  %v7957_v19 = vmax.f32 %v4266_v17, %v4330_v57  ;;  %v8409_v51 = vld [vmem:[#allocation27_spill] sm:$0xff]  ;;  %v3397_v17 = vpop.f32.mrf.mxu2  ;;  %v8411_v7 = vld [vmem:[#allocation22_spill] sm:$0xff] }
 0x549   :  { %v7961_v49 = vmax.f32 %v4267_v0, %v4331_v2 }
 0x54a   :  { %v3660_v46 = vadd.f32 %v3659_v4, %v3571_v10  ;;  %v4210_v43 = vpack.c.bf16 %v4173_v40, %v4172_v15  ;;  %v4528_v37 = vpack.c.bf16 %v7957_v19, %v7955_v9  ;;  %v8410_v4 = vld [vmem:[#allocation59_spill] sm:$0xff]  ;;  %v3664_v40 = vpop.f32.mrf.mxu1 }
 0x54b   :  { %v4529_v20 = vpack.c.bf16 %v7961_v49, %v7959_v12  ;;  %v3996_v42 = vperm.slane %v8410_v4, %v5743_v11 }
 0x54c   :  { %v3699_v13 = vpack.c.bf16 %v3660_v46, %v8409_v51  ;;  %v4268_v22 = vunpack.c.l.bf16 %v4210_v43  ;;  %v4269_v0 = vunpack.c.h.bf16 %v4210_v43 }
 0x54d   :  { %v3484_v31 = vpop.f32.mrf.mxu3  ;;  %v4116_v15 = vunpack.c.l.bf16 %v3996_v42 }
 0x54e   :  { %v4078_v18 = vunpack.c.l.bf16 %v3699_v13  ;;  %v4079_v33 = vunpack.c.h.bf16 %v3699_v13  ;;  %v3485_v23 = vadd.f32 %v3484_v31, %v3395_v63  ;;  %v4332_v34 = vmul.f32 0.20019531, %v4268_v22 }
 0x54f   :  { %v4333_v10 = vmul.f32 0.20019531, %v4269_v0 }
 0x550   :  { %v4174_v24 = vadd.f32 %v4115_v38, %v4078_v18  ;;  %v4175_v53 = vadd.f32 %v4115_v38, %v4079_v33  ;;  %v3574_v16 = vadd.f32 %v3573_v30, %v3485_v23  ;;  %v7973_v51 = vmax.f32 %v4268_v22, %v4332_v34  ;;  %v8412_v23 = vld [vmem:[#allocation43_spill] sm:$0xff]  ;;  %v3400_v22 = vpop.f32.mrf.mxu2 }
 0x551   :  { %v7977_v18 = vmax.f32 %v4269_v0, %v4333_v10  ;;  %v8414_v10 = vld [vmem:[#allocation47_spill] sm:$0xff] }
 0x552   :  { %v3663_v25 = vadd.f32 %v3662_v61, %v3574_v16  ;;  %v4211_v54 = vpack.c.bf16 %v4175_v53, %v4174_v24  ;;  %v4005_v24 = vperm.slane %v8412_v23, %v5743_v11 }
 0x554   :  { %v3700_v29 = vpack.c.bf16 %v3663_v25, %v8411_v7  ;;  %v4270_v57 = vunpack.c.l.bf16 %v4211_v54  ;;  %v4271_v2 = vunpack.c.h.bf16 %v4211_v54  ;;  %v3578_v54 = vpop.f32.mrf.mxu0  ;;  %v4117_v0 = vunpack.c.l.bf16 %v4005_v24 }
 0x555   :  { %v3486_v63 = vpop.f32.mrf.mxu3 }
 0x556   :  { %v4080_v55 = vunpack.c.l.bf16 %v3700_v29  ;;  %v4081_v50 = vunpack.c.h.bf16 %v3700_v29  ;;  %v3487_v30 = vadd.f32 %v3486_v63, %v3397_v17  ;;  %v4334_v46 = vmul.f32 0.20019531, %v4270_v57  ;;  %v8413_v17 = vld [vmem:[#allocation60_spill] sm:$0xff] }
 0x557   :  { %v4335_v13 = vmul.f32 0.20019531, %v4271_v2 }
 0x558   :  { %v4176_v43 = vadd.f32 %v4116_v15, %v4080_v55  ;;  %v4177_v61 = vadd.f32 %v4116_v15, %v4081_v50  ;;  %v3576_v31 = vadd.f32 %v3575_v14, %v3487_v30  ;;  %v7975_v38 = vmax.f32 %v4270_v57, %v4334_v46  ;;  %v3667_v57 = vpop.f32.mrf.mxu1 }
 0x559   :  { %v7979_v33 = vmax.f32 %v4271_v2, %v4335_v13  ;;  %v4014_v55 = vperm.slane %v8414_v10, %v5743_v11 }
 0x55a   :  { %v3665_v53 = vadd.f32 %v3664_v40, %v3576_v31  ;;  %v4212_v16 = vpack.c.bf16 %v4177_v61, %v4176_v43  ;;  %v4530_v4 = vpack.c.bf16 %v7975_v38, %v7973_v51  ;;  %v8415_v43 = vld [vmem:[#allocation20_spill] sm:$0xff] }
 0x55b   :  { %v4531_v42 = vpack.c.bf16 %v7979_v33, %v7977_v18  ;;  %v4118_v24 = vunpack.c.l.bf16 %v4014_v55 }
 0x55c   :  { %v3701_v25 = vpack.c.bf16 %v3665_v53, %v8413_v17  ;;  %v4272_v2 = vunpack.c.l.bf16 %v4212_v16  ;;  %v4273_v50 = vunpack.c.h.bf16 %v4212_v16  ;;  %v3402_v53 = vpop.f32.mrf.mxu2 }
 0x55d   :  { %v3489_v14 = vpop.f32.mrf.mxu3 }
 0x55e   :  { %v4082_v34 = vunpack.c.l.bf16 %v3701_v25  ;;  %v4083_v7 = vunpack.c.h.bf16 %v3701_v25  ;;  %v3490_v29 = vadd.f32 %v3489_v14, %v3400_v22  ;;  %v4336_v13 = vmul.f32 0.20019531, %v4272_v2 }
 0x55f   :  { %v4337_v22 = vmul.f32 0.20019531, %v4273_v50 }
 0x560   :  { %v4178_v15 = vadd.f32 %v4117_v0, %v4082_v34  ;;  %v4179_v40 = vadd.f32 %v4117_v0, %v4083_v7  ;;  %v3579_v63 = vadd.f32 %v3578_v54, %v3490_v29  ;;  %v3580_v54 = vpop.f32.mrf.mxu0  ;;  %v4496_v7 = vmax.f32 %v4272_v2, %v4336_v13  ;;  %v4536_v13 = vld [vmem:[%s8041_s5] sm:$0xff]  ;;  %s5338_s5 = smov [#allocation3]  }
 0x561   :  { %s4659_s17 = sshll.u32 %s5338_s5, 4  ;;  %s4660_s17 = int_to_ptr.vmem [resolvable:$true] %s4659_s17 }
 0x562   :  { %v3668_v30 = vadd.f32 %v3667_v57, %v3579_v63  ;;  %v4213_v46 = vpack.c.bf16 %v4179_v40, %v4178_v15  ;;  %v3669_v40 = vpop.f32.mrf.mxu1  ;;  %v4497_v63 = vmax.f32 %v4273_v50, %v4337_v22  ;;  %v4538_v22 = vunpack.c.l.b16 %v4536_v13 }
 0x564   :  { %v3702_v61 = vpack.c.bf16 %v3668_v30, %v8415_v43  ;;  %v4274_v31 = vunpack.c.l.bf16 %v4213_v46  ;;  %v4275_v23 = vunpack.c.h.bf16 %v4213_v46  ;;  %v8416_v46 = vld [vmem:[#allocation38_spill] sm:$0xff] }
 0x565   :  { %v3491_v17 = vpop.f32.mrf.mxu3  ;;  %v4023_v55 = vperm.slane %v8416_v46, %v5743_v11  ;;  %v4540_v11 = vpack.c.b16 %v4538_v22, %v4538_v22 }
 0x566   :  { %v4084_v25 = vunpack.c.l.bf16 %v3702_v61  ;;  %v4085_v14 = vunpack.c.h.bf16 %v3702_v61  ;;  %v3492_v34 = vadd.f32 %v3491_v17, %v3402_v53  ;;  %v4338_v0 = vmul.f32 0.20019531, %v4274_v31  ;;  %v8417_v61 = vld [vmem:[#allocation67_spill] sm:$0xff] }
 0x567   :  { %v4339_v29 = vmul.f32 0.20019531, %v4275_v23  ;;  %v4119_v17 = vunpack.c.l.bf16 %v4023_v55  ;;  %4552 = vmatmul.bf16.vlgmr.msrb.gmra.mxu2 %v4540_v11  ;;  %4578 = vmatmul.bf16.vlgmr.msra.gmra.mxu0 %v4540_v11 }
 0x568   :  { %v4180_v10 = vadd.f32 %v4118_v24, %v4084_v25  ;;  %v4181_v16 = vadd.f32 %v4118_v24, %v4085_v14  ;;  %v3581_v57 = vadd.f32 %v3580_v54, %v3492_v34  ;;  %v4498_v15 = vmax.f32 %v4274_v31, %v4338_v0 }
 0x569   :  { %v4499_v30 = vmax.f32 %v4275_v23, %v4339_v29 }
 0x56a   :  { %v4214_v43 = vpack.c.bf16 %v4181_v16, %v4180_v10  ;;  %v3670_v21 = vadd.f32 %v3669_v40, %v3581_v57  ;;  %v4532_v58 = vpack.c.bf16 %v4498_v15, %v4496_v7 }
 0x56b   :  { %v4533_v41 = vpack.c.bf16 %v4499_v30, %v4497_v63 }
 0x56c   :  { %v3703_v53 = vpack.c.bf16 %v3670_v21, %v8417_v61  ;;  %v4276_v50 = vunpack.c.l.bf16 %v4214_v43  ;;  %v4277_v23 = vunpack.c.h.bf16 %v4214_v43  ;;  %v4649_v43 = vlaneseq }
 0x56e   :  { %v4086_v26 = vunpack.c.l.bf16 %v3703_v53  ;;  %v4087_v2 = vunpack.c.h.bf16 %v3703_v53  ;;  %v4340_v34 = vmul.f32 0.20019531, %v4276_v50  ;;  %v4341_v54 = vmul.f32 0.20019531, %v4277_v23 }
 0x56f   :  { %vm4651_vm10 = vcmp.lt.s32.totalorder %v4649_v43, 256 }
 0x570   :  { %v4182_v31 = vadd.f32 %v4119_v17, %v4086_v26  ;;  %v4183_v24 = vadd.f32 %v4119_v17, %v4087_v2  ;;  %v4500_v29 = vmax.f32 %v4276_v50, %v4340_v34  ;;  %v4501_v16 = vmax.f32 %v4277_v23, %v4341_v54 }
 0x572   :  { %v4215_v25 = vpack.c.bf16 %v4183_v24, %v4182_v31 }
 0x574   :  { %v4278_v14 = vunpack.c.l.bf16 %v4215_v25  ;;  %v4279_v0 = vunpack.c.h.bf16 %v4215_v25 }
 0x576   :  { %v4342_v21 = vmul.f32 0.20019531, %v4278_v14  ;;  %v4343_v7 = vmul.f32 0.20019531, %v4279_v0 }
 0x578   :  { %v4502_v10 = vmax.f32 %v4278_v14, %v4342_v21  ;;  %v4503_v57 = vmax.f32 %v4279_v0, %v4343_v7 }
 0x57a   :  { %v4534_v15 = vpack.c.bf16 %v4502_v10, %v4500_v29  ;;  %v4535_v26 = vpack.c.bf16 %v4503_v57, %v4501_v16 }
 0x57c   :  { %4557 = vmatpush.bf16.msrb.mxu3 %v4534_v15  ;;  %4583 = vmatpush.bf16.msra.mxu1 %v4535_v26 }
 0x580   :  { %4558 = vmatpush.bf16.msrb.mxu3 %v4532_v58  ;;  %4584 = vmatpush.bf16.msra.mxu1 %v4533_v41  ;;  %v4539_v58 = vunpack.c.h.b16 %v4536_v13  ;;  %v8418_v41 = vpack.c.bf16 %v7899_v27, %v7893_v3  ;;  %v4600_v27 = vpop.permute.xlu0 %4599 }
 0x582   :  { %v4541_v59 = vpack.c.b16 %v4539_v58, %v4539_v58 }
 0x584   :  { %4559 = vmatpush.bf16.msrb.mxu3 %v4530_v4  ;;  %4585 = vmatpush.bf16.msra.mxu1 %v4531_v42 }
 0x588   :  { %4560 = vmatpush.bf16.msrb.mxu3 %v4528_v37  ;;  %4586 = vmatpush.bf16.msra.mxu1 %v4529_v20 }
 0x58c   :  { %4561 = vmatpush.bf16.msrb.mxu3 %v4526_v56  ;;  %4587 = vmatpush.bf16.msra.mxu1 %v4527_v47 }
 0x590   :  { %4562 = vmatpush.bf16.msrb.mxu3 %v4524_v45  ;;  %4588 = vmatpush.bf16.msra.mxu1 %v4525_v62  ;;  %v4602_v62 = vperm.slane %v4600_v27, 0 }
 0x594   :  { %4563 = vmatpush.bf16.msrb.mxu3 %v8418_v41  ;;  %4589 = vmatpush.bf16.msra.mxu1 %v8419_v36 }
 0x598   :  { %4564 = vmatpush.bf16.msrb.mxu3 %v8420_v44  ;;  %4590 = vmatpush.bf16.msra.mxu1 %v8421_v28 }
 0x59b   :  { %4565 = vmatmul.bf16.vlgmr.msrb.gmra.mxu3 %v4541_v59  ;;  %4591 = vmatmul.bf16.vlgmr.msra.gmra.mxu1 %v4541_v59 }
 0x5e4   :  { %v4579_v39 = vpop.f32.mrf.mxu0 }
 0x5ea   :  { %v4553_v8 = vpop.f32.mrf.mxu2 }
 0x5ec   :  { %v4581_v35 = vpop.f32.mrf.mxu0 }
 0x5f2   :  { %v4555_v3 = vpop.f32.mrf.mxu2 }
 0x618   :  { %v4592_v45 = vpop.f32.mrf.mxu1 }
 0x619   :  { %v4593_v1 = vadd.f32 %v4592_v45, %v4579_v39 }
 0x61b   :  { %v4604_v48 = vadd.f32 %v4602_v62, %v4593_v1 }
 0x61d   :  { %v5183_v32 = vmul.f32 -1.442695, %v4604_v48 }
 0x61e   :  { %v4566_v56 = vpop.f32.mrf.mxu3 }
 0x61f   :  { %5302 = vpow2.f32 %v5183_v32  ;;  %v4567_v60 = vadd.f32 %v4566_v56, %v4553_v8 }
 0x620   :  { %v4594_v5 = vpop.f32.mrf.mxu1 }
 0x621   :  { %v4603_v47 = vadd.f32 %v4602_v62, %v4567_v60 }
 0x623   :  { %v5182_v9 = vmul.f32 -1.442695, %v4603_v47 }
 0x625   :  { %v5303_v6 = vpop.eup %5302  ;;  %5304 = vpow2.f32 %v5182_v9 }
 0x626   :  { %v4612_v52 = vadd.f32 1.0, %v5303_v6  ;;  %v4568_v19 = vpop.f32.mrf.mxu3 }
 0x628   :  { %5306 = vrcp.f32 %v4612_v52  ;;  %v4639_v33 = vand.u32 2147483648, %v4612_v52  ;;  %vm4633_vm2 = vweird.f32 %v4612_v52  ;;  %v4637_v40 = vand.u32 2147483647, %v4612_v52 }
 0x62a   :  { %v4640_v55 = vor.u32 1.1754944e-38, %v4639_v33  ;;  %vm4638_vm5 = vcmp.eq.f32.partialorder %v4637_v40, 8.507059e+37 }
 0x62b   :  { %v5305_v12 = vpop.eup %5304 }
 0x62c   :  { %v4611_v49 = vadd.f32 1.0, %v5305_v12 }
 0x62e   :  { %v5307_v37 = vpop.eup %5306  ;;  %5308 = vrcp.f32 %v4611_v49  ;;  %v4624_v46 = vand.u32 2147483648, %v4611_v49  ;;  %v4622_v53 = vand.u32 2147483647, %v4611_v49  ;;  %vm4618_vm6 = vweird.f32 %v4611_v49 }
 0x62f   :  { %v4629_v20 = vmul.f32 %v5307_v37, %v4612_v52  ;;  %vm4634_vm1 = vweird.f32 %v5307_v37 }
 0x630   :  { %vm4635_vm3 = vmor %vm4633_vm2, %vm4634_vm1  ;;  %v4625_v13 = vor.u32 1.1754944e-38, %v4624_v46  ;;  %vm4623_vm9 = vcmp.eq.f32.partialorder %v4622_v53, 8.507059e+37 }
 0x631   :  { %v4630_v51 = vsub.f32 1.0, %v4629_v20 }
 0x633   :  { %v4631_v38 = vmul.f32 %v5307_v37, %v4630_v51 }
 0x634   :  { %v5309_v18 = vpop.eup %5308 }
 0x635   :  { %v4614_v4 = vmul.f32 %v5309_v18, %v4611_v49  ;;  %v4632_v42 = vadd.f32 %v5307_v37, %v4631_v38  ;;  %vm4619_vm4 = vweird.f32 %v5309_v18 }
 0x636   :  { %vm4620_vm7 = vmor %vm4618_vm6, %vm4619_vm4 }
 0x637   :  { %v4615_v63 = vsub.f32 1.0, %v4614_v4  ;;  %v4636_v30 = vsel %vm4635_vm3, %v5307_v37, %v4632_v42 }
 0x638   :  { %v4641_v17 = vsel %vm4638_vm5, %v4640_v55, %v4636_v30 }
 0x639   :  { %v4616_v61 = vmul.f32 %v5309_v18, %v4615_v63  ;;  %v4645_v24 = vrot.slane %v4641_v17, 7 }
 0x63b   :  { %v4617_v2 = vadd.f32 %v5309_v18, %v4616_v61 }
 0x63d   :  { %v4621_v31 = vsel %vm4620_vm7, %v5309_v18, %v4617_v2 }
 0x63e   :  { %v4626_v50 = vsel %vm4623_vm9, %v4625_v13, %v4621_v31 }
 0x63f   :  { %v4647_v23 = vsel %vm4646_vm8, %v4626_v50, %v4645_v24 }
 0x640   :  { %4653 = vst.msk [vmem:[#allocation3] sm:$0x3] %vm4651_vm10, %v4647_v23 }
 0x641   :  { %4664 = dma.vmem_to_hbm [thread:$0]  %s4660_s17, 32, %s4662_s20, [#allocation4]  }
 0x642   :  { %5334 = dma.done.wait [#allocation4], 32  }
 0x643   :  { %5335 = vsyncadd [#allocation4], 4294967264 }
 0x644   :  { %4669 = vsyncpa [#allocation4], 1 }

</bundles_post_ra>
